<compile_context>
chip_gen: v7x
topology: tpu7x:2x2x1
jax: 0.10.0
libtpu: 0.0.40
codegen_flags: <defaults>
</compile_context>

<pallas_src>
import functools

import jax
import jax.numpy as jnp
from jax.experimental import pallas as pl
from jax.experimental.pallas import tpu as pltpu

# ---- module hyper-parameters (small, consistent with the torch module) ----
NUM_ACTIONS = 20            # len(Buttons.ALL) in MineRL VPT
STATE_EMBEDDING_SIZE = 256  # "state_embedding_size" (default 1024, shrunk for the test)
BUTTON_FEATURES = 16
CAMERA_FEATURES = 16
EMBEDDER_LAYERS = 4

ACT_IN_PAD = 128            # lane-dense padded action-input width (buttons ++ camera ++ zeros)
ACT_EMB_PAD = 128           # lane-dense padded (btn_emb ++ cam_emb) width
MIN_TILE_M = 128            # minimum batch rows per grid step
MAX_TILE_M = 512            # VMEM stays < 4 MB even at 512 rows (fine on v5e/v6e/v7x)


def _choose_tile_m(batch):
    """Biggest tile (<=512) that still yields >=2 grid steps when B > 128 (v7x megacore)."""
    half = -(-batch // 2)                       # cdiv(B, 2)
    tile = -(-half // MIN_TILE_M) * MIN_TILE_M  # round up to a multiple of 128
    return max(MIN_TILE_M, min(MAX_TILE_M, tile))


def _dynamics_kernel(state_ref, act_ref,
                     wact_ref, bact_ref,
                     w0s_ref, w0bc_ref, b0_ref,
                     wst_ref, bst_ref,
                     out_ref):
    """One batch tile; weights resident in VMEM, bf16 matmuls, f32 accumulation."""
    f32 = jnp.float32
    bf16 = jnp.bfloat16

    # In-kernel cast of the f32 state stream (no wrapper-side astype HBM pass).
    x = state_ref[...].astype(bf16)

    # Fused button/camera embedder: single lane-dense [M,128]@[128,128] matmul on a
    # block-diagonal weight; padded rows/cols are zero, so the result equals
    # [ReLU(btn Linear) || ReLU(cam Linear) || 0].
    a = jnp.dot(act_ref[...], wact_ref[...], preferred_element_type=f32) + bact_ref[...]
    a = jnp.maximum(a, 0.0).astype(bf16)

    # First embedder Linear on concat(state, btn_emb, cam_emb) as a split matmul.
    # Keep the two dots back-to-back so the MXU result buffer accumulates them.
    h = (jnp.dot(x, w0s_ref[...], preferred_element_type=f32)
         + jnp.dot(a, w0bc_ref[...], preferred_element_type=f32)
         + b0_ref[...])

    # Embedder tail: EMBEDDER_LAYERS x (ReLU, Linear).
    for i in range(wst_ref.shape[0]):
        h = jnp.dot(jnp.maximum(h, 0.0).astype(bf16), wst_ref[i],
                    preferred_element_type=f32) + bst_ref[i]

    out_ref[...] = h.astype(out_ref.dtype)


def init_params(key,
                state_embedding_size=STATE_EMBEDDING_SIZE,
                button_features=BUTTON_FEATURES,
                camera_features=CAMERA_FEATURES,
                embedder_layers=EMBEDDER_LAYERS,
                num_actions=NUM_ACTIONS):
    """Deterministic synthetic parameters (same shapes as the torch module), pre-packed."""
    s = state_embedding_size
    concat = s + button_features + camera_features
    ks = jax.random.split(key, 4)

    def lin(k, fan_in, fan_out):
        kw, kb = jax.random.split(k)
        scale = 1.0 / jnp.sqrt(fan_in)
        w = jax.random.uniform(kw, (fan_in, fan_out), jnp.float32, -scale, scale)
        b = jax.random.uniform(kb, (1, fan_out), jnp.float32, -scale, scale)
        return w, b

    wb, bb = lin(ks[0], num_actions, button_features)      # (20,16)
    wc, bc = lin(ks[1], 2, camera_features)                 # (2,16)
    w0, b0 = lin(ks[2], concat, s)                          # (288,256)

    # Block-diagonal, lane-dense fused button/camera embedder weight.
    wact = jnp.zeros((ACT_IN_PAD, ACT_EMB_PAD), jnp.float32)
    wact = wact.at[:num_actions, :button_features].set(wb)
    wact = wact.at[num_actions:num_actions + 2,
                   button_features:button_features + camera_features].set(wc)
    bact = jnp.zeros((1, ACT_EMB_PAD), jnp.float32)
    bact = bact.at[:, :button_features].set(bb)
    bact = bact.at[:, button_features:button_features + camera_features].set(bc)

    # Split first embedder Linear: state part + zero-padded (button||camera) part.
    w0s = w0[:s]                                            # (256,256)
    w0bc = jnp.zeros((ACT_EMB_PAD, s), jnp.float32)
    w0bc = w0bc.at[:button_features + camera_features].set(w0[s:])

    w_list, b_list = [], []
    for k in jax.random.split(ks[3], embedder_layers):
        w, b = lin(k, s, s)
        w_list.append(w)
        b_list.append(b)
    w_stack = jnp.stack(w_list, axis=0)                     # (L, S, S)
    b_stack = jnp.stack(b_list, axis=0)                     # (L, 1, S)

    bf16 = jnp.bfloat16
    return dict(wact=wact.astype(bf16), bact=bact,
                w0s=w0s.astype(bf16), w0bc=w0bc.astype(bf16), b0=b0,
                w_stack=w_stack.astype(bf16), b_stack=b_stack)


@functools.partial(jax.jit, static_argnames=("out_dtype",))
def dynamics_forward(params, state_embedding, buttons_vector, camera_vector,
                     out_dtype=jnp.float32):
    """Pallas-backed equivalent of DynamicsFunction.forward (1-D or 2-D batched inputs)."""
    squeeze = state_embedding.ndim == 1
    state_embedding = jnp.atleast_2d(state_embedding)
    buttons_vector = jnp.atleast_2d(buttons_vector)
    camera_vector = jnp.atleast_2d(camera_vector)

    B, S = state_embedding.shape
    bf16 = jnp.bfloat16

    # Lane-dense packed action input: [B, 22] -> [B, 128] zero-padded.  The act
    # tensor is materialized here anyway, so it is emitted directly in bf16.
    act = jnp.concatenate([buttons_vector, camera_vector.reshape(B, -1)], axis=-1)
    act = jnp.pad(act, ((0, 0), (0, ACT_IN_PAD - act.shape[1]))).astype(bf16)

    tile_m = _choose_tile_m(B)
    n_tiles = pl.cdiv(B, tile_m)
    Bp = n_tiles * tile_m

    # State streams in as f32 (cast happens inside the kernel).  Pad batch rows
    # only when B is not a tile multiple.
    state_p = state_embedding
    act_p = act
    if Bp != B:
        state_p = jnp.pad(state_p, ((0, Bp - B), (0, 0)))
        act_p = jnp.pad(act_p, ((0, Bp - B), (0, 0)))

    L = params["w_stack"].shape[0]
    flops = 2 * Bp * (ACT_IN_PAD * ACT_EMB_PAD + ACT_EMB_PAD * S + S * S + L * S * S)
    weight_bytes = sum(int(v.size) * jnp.dtype(v.dtype).itemsize for v in params.values())
    bytes_accessed = (int(state_p.size) * 4 + int(act_p.size) * 2
                      + Bp * S * jnp.dtype(out_dtype).itemsize + weight_bytes)

    def resident(arr):
        # Constant index_map -> block stays resident in VMEM across grid steps.
        # (Weights total < 1 MB; default double-buffering is harmless, so we
        #  deliberately keep it instead of pl.Buffered(1).)
        ndim = arr.ndim
        return pl.BlockSpec(arr.shape, lambda i: (0,) * ndim)

    out = pl.pallas_call(
        _dynamics_kernel,
        out_shape=jax.ShapeDtypeStruct((Bp, S), out_dtype),
        grid=(n_tiles,),
        in_specs=[
            pl.BlockSpec((tile_m, S), lambda i: (i, 0)),            # state tile streams (f32)
            pl.BlockSpec((tile_m, ACT_IN_PAD), lambda i: (i, 0)),   # action tile streams (bf16)
            resident(params["wact"]), resident(params["bact"]),     # weights stay put
            resident(params["w0s"]), resident(params["w0bc"]), resident(params["b0"]),
            resident(params["w_stack"]), resident(params["b_stack"]),
        ],
        out_specs=pl.BlockSpec((tile_m, S), lambda i: (i, 0)),
        compiler_params=pltpu.CompilerParams(
            dimension_semantics=("parallel",)),
        cost_estimate=pl.CostEstimate(
            flops=flops, transcendentals=0, bytes_accessed=bytes_accessed),
    )(state_p, act_p,
      params["wact"], params["bact"],
      params["w0s"], params["w0bc"], params["b0"],
      params["w_stack"], params["b_stack"])

    out = out[:B]
    if squeeze:
        out = out[0]
    return out


def _reference_forward(params, state, buttons, camera):
    """Pure-JAX reference with the same bf16-weight / f32-accumulate math."""
    f32, bf16 = jnp.float32, jnp.bfloat16
    B = state.shape[0]
    act = jnp.concatenate([buttons, camera.reshape(B, -1)], axis=-1)
    act = jnp.pad(act, ((0, 0), (0, ACT_IN_PAD - act.shape[1]))).astype(bf16)
    a = jnp.maximum(
        jnp.dot(act, params["wact"], preferred_element_type=f32) + params["bact"], 0.0
    ).astype(bf16)
    h = (jnp.dot(state.astype(bf16), params["w0s"], preferred_element_type=f32)
         + jnp.dot(a, params["w0bc"], preferred_element_type=f32)
         + params["b0"])
    for i in range(params["w_stack"].shape[0]):
        h = jnp.dot(jnp.maximum(h, 0.0).astype(bf16), params["w_stack"][i],
                    preferred_element_type=f32) + params["b_stack"][i]
    return h


if __name__ == "__main__":
    key = jax.random.PRNGKey(0)
    kp, ks, kb, kc = jax.random.split(key, 4)

    params = init_params(kp)

    # Non-multiple of the tile -> exercises batch padding; 2 grid steps of 256 rows.
    B = 384
    state = jax.random.normal(ks, (B, STATE_EMBEDDING_SIZE), jnp.float32)
    # synthetic "vectorized" action inputs (what vectorize_minerl_action would produce)
    buttons = jax.nn.softmax(
        jax.random.normal(kb, (B, NUM_ACTIONS), jnp.float32), axis=-1)
    camera = jax.random.normal(kc, (B, 2), jnp.float32) / 180.0

    out = jax.block_until_ready(dynamics_forward(params, state, buttons, camera))
    ref = _reference_forward(params, state, buttons, camera)

    assert out.shape == (B, STATE_EMBEDDING_SIZE)
    assert out.dtype == jnp.float32
    assert jnp.allclose(out, ref, atol=1e-2, rtol=1e-2), "mismatch vs reference"

    print("KERNEL_OK")
</pallas_src>

<mosaic_0001>
module attributes {stable_mosaic.version = 11 : i64} {
  func.func @_dynamics_kernel(%arg0: i32, %arg1: memref<256x256xf32, #tpu.memory_space<vmem>>, %arg2: memref<256x128xbf16, #tpu.memory_space<vmem>>, %arg3: memref<128x128xbf16, #tpu.memory_space<vmem>>, %arg4: memref<1x128xf32, #tpu.memory_space<vmem>>, %arg5: memref<256x256xbf16, #tpu.memory_space<vmem>>, %arg6: memref<128x256xbf16, #tpu.memory_space<vmem>>, %arg7: memref<1x256xf32, #tpu.memory_space<vmem>>, %arg8: memref<4x256x256xbf16, #tpu.memory_space<vmem>>, %arg9: memref<4x1x256xf32, #tpu.memory_space<vmem>>, %arg10: memref<256x256xf32, #tpu.memory_space<vmem>>) attributes {dimension_semantics = [#tpu.dimension_semantics<parallel>], iteration_bounds = array<i64: 2>, scalar_prefetch = 0 : i64, scratch_operands = 0 : i64, tpu.core_type = #tpu.core_type<tc>, window_params = [{transform_indices = @transform_0, window_bounds = array<i64: 256, 256>}, {transform_indices = @transform_1, window_bounds = array<i64: 256, 128>}, {pipeline_mode = #tpu.pipeline_mode<synchronous>, transform_indices = @transform_2, window_bounds = array<i64: 128, 128>}, {pipeline_mode = #tpu.pipeline_mode<synchronous>, transform_indices = @transform_3, window_bounds = array<i64: 1, 128>}, {pipeline_mode = #tpu.pipeline_mode<synchronous>, transform_indices = @transform_4, window_bounds = array<i64: 256, 256>}, {pipeline_mode = #tpu.pipeline_mode<synchronous>, transform_indices = @transform_5, window_bounds = array<i64: 128, 256>}, {pipeline_mode = #tpu.pipeline_mode<synchronous>, transform_indices = @transform_6, window_bounds = array<i64: 1, 256>}, {pipeline_mode = #tpu.pipeline_mode<synchronous>, transform_indices = @transform_7, window_bounds = array<i64: 4, 256, 256>}, {pipeline_mode = #tpu.pipeline_mode<synchronous>, transform_indices = @transform_8, window_bounds = array<i64: 4, 1, 256>}, {transform_indices = @transform_9, window_bounds = array<i64: 256, 256>}]} {
    %c0 = arith.constant 0 : index
    %c0_0 = arith.constant 0 : index
    %0 = vector.load %arg1[%c0, %c0_0] : memref<256x256xf32, #tpu.memory_space<vmem>>, vector<256x256xf32>
    %1 = arith.truncf %0 : vector<256x256xf32> to vector<256x256xbf16>
    %c0_1 = arith.constant 0 : index
    %c0_2 = arith.constant 0 : index
    %2 = vector.load %arg2[%c0_1, %c0_2] : memref<256x128xbf16, #tpu.memory_space<vmem>>, vector<256x128xbf16>
    %c0_3 = arith.constant 0 : index
    %c0_4 = arith.constant 0 : index
    %3 = vector.load %arg3[%c0_3, %c0_4] : memref<128x128xbf16, #tpu.memory_space<vmem>>, vector<128x128xbf16>
    %cst = arith.constant dense<0.000000e+00> : vector<256x128xf32>
    %4 = tpu.matmul %2, %3, %cst {dimension_numbers = #tpu.dot_dimension_numbers<[1], [0], [0], [1], [0, 0, 1, 1], [], []>} : vector<256x128xbf16>, vector<128x128xbf16>, vector<256x128xf32> -> vector<256x128xf32>
    %c0_5 = arith.constant 0 : index
    %c0_6 = arith.constant 0 : index
    %5 = vector.load %arg4[%c0_5, %c0_6] : memref<1x128xf32, #tpu.memory_space<vmem>>, vector<1x128xf32>
    %6 = vector.broadcast %5 : vector<1x128xf32> to vector<256x128xf32>
    %7 = arith.addf %4, %6 : vector<256x128xf32>
    %cst_7 = arith.constant 0.000000e+00 : f32
    %8 = vector.broadcast %cst_7 : f32 to vector<256x128xf32>
    %9 = arith.maximumf %7, %8 : vector<256x128xf32>
    %10 = arith.truncf %9 : vector<256x128xf32> to vector<256x128xbf16>
    %c0_8 = arith.constant 0 : index
    %c0_9 = arith.constant 0 : index
    %11 = vector.load %arg5[%c0_8, %c0_9] : memref<256x256xbf16, #tpu.memory_space<vmem>>, vector<256x256xbf16>
    %cst_10 = arith.constant dense<0.000000e+00> : vector<256x256xf32>
    %12 = tpu.matmul %1, %11, %cst_10 {dimension_numbers = #tpu.dot_dimension_numbers<[1], [0], [0], [1], [0, 0, 1, 1], [], []>} : vector<256x256xbf16>, vector<256x256xbf16>, vector<256x256xf32> -> vector<256x256xf32>
    %c0_11 = arith.constant 0 : index
    %c0_12 = arith.constant 0 : index
    %13 = vector.load %arg6[%c0_11, %c0_12] : memref<128x256xbf16, #tpu.memory_space<vmem>>, vector<128x256xbf16>
    %cst_13 = arith.constant dense<0.000000e+00> : vector<256x256xf32>
    %14 = tpu.matmul %10, %13, %cst_13 {dimension_numbers = #tpu.dot_dimension_numbers<[1], [0], [0], [1], [0, 0, 1, 1], [], []>} : vector<256x128xbf16>, vector<128x256xbf16>, vector<256x256xf32> -> vector<256x256xf32>
    %15 = arith.addf %12, %14 : vector<256x256xf32>
    %c0_14 = arith.constant 0 : index
    %c0_15 = arith.constant 0 : index
    %16 = vector.load %arg7[%c0_14, %c0_15] : memref<1x256xf32, #tpu.memory_space<vmem>>, vector<1x256xf32>
    %17 = vector.broadcast %16 : vector<1x256xf32> to vector<256x256xf32>
    %18 = arith.addf %15, %17 : vector<256x256xf32>
    %cst_16 = arith.constant 0.000000e+00 : f32
    %19 = vector.broadcast %cst_16 : f32 to vector<256x256xf32>
    %20 = arith.maximumf %18, %19 : vector<256x256xf32>
    %21 = arith.truncf %20 : vector<256x256xf32> to vector<256x256xbf16>
    %c0_17 = arith.constant 0 : index
    %c0_18 = arith.constant 0 : index
    %c0_19 = arith.constant 0 : index
    %22 = vector.load %arg8[%c0_17, %c0_18, %c0_19] : memref<4x256x256xbf16, #tpu.memory_space<vmem>>, vector<1x256x256xbf16>
    %23 = vector.shape_cast %22 : vector<1x256x256xbf16> to vector<256x256xbf16>
    %cst_20 = arith.constant dense<0.000000e+00> : vector<256x256xf32>
    %24 = tpu.matmul %21, %23, %cst_20 {dimension_numbers = #tpu.dot_dimension_numbers<[1], [0], [0], [1], [0, 0, 1, 1], [], []>} : vector<256x256xbf16>, vector<256x256xbf16>, vector<256x256xf32> -> vector<256x256xf32>
    %c0_21 = arith.constant 0 : index
    %c0_22 = arith.constant 0 : index
    %c0_23 = arith.constant 0 : index
    %25 = vector.load %arg9[%c0_21, %c0_22, %c0_23] : memref<4x1x256xf32, #tpu.memory_space<vmem>>, vector<1x1x256xf32>
    %26 = vector.shape_cast %25 : vector<1x1x256xf32> to vector<1x256xf32>
    %27 = vector.broadcast %26 : vector<1x256xf32> to vector<256x256xf32>
    %28 = arith.addf %24, %27 : vector<256x256xf32>
    %cst_24 = arith.constant 0.000000e+00 : f32
    %29 = vector.broadcast %cst_24 : f32 to vector<256x256xf32>
    %30 = arith.maximumf %28, %29 : vector<256x256xf32>
    %31 = arith.truncf %30 : vector<256x256xf32> to vector<256x256xbf16>
    %c1 = arith.constant 1 : index
    %c0_25 = arith.constant 0 : index
    %c0_26 = arith.constant 0 : index
    %32 = vector.load %arg8[%c1, %c0_25, %c0_26] : memref<4x256x256xbf16, #tpu.memory_space<vmem>>, vector<1x256x256xbf16>
    %33 = vector.shape_cast %32 : vector<1x256x256xbf16> to vector<256x256xbf16>
    %cst_27 = arith.constant dense<0.000000e+00> : vector<256x256xf32>
    %34 = tpu.matmul %31, %33, %cst_27 {dimension_numbers = #tpu.dot_dimension_numbers<[1], [0], [0], [1], [0, 0, 1, 1], [], []>} : vector<256x256xbf16>, vector<256x256xbf16>, vector<256x256xf32> -> vector<256x256xf32>
    %c1_28 = arith.constant 1 : index
    %c0_29 = arith.constant 0 : index
    %c0_30 = arith.constant 0 : index
    %35 = vector.load %arg9[%c1_28, %c0_29, %c0_30] : memref<4x1x256xf32, #tpu.memory_space<vmem>>, vector<1x1x256xf32>
    %36 = vector.shape_cast %35 : vector<1x1x256xf32> to vector<1x256xf32>
    %37 = vector.broadcast %36 : vector<1x256xf32> to vector<256x256xf32>
    %38 = arith.addf %34, %37 : vector<256x256xf32>
    %cst_31 = arith.constant 0.000000e+00 : f32
    %39 = vector.broadcast %cst_31 : f32 to vector<256x256xf32>
    %40 = arith.maximumf %38, %39 : vector<256x256xf32>
    %41 = arith.truncf %40 : vector<256x256xf32> to vector<256x256xbf16>
    %c2 = arith.constant 2 : index
    %c0_32 = arith.constant 0 : index
    %c0_33 = arith.constant 0 : index
    %42 = vector.load %arg8[%c2, %c0_32, %c0_33] : memref<4x256x256xbf16, #tpu.memory_space<vmem>>, vector<1x256x256xbf16>
    %43 = vector.shape_cast %42 : vector<1x256x256xbf16> to vector<256x256xbf16>
    %cst_34 = arith.constant dense<0.000000e+00> : vector<256x256xf32>
    %44 = tpu.matmul %41, %43, %cst_34 {dimension_numbers = #tpu.dot_dimension_numbers<[1], [0], [0], [1], [0, 0, 1, 1], [], []>} : vector<256x256xbf16>, vector<256x256xbf16>, vector<256x256xf32> -> vector<256x256xf32>
    %c2_35 = arith.constant 2 : index
    %c0_36 = arith.constant 0 : index
    %c0_37 = arith.constant 0 : index
    %45 = vector.load %arg9[%c2_35, %c0_36, %c0_37] : memref<4x1x256xf32, #tpu.memory_space<vmem>>, vector<1x1x256xf32>
    %46 = vector.shape_cast %45 : vector<1x1x256xf32> to vector<1x256xf32>
    %47 = vector.broadcast %46 : vector<1x256xf32> to vector<256x256xf32>
    %48 = arith.addf %44, %47 : vector<256x256xf32>
    %cst_38 = arith.constant 0.000000e+00 : f32
    %49 = vector.broadcast %cst_38 : f32 to vector<256x256xf32>
    %50 = arith.maximumf %48, %49 : vector<256x256xf32>
    %51 = arith.truncf %50 : vector<256x256xf32> to vector<256x256xbf16>
    %c3 = arith.constant 3 : index
    %c0_39 = arith.constant 0 : index
    %c0_40 = arith.constant 0 : index
    %52 = vector.load %arg8[%c3, %c0_39, %c0_40] : memref<4x256x256xbf16, #tpu.memory_space<vmem>>, vector<1x256x256xbf16>
    %53 = vector.shape_cast %52 : vector<1x256x256xbf16> to vector<256x256xbf16>
    %cst_41 = arith.constant dense<0.000000e+00> : vector<256x256xf32>
    %54 = tpu.matmul %51, %53, %cst_41 {dimension_numbers = #tpu.dot_dimension_numbers<[1], [0], [0], [1], [0, 0, 1, 1], [], []>} : vector<256x256xbf16>, vector<256x256xbf16>, vector<256x256xf32> -> vector<256x256xf32>
    %c3_42 = arith.constant 3 : index
    %c0_43 = arith.constant 0 : index
    %c0_44 = arith.constant 0 : index
    %55 = vector.load %arg9[%c3_42, %c0_43, %c0_44] : memref<4x1x256xf32, #tpu.memory_space<vmem>>, vector<1x1x256xf32>
    %56 = vector.shape_cast %55 : vector<1x1x256xf32> to vector<1x256xf32>
    %57 = vector.broadcast %56 : vector<1x256xf32> to vector<256x256xf32>
    %58 = arith.addf %54, %57 : vector<256x256xf32>
    %c0_45 = arith.constant 0 : index
    %c0_46 = arith.constant 0 : index
    %59 = vector.load %arg10[%c0_45, %c0_46] : memref<256x256xf32, #tpu.memory_space<vmem>>, vector<256x256xf32>
    tpu.vector_store %arg10[%c0_45, %c0_46], %58 {strides = array<i32>} : memref<256x256xf32, #tpu.memory_space<vmem>>, vector<256x256xf32>,
    return
  }
  func.func @transform_0(%arg0: i32) -> (i32, i32) {
    %c0_i32 = arith.constant 0 : i32
    %c0_i32_0 = arith.constant 0 : i32
    return %arg0, %c0_i32 : i32, i32
  }
  func.func @transform_1(%arg0: i32) -> (i32, i32) {
    %c0_i32 = arith.constant 0 : i32
    %c0_i32_0 = arith.constant 0 : i32
    return %arg0, %c0_i32 : i32, i32
  }
  func.func @transform_2(%arg0: i32) -> (i32, i32) {
    %c0_i32 = arith.constant 0 : i32
    %c0_i32_0 = arith.constant 0 : i32
    %c0_i32_1 = arith.constant 0 : i32
    return %c0_i32, %c0_i32_0 : i32, i32
  }
  func.func @transform_3(%arg0: i32) -> (i32, i32) {
    %c0_i32 = arith.constant 0 : i32
    %c0_i32_0 = arith.constant 0 : i32
    %c0_i32_1 = arith.constant 0 : i32
    return %c0_i32, %c0_i32_0 : i32, i32
  }
  func.func @transform_4(%arg0: i32) -> (i32, i32) {
    %c0_i32 = arith.constant 0 : i32
    %c0_i32_0 = arith.constant 0 : i32
    %c0_i32_1 = arith.constant 0 : i32
    return %c0_i32, %c0_i32_0 : i32, i32
  }
  func.func @transform_5(%arg0: i32) -> (i32, i32) {
    %c0_i32 = arith.constant 0 : i32
    %c0_i32_0 = arith.constant 0 : i32
    %c0_i32_1 = arith.constant 0 : i32
    return %c0_i32, %c0_i32_0 : i32, i32
  }
  func.func @transform_6(%arg0: i32) -> (i32, i32) {
    %c0_i32 = arith.constant 0 : i32
    %c0_i32_0 = arith.constant 0 : i32
    %c0_i32_1 = arith.constant 0 : i32
    return %c0_i32, %c0_i32_0 : i32, i32
  }
  func.func @transform_7(%arg0: i32) -> (i32, i32, i32) {
    %c0_i32 = arith.constant 0 : i32
    %c0_i32_0 = arith.constant 0 : i32
    %c0_i32_1 = arith.constant 0 : i32
    %c0_i32_2 = arith.constant 0 : i32
    return %c0_i32, %c0_i32_0, %c0_i32_1 : i32, i32, i32
  }
  func.func @transform_8(%arg0: i32) -> (i32, i32, i32) {
    %c0_i32 = arith.constant 0 : i32
    %c0_i32_0 = arith.constant 0 : i32
    %c0_i32_1 = arith.constant 0 : i32
    %c0_i32_2 = arith.constant 0 : i32
    return %c0_i32, %c0_i32_0, %c0_i32_1 : i32, i32, i32
  }
  func.func @transform_9(%arg0: i32) -> (i32, i32) {
    %c0_i32 = arith.constant 0 : i32
    %c0_i32_0 = arith.constant 0 : i32
    return %arg0, %c0_i32 : i32, i32
  }
}

</mosaic_0001>

<bundles_post_ra>
// kernel: dynamics_forward.1
= control target key start
LH: loop header
LB: loop body
LE: loop exit
PB: predicated region body
PF: predicated region fallthrough
CT: control target
= control target key end

     0   :  { %s4571_s30 = smov 0   ;;  %s5741_s0 = inlined_call_operand.vmem [shape: f32[512,256], index: 0, kind: input, shape index: {}]   ;;  %s5742_s1 = inlined_call_operand.vmem [shape: bf16[512,128], index: 1, kind: input, shape index: {}]   ;;  %s5743_s2 = inlined_call_operand.vmem [shape: bf16[128,128], index: 2, kind: input, shape index: {}]   ;;  %s5744_s3 = inlined_call_operand.vmem [shape: f32[1,128], index: 3, kind: input, shape index: {}]   ;;  %s5745_s4 = inlined_call_operand.vmem [shape: bf16[256,256], index: 4, kind: input, shape index: {}]   ;;  %s5746_s5 = inlined_call_operand.vmem [shape: bf16[128,256], index: 5, kind: input, shape index: {}]   ;;  %s5747_s6 = inlined_call_operand.vmem [shape: f32[1,256], index: 6, kind: input, shape index: {}]   ;;  %s5748_s7 = inlined_call_operand.vmem [shape: bf16[4,256,256], index: 7, kind: input, shape index: {}]   ;;  %s5749_s8 = inlined_call_operand.vmem [shape: f32[4,1,256], index: 8, kind: input, shape index: {}]   ;;  %s5750_s9 = inlined_call_operand.vmem [shape: f32[512,256], index: 9, kind: output, shape index: {}]  }
   0x1 LB: > { %s3730_s10 = sadd.s32 4294967295, %s4518_s30   ;;  %p3734_p0 = scmp.ge.s32.totalorder %s4518_s30, 1  ;;  %s4518_s30 = sphi %s4571_s30, %s19_s30  }
   0x2   : > { %p300_p1 = scmp.lt.s32.totalorder %s4518_s30, 3 }
   0x4   : > { %p301_p2 = pnand %p3734_p0, %p300_p1 }
   0x5   : > { %v4224_v0 = vld [vmem:[%s5743_s2] sm:$0xff] (!%p301_p2)   ;;  %s3735_s13 = sshll.u32 (!%p301_p2), %s3730_s10, 5  ;;  %v4225_v1 = vld [vmem:[%s5743_s2 + $0x8] sm:$0xff] (!%p301_p2)   ;;  %v4226_v2 = vld [vmem:[%s5743_s2 + $0x10] sm:$0xff] (!%p301_p2)   ;;  %v4520_v41 = vmov (!%p301_p2), 0  }
   0x6   : > { %304 = sbr.rel (%p301_p2) target bundleno = 1613 (0x64d), region = 56  ;;  %p344_p3 = scmp.lt.s32.totalorder (!%p301_p2), %s3735_s13, 63  ;;  %4071 = vmatprep.subr.bf16.mxu0 (!%p301_p2), %v4224_v0  ;;  %v4227_v3 = vld [vmem:[%s5743_s2 + $0x18] sm:$0xff] (!%p301_p2)   ;;  %v4228_v5 = vld [vmem:[%s5743_s2 + $0x20] sm:$0xff] (!%p301_p2)   ;;  %v4229_v6 = vld [vmem:[%s5743_s2 + $0x28] sm:$0xff] (!%p301_p2)   ;;  %1028 = vmatprep.mubr.bf16.mxu1 (!%p301_p2), %v4520_v41 }
   0x7   : > { %4072 = vmatpush3.bf16.msra.mxu0 (!%p301_p2), %v4224_v0  ;;  %v4230_v7 = vld [vmem:[%s5743_s2 + $0x30] sm:$0xff] (!%p301_p2)   ;;  %v4231_v8 = vld [vmem:[%s5743_s2 + $0x38] sm:$0xff] (!%p301_p2)   ;;  %v4248_v9 = vld [vmem:[%s5746_s5 + $0x4] ss:$8 sps:$4 sm:$0xff] (!%p301_p2)  }
   0x8   : > { %4073 = vmatprep.subr.bf16.mxu0 (!%p301_p2), %v4225_v1  ;;  %v4250_v10 = vld [vmem:[%s5746_s5] ss:$8 sps:$4 sm:$0xff] (!%p301_p2)   ;;  %996 = vmatprep.subr.bf16.mxu1 (!%p301_p2), %v4248_v9  ;;  %v4251_v11 = vld [vmem:[%s5746_s5 + $0x14] ss:$8 sps:$4 sm:$0xff] (!%p301_p2)   ;;  %v4253_v12 = vld [vmem:[%s5746_s5 + $0x10] ss:$8 sps:$4 sm:$0xff] (!%p301_p2)  }
   0x9   : > { %997 = vmatpush1.bf16.msra.mxu1 (!%p301_p2), %v4250_v10  ;;  %v4254_v13 = vld [vmem:[%s5746_s5 + $0x24] ss:$8 sps:$4 sm:$0xff] (!%p301_p2)   ;;  %v4256_v16 = vld [vmem:[%s5746_s5 + $0x20] ss:$8 sps:$4 sm:$0xff] (!%p301_p2)   ;;  %v4257_v17 = vld [vmem:[%s5746_s5 + $0x34] ss:$8 sps:$4 sm:$0xff] (!%p301_p2)  }
   0xa   : > { %998 = vmatprep.subr.bf16.mxu1 (!%p301_p2), %v4251_v11  ;;  %v4259_v18 = vld [vmem:[%s5746_s5 + $0x30] ss:$8 sps:$4 sm:$0xff] (!%p301_p2)   ;;  %v4260_v19 = vld [vmem:[%s5746_s5 + $0x44] ss:$8 sps:$4 sm:$0xff] (!%p301_p2)   ;;  %v4262_v22 = vld [vmem:[%s5746_s5 + $0x40] ss:$8 sps:$4 sm:$0xff] (!%p301_p2)  }
   0xb   : > { %4074 = vmatpush3.bf16.msra.mxu0 (!%p301_p2), %v4225_v1  ;;  %v4263_v23 = vld [vmem:[%s5746_s5 + $0x54] ss:$8 sps:$4 sm:$0xff] (!%p301_p2)   ;;  %v4265_v24 = vld [vmem:[%s5746_s5 + $0x50] ss:$8 sps:$4 sm:$0xff] (!%p301_p2)   ;;  %v4266_v36 = vld [vmem:[%s5746_s5 + $0x64] ss:$8 sps:$4 sm:$0xff] (!%p301_p2)  }
   0xc   : > { %4075 = vmatprep.subr.bf16.mxu0 (!%p301_p2), %v4226_v2  ;;  %v4268_v37 = vld [vmem:[%s5746_s5 + $0x60] ss:$8 sps:$4 sm:$0xff] (!%p301_p2)   ;;  %v4269_v38 = vld [vmem:[%s5746_s5 + $0x74] ss:$8 sps:$4 sm:$0xff] (!%p301_p2)   ;;  %v4271_v39 = vld [vmem:[%s5746_s5 + $0x70] ss:$8 sps:$4 sm:$0xff] (!%p301_p2)  }
   0xd   : > { %s5752_s13 = smov (!%p344_p3, %s3735_s13), 63  ;;  %999 = vmatpush1.bf16.msra.mxu1 %v4253_v12  ;;  %v4274_v40 = vld [vmem:[%s5745_s4 + $0x4] ss:$8 sps:$4 sm:$0xff]   ;;  %v4682_v42 = vld [vmem:[%s5744_s3] ss:$0 sm:$0xff] }
   0xe   : > { %s3739_s18 = sshll.u32 %s5752_s13, 2  ;;  %1000 = vmatprep.subr.bf16.mxu1 %v4254_v13  ;;  %v4272_v56 = vld [vmem:[%s5745_s4] ss:$8 sps:$4 sm:$0xff]   ;;  %v4277_v59 = vld [vmem:[%s5745_s4 + $0x14] ss:$8 sps:$4 sm:$0xff]   ;;  %s4045_s17 = sshll.u32 %s5752_s13, 4 }
   0xf   : > { %s4597_s23 = scalar_lea.vmem %s5742_s1, %s3739_s18  ;;  %4076 = vmatpush3.bf16.msra.mxu0 %v4226_v2  ;;  %v4278_v10 = vld [vmem:[%s5745_s4 + $0x20] ss:$8 sps:$4 sm:$0xff]   ;;  %v4283_v13 = vld [vmem:[%s5745_s4 + $0x34] ss:$8 sps:$4 sm:$0xff]   ;;  %s4847_s20 = scalar_lea.vmem %s5741_s0, %s4045_s17 }
  0x10   : > { %v4232_v4 = vld [vmem:[%s4597_s23] sm:$0xff]   ;;  %4077 = vmatprep.subr.bf16.mxu0 %v4227_v3  ;;  %v4233_v14 = vld [vmem:[%s4597_s23 + $0x8] sm:$0xff]   ;;  %v4234_v15 = vld [vmem:[%s4597_s23 + $0x10] sm:$0xff]   ;;  %s5608_s22 = scalar_lea.vmem %s5750_s9, %s4045_s17 }
  0x11   : > { %4087 = vmatprep.mubr.bf16.mxu0 %v4232_v4  ;;  %1001 = vmatpush1.bf16.msra.mxu1 %v4256_v16  ;;  %v4235_v20 = vld [vmem:[%s4597_s23 + $0x18] sm:$0xff]   ;;  %v4236_v21 = vld [vmem:[%s4597_s23 + $0x20] sm:$0xff]   ;;  %v4237_v25 = vld [vmem:[%s4597_s23 + $0x28] sm:$0xff]  }
  0x12   : > { %1002 = vmatprep.subr.bf16.mxu1 %v4257_v17  ;;  %v4238_v26 = vld [vmem:[%s4597_s23 + $0x30] sm:$0xff]   ;;  %v4239_v27 = vld [vmem:[%s4597_s23 + $0x38] sm:$0xff]   ;;  %v4240_v28 = vld [vmem:[%s4597_s23 + $0x40] sm:$0xff]  }
  0x13   : > { %4078 = vmatpush3.bf16.msra.mxu0 %v4227_v3  ;;  %v4241_v29 = vld [vmem:[%s4597_s23 + $0x48] sm:$0xff]   ;;  %v4242_v30 = vld [vmem:[%s4597_s23 + $0x50] sm:$0xff]   ;;  %v4243_v31 = vld [vmem:[%s4597_s23 + $0x58] sm:$0xff]  }
  0x14   : > { %4079 = vmatprep.subr.bf16.mxu0 %v4228_v5  ;;  %v4244_v32 = vld [vmem:[%s4597_s23 + $0x60] sm:$0xff]   ;;  %v4245_v33 = vld [vmem:[%s4597_s23 + $0x68] sm:$0xff]   ;;  %v4246_v34 = vld [vmem:[%s4597_s23 + $0x70] sm:$0xff]  }
  0x15   : > { %1003 = vmatpush1.bf16.msra.mxu1 %v4259_v18  ;;  %v4247_v35 = vld [vmem:[%s4597_s23 + $0x78] sm:$0xff]  }
  0x16   : > { %1004 = vmatprep.subr.bf16.mxu1 %v4260_v19  ;;  %v4275_v3 = vld [vmem:[%s5745_s4 + $0x10] ss:$8 sps:$4 sm:$0xff]  }
  0x17   : > { %4080 = vmatpush3.bf16.msra.mxu0 %v4228_v5 }
  0x18   : > { %4081 = vmatprep.subr.bf16.mxu0 %v4229_v6 }
  0x19   : > { %1005 = vmatpush1.bf16.msra.mxu1 %v4262_v22 }
  0x1a   : > { %1006 = vmatprep.subr.bf16.mxu1 %v4263_v23 }
  0x1b   : > { %4082 = vmatpush3.bf16.msra.mxu0 %v4229_v6  ;;  %v4280_v6 = vld [vmem:[%s5745_s4 + $0x24] ss:$8 sps:$4 sm:$0xff]  }
  0x1c   : > { %4083 = vmatprep.subr.bf16.mxu0 %v4230_v7 }
  0x1d   : > { %1007 = vmatpush1.bf16.msra.mxu1 %v4265_v24  ;;  %v4286_v24 = vld [vmem:[%s5745_s4 + $0x44] ss:$8 sps:$4 sm:$0xff]  }
  0x1e   : > { %1008 = vmatprep.subr.bf16.mxu1 %v4266_v36 }
  0x1f   : > { %4084 = vmatpush3.bf16.msra.mxu0 %v4230_v7 }
  0x20   : > { %4085 = vmatprep.subr.bf16.mxu0 %v4231_v8 }
  0x21   : > { %1009 = vmatpush1.bf16.msra.mxu1 %v4268_v37 }
  0x22   : > { %1010 = vmatprep.subr.bf16.mxu1 %v4269_v38 }
  0x23   : > { %4086 = vmatpush3.bf16.msra.mxu0 %v4231_v8 }
  0x25   : > { %1011 = vmatpush1.bf16.msra.mxu1 %v4271_v39  ;;  %v4287_v39 = vld [vmem:[%s5745_s4 + $0x50] ss:$8 sps:$4 sm:$0xff]  }
  0x26   : > { %4088 = vmatmul.mubr.bf16.vlgmr.msra.gmra.mrb[0].mxu0 %v4233_v14  ;;  %1349 = vmatprep.subr.bf16.mxu1 %v4274_v40 }
  0x27   : > { %4091 = vmatprep.mubr.bf16.mxu0 %v4234_v15 }
  0x2e   : > { %4092 = vmatmul.mubr.bf16.gmra.mrb[4].mxu0 %v4235_v20 }
  0x2f   : > { %4095 = vmatprep.mubr.bf16.mxu0 %v4236_v21  ;;  %v4281_v21 = vld [vmem:[%s5745_s4 + $0x30] ss:$8 sps:$4 sm:$0xff]  }
  0x36   : > { %4096 = vmatmul.mubr.bf16.gmra.mrb[8].mxu0 %v4237_v25 }
  0x37   : > { %4099 = vmatprep.mubr.bf16.mxu0 %v4238_v26 }
  0x3e   : > { %4100 = vmatmul.mubr.bf16.gmra.mrb[12].mxu0 %v4239_v27 }
  0x3f   : > { %4103 = vmatprep.mubr.bf16.mxu0 %v4240_v28  ;;  %v4284_v28 = vld [vmem:[%s5745_s4 + $0x40] ss:$8 sps:$4 sm:$0xff]  }
  0x46   : > { %4104 = vmatmul.mubr.bf16.gmra.mrb[16].mxu0 %v4241_v29 }
  0x47   : > { %4107 = vmatprep.mubr.bf16.mxu0 %v4242_v30 }
  0x4e   : > { %4108 = vmatmul.mubr.bf16.gmra.mrb[20].mxu0 %v4243_v31  ;;  %v4289_v31 = vld [vmem:[%s5745_s4 + $0x54] ss:$8 sps:$4 sm:$0xff]  }
  0x4f   : > { %4111 = vmatprep.mubr.bf16.mxu0 %v4244_v32 }
  0x56   : > { %4112 = vmatmul.mubr.bf16.gmra.mrb[24].mxu0 %v4245_v33 }
  0x57   : > { %4115 = vmatprep.mubr.bf16.mxu0 %v4246_v34 }
  0x5e   : > { %4116 = vmatmul.mubr.bf16.gmra.mrb[28].mxu0 %v4247_v35 }
  0xf9   : > { %v4089_v43 = vpop.f32.mrb[0].mxu0 }
  0xfa   : > { %v702_v44 = vadd.f32 %v4089_v43, %v4682_v42  ;;  %v693_v45 = vpop.f32.mrb[1].mxu0 }
  0xfb   : > { %v694_v46 = vadd.f32 %v4682_v42, %v693_v45  ;;  %v4090_v47 = vpop.f32.mrb[2].mxu0 }
  0xfc   : > { %v705_v48 = vadd.f32 %v4090_v47, %v4682_v42  ;;  %v696_v49 = vpop.f32.mrb[3].mxu0  ;;  %v822_v51 = vmax.f32 %v702_v44, 0.0  ;;  %v4292_v44 = vld [vmem:[%s5745_s4 + $0x64] ss:$8 sps:$4 sm:$0xff]  }
  0xfd   : > { %v697_v50 = vadd.f32 %v4682_v42, %v696_v49  ;;  %v820_v53 = vmax.f32 %v694_v46, 0.0 }
  0xfe   : > { %v823_v52 = vmax.f32 %v705_v48, 0.0  ;;  %v4290_v48 = vld [vmem:[%s5745_s4 + $0x60] ss:$8 sps:$4 sm:$0xff]  }
  0xff   : > { %v821_v54 = vmax.f32 %v697_v50, 0.0 }
 0x100   : > { %v853_v55 = vpack.c.bf16 %v823_v52, %v822_v51  ;;  %v4295_v51 = vld [vmem:[%s5745_s4 + $0x74] ss:$8 sps:$4 sm:$0xff]  }
 0x101   : > { %v852_v57 = vpack.c.bf16 %v821_v54, %v820_v53  ;;  %v4093_v58 = vpop.f32.mrb[4].mxu0 }
 0x102   : > { %v718_v60 = vadd.f32 %v4093_v58, %v4682_v42  ;;  %v709_v61 = vpop.f32.mrb[5].mxu0 }
 0x103   : > { %1029 = vmatmul.mubr.bf16.vlgmr.msra.gmra.mrb[0].mxu1 %v852_v57  ;;  %v710_v62 = vadd.f32 %v4682_v42, %v709_v61  ;;  %v4094_v63 = vpop.f32.mrb[6].mxu0 }
 0x104   : > { %1350 = vmatpush1.bf16.msra.mxu1 %v4272_v56  ;;  %v826_v0 = vmax.f32 %v718_v60, 0.0  ;;  %v721_v1 = vadd.f32 %v4094_v63, %v4682_v42  ;;  %v712_v2 = vpop.f32.mrb[7].mxu0  ;;  %1038 = vmatprep.mubr.bf16.mxu1 %v4520_v41 }
 0x105   : > { %v824_v4 = vmax.f32 %v710_v62, 0.0  ;;  %v713_v5 = vadd.f32 %v4682_v42, %v712_v2  ;;  %1351 = vmatprep.subr.bf16.mxu1 %v4277_v59  ;;  %v4293_v59 = vld [vmem:[%s5745_s4 + $0x70] ss:$8 sps:$4 sm:$0xff]   ;;  %v4298_v62 = vld [vmem:[%s5745_s4 + $0x84] ss:$8 sps:$4 sm:$0xff]  }
 0x106   : > { %v827_v7 = vmax.f32 %v721_v1, 0.0  ;;  %v4296_v2 = vld [vmem:[%s5745_s4 + $0x80] ss:$8 sps:$4 sm:$0xff]  }
 0x107   : > { %v825_v8 = vmax.f32 %v713_v5, 0.0  ;;  %v4301_v5 = vld [vmem:[%s5745_s4 + $0x94] ss:$8 sps:$4 sm:$0xff]  }
 0x108   : > { %v855_v9 = vpack.c.bf16 %v827_v7, %v826_v0  ;;  %1352 = vmatpush1.bf16.msra.mxu1 %v4275_v3 }
 0x109   : > { %v854_v11 = vpack.c.bf16 %v825_v8, %v824_v4  ;;  %1353 = vmatprep.subr.bf16.mxu1 %v4280_v6  ;;  %v4097_v12 = vpop.f32.mrb[8].mxu0 }
 0x10a   : > { %v734_v14 = vadd.f32 %v4097_v12, %v4682_v42  ;;  %v725_v15 = vpop.f32.mrb[9].mxu0 }
 0x10b   : > { %1039 = vmatmul.mubr.bf16.gmra.mrb[4].mxu1 %v853_v55  ;;  %v726_v16 = vadd.f32 %v4682_v42, %v725_v15  ;;  %v4098_v17 = vpop.f32.mrb[10].mxu0 }
 0x10c   : > { %1048 = vmatprep.mubr.bf16.mxu1 %v4520_v41  ;;  %1354 = vmatpush1.bf16.msra.mxu1 %v4278_v10  ;;  %v830_v18 = vmax.f32 %v734_v14, 0.0  ;;  %v737_v19 = vadd.f32 %v4098_v17, %v4682_v42  ;;  %v728_v20 = vpop.f32.mrb[11].mxu0 }
 0x10d   : > { %v828_v22 = vmax.f32 %v726_v16, 0.0  ;;  %v729_v23 = vadd.f32 %v4682_v42, %v728_v20  ;;  %1355 = vmatprep.subr.bf16.mxu1 %v4283_v13  ;;  %v4299_v13 = vld [vmem:[%s5745_s4 + $0x90] ss:$8 sps:$4 sm:$0xff]   ;;  %v4304_v16 = vld [vmem:[%s5745_s4 + $0xa4] ss:$8 sps:$4 sm:$0xff]  }
 0x10e   : > { %v831_v25 = vmax.f32 %v737_v19, 0.0  ;;  %v4302_v20 = vld [vmem:[%s5745_s4 + $0xa0] ss:$8 sps:$4 sm:$0xff]  }
 0x10f   : > { %v829_v26 = vmax.f32 %v729_v23, 0.0  ;;  %v4307_v23 = vld [vmem:[%s5745_s4 + $0xb4] ss:$8 sps:$4 sm:$0xff]  }
 0x110   : > { %v4722_v27 = vpack.c.bf16 %v831_v25, %v830_v18  ;;  %1356 = vmatpush1.bf16.msra.mxu1 %v4281_v21 }
 0x111   : > { %v856_v29 = vpack.c.bf16 %v829_v26, %v828_v22  ;;  %1357 = vmatprep.subr.bf16.mxu1 %v4286_v24  ;;  %v4101_v30 = vpop.f32.mrb[12].mxu0 }
 0x112   : > { %v750_v32 = vadd.f32 %v4101_v30, %v4682_v42  ;;  %v741_v33 = vpop.f32.mrb[13].mxu0 }
 0x113   : > { %1049 = vmatmul.mubr.bf16.gmra.mrb[8].mxu1 %v854_v11  ;;  %v742_v34 = vadd.f32 %v4682_v42, %v741_v33  ;;  %v4102_v35 = vpop.f32.mrb[14].mxu0 }
 0x114   : > { %1058 = vmatprep.mubr.bf16.mxu1 %v4520_v41  ;;  %1358 = vmatpush1.bf16.msra.mxu1 %v4284_v28  ;;  %v834_v36 = vmax.f32 %v750_v32, 0.0  ;;  %v753_v37 = vadd.f32 %v4102_v35, %v4682_v42  ;;  %v744_v38 = vpop.f32.mrb[15].mxu0  ;;  %v4305_v32 = vld [vmem:[%s5745_s4 + $0xb0] ss:$8 sps:$4 sm:$0xff]  }
 0x115   : > { %v832_v40 = vmax.f32 %v742_v34, 0.0  ;;  %v745_v43 = vadd.f32 %v4682_v42, %v744_v38  ;;  %1359 = vmatprep.subr.bf16.mxu1 %v4289_v31  ;;  %v4308_v38 = vld [vmem:[%s5745_s4 + $0xc0] ss:$8 sps:$4 sm:$0xff]  }
 0x116   : > { %v835_v45 = vmax.f32 %v753_v37, 0.0 }
 0x117   : > { %v833_v46 = vmax.f32 %v745_v43, 0.0  ;;  %v4313_v43 = vld [vmem:[%s5745_s4 + $0xd4] ss:$8 sps:$4 sm:$0xff]  }
 0x118   : > { %v4741_v47 = vpack.c.bf16 %v835_v45, %v834_v36  ;;  %1360 = vmatpush1.bf16.msra.mxu1 %v4287_v39 }
 0x119   : > { %v4746_v49 = vpack.c.bf16 %v833_v46, %v832_v40  ;;  %1361 = vmatprep.subr.bf16.mxu1 %v4292_v44  ;;  %v4105_v50 = vpop.f32.mrb[16].mxu0 }
 0x11a   : > { %v766_v52 = vadd.f32 %v4105_v50, %v4682_v42  ;;  %v757_v53 = vpop.f32.mrb[17].mxu0 }
 0x11b   : > { %1059 = vmatmul.mubr.bf16.gmra.mrb[12].mxu1 %v855_v9  ;;  %v758_v54 = vadd.f32 %v4682_v42, %v757_v53  ;;  %v4106_v55 = vpop.f32.mrb[18].mxu0  ;;  %v4311_v53 = vld [vmem:[%s5745_s4 + $0xd0] ss:$8 sps:$4 sm:$0xff]  }
 0x11c   : > { %1068 = vmatprep.mubr.bf16.mxu1 %v4520_v41  ;;  %1362 = vmatpush1.bf16.msra.mxu1 %v4290_v48  ;;  %v838_v56 = vmax.f32 %v766_v52, 0.0  ;;  %v769_v57 = vadd.f32 %v4106_v55, %v4682_v42  ;;  %v760_v58 = vpop.f32.mrb[19].mxu0 }
 0x11d   : > { %v836_v60 = vmax.f32 %v758_v54, 0.0  ;;  %v761_v61 = vadd.f32 %v4682_v42, %v760_v58  ;;  %1363 = vmatprep.subr.bf16.mxu1 %v4295_v51 }
 0x11e   : > { %v839_v63 = vmax.f32 %v769_v57, 0.0 }
 0x11f   : > { %v837_v0 = vmax.f32 %v761_v61, 0.0  ;;  %v4319_v61 = vld [vmem:[%s5745_s4 + $0xf4] ss:$8 sps:$4 sm:$0xff]  }
 0x120   : > { %v4762_v1 = vpack.c.bf16 %v839_v63, %v838_v56  ;;  %1364 = vmatpush1.bf16.msra.mxu1 %v4293_v59  ;;  %v4314_v59 = vld [vmem:[%s5745_s4 + $0xe0] ss:$8 sps:$4 sm:$0xff]  }
 0x121   : > { %v4767_v3 = vpack.c.bf16 %v837_v0, %v836_v60  ;;  %1365 = vmatprep.subr.bf16.mxu1 %v4298_v62  ;;  %v4109_v4 = vpop.f32.mrb[20].mxu0  ;;  %v367_v62 = vld [vmem:[%s4847_s20 + $0x18] sm:$0xff]  ;;  %v4320_v0 = vld [vmem:[%s5748_s7] ss:$8 sps:$4 sm:$0xff]  }
 0x122   : > { %v782_v6 = vadd.f32 %v4109_v4, %v4682_v42  ;;  %v773_v7 = vpop.f32.mrb[21].mxu0  ;;  %v4325_v4 = vld [vmem:[%s5748_s7 + $0x14] ss:$8 sps:$4 sm:$0xff]  }
 0x123   : > { %1069 = vmatmul.mubr.bf16.gmra.mrb[16].mxu1 %v856_v29  ;;  %v774_v8 = vadd.f32 %v4682_v42, %v773_v7  ;;  %v4110_v9 = vpop.f32.mrb[22].mxu0 }
 0x124   : > { %1078 = vmatprep.mubr.bf16.mxu1 %v4520_v41  ;;  %1366 = vmatpush1.bf16.msra.mxu1 %v4296_v2  ;;  %v842_v10 = vmax.f32 %v782_v6, 0.0  ;;  %v785_v11 = vadd.f32 %v4110_v9, %v4682_v42  ;;  %v776_v12 = vpop.f32.mrb[23].mxu0  ;;  %v364_v2 = vld [vmem:[%s4847_s20] sm:$0xff]  ;;  %v4323_v6 = vld [vmem:[%s5748_s7 + $0x10] ss:$8 sps:$4 sm:$0xff]  }
 0x125   : > { %v840_v14 = vmax.f32 %v774_v8, 0.0  ;;  %v777_v15 = vadd.f32 %v4682_v42, %v776_v12  ;;  %1367 = vmatprep.subr.bf16.mxu1 %v4301_v5  ;;  %v371_v5 = vld [vmem:[%s4847_s20 + $0x38] sm:$0xff]  ;;  %v4328_v8 = vld [vmem:[%s5748_s7 + $0x24] ss:$8 sps:$4 sm:$0xff]  }
 0x126   : > { %v843_v17 = vmax.f32 %v785_v11, 0.0  ;;  %v4331_v11 = vld [vmem:[%s5748_s7 + $0x34] ss:$8 sps:$4 sm:$0xff]   ;;  %v368_v12 = vld [vmem:[%s4847_s20 + $0x20] sm:$0xff] }
 0x127   : > { %v841_v18 = vmax.f32 %v777_v15, 0.0  ;;  %v375_v15 = vld [vmem:[%s4847_s20 + $0x58] sm:$0xff] }
 0x128   : > { %v4783_v19 = vpack.c.bf16 %v843_v17, %v842_v10  ;;  %1368 = vmatpush1.bf16.msra.mxu1 %v4299_v13  ;;  %v4326_v10 = vld [vmem:[%s5748_s7 + $0x20] ss:$8 sps:$4 sm:$0xff]   ;;  %v370_v13 = vld [vmem:[%s4847_s20 + $0x30] sm:$0xff] }
 0x129   : > { %v862_v21 = vpack.c.bf16 %v841_v18, %v840_v14  ;;  %1369 = vmatprep.subr.bf16.mxu1 %v4304_v16  ;;  %v4113_v22 = vpop.f32.mrb[24].mxu0  ;;  %v373_v14 = vld [vmem:[%s4847_s20 + $0x48] sm:$0xff]  ;;  %v4329_v16 = vld [vmem:[%s5748_s7 + $0x30] ss:$8 sps:$4 sm:$0xff]   ;;  %v430_v17 = vpack.c.bf16 %v370_v13, %v368_v12 }
 0x12a   : > { %v798_v24 = vadd.f32 %v4113_v22, %v4682_v42  ;;  %v789_v25 = vpop.f32.mrb[25].mxu0  ;;  %v4334_v18 = vld [vmem:[%s5748_s7 + $0x44] ss:$8 sps:$4 sm:$0xff]   ;;  %v398_v12 = vld [vmem:[%s4847_s20 + $0x110] sm:$0xff] }
 0x12b   : > { %1079 = vmatmul.mubr.bf16.gmra.mrb[20].mxu1 %v4722_v27  ;;  %v790_v26 = vadd.f32 %v4682_v42, %v789_v25  ;;  %v4114_v28 = vpop.f32.mrb[26].mxu0  ;;  %v4310_v27 = vld [vmem:[%s5745_s4 + $0xc4] ss:$8 sps:$4 sm:$0xff]   ;;  %v379_v25 = vld [vmem:[%s4847_s20 + $0x78] sm:$0xff] }
 0x12c   : > { %1088 = vmatprep.mubr.bf16.mxu1 %v4520_v41  ;;  %1370 = vmatpush1.bf16.msra.mxu1 %v4302_v20  ;;  %v846_v29 = vmax.f32 %v798_v24, 0.0  ;;  %v801_v30 = vadd.f32 %v4114_v28, %v4682_v42  ;;  %v792_v31 = vpop.f32.mrb[27].mxu0  ;;  %v4332_v20 = vld [vmem:[%s5748_s7 + $0x40] ss:$8 sps:$4 sm:$0xff]  }
 0x12d   : > { %v844_v33 = vmax.f32 %v790_v26, 0.0  ;;  %v793_v34 = vadd.f32 %v4682_v42, %v792_v31  ;;  %1371 = vmatprep.subr.bf16.mxu1 %v4307_v23  ;;  %v372_v22 = vld [vmem:[%s4847_s20 + $0x40] sm:$0xff]  ;;  %v374_v23 = vld [vmem:[%s4847_s20 + $0x50] sm:$0xff]  ;;  %v377_v24 = vld [vmem:[%s4847_s20 + $0x68] sm:$0xff] }
 0x12e   : > { %v847_v35 = vmax.f32 %v801_v30, 0.0  ;;  %v4335_v26 = vld [vmem:[%s5748_s7 + $0x50] ss:$8 sps:$4 sm:$0xff]   ;;  %v432_v28 = vpack.c.bf16 %v374_v23, %v372_v22  ;;  %v435_v30 = vpack.c.bf16 %v379_v25, %v377_v24  ;;  %v4338_v31 = vld [vmem:[%s5748_s7 + $0x60] ss:$8 sps:$4 sm:$0xff]  }
 0x12f   : > { %v845_v36 = vmax.f32 %v793_v34, 0.0  ;;  %v378_v34 = vld [vmem:[%s4847_s20 + $0x70] sm:$0xff]  ;;  %v401_v13 = vld [vmem:[%s4847_s20 + $0x128] sm:$0xff]  ;;  %v404_v23 = vld [vmem:[%s4847_s20 + $0x140] sm:$0xff] }
 0x130   : > { %v865_v37 = vpack.c.bf16 %v847_v35, %v846_v29  ;;  %1372 = vmatpush1.bf16.msra.mxu1 %v4305_v32  ;;  %v4340_v29 = vld [vmem:[%s5748_s7 + $0x64] ss:$8 sps:$4 sm:$0xff]   ;;  %v4343_v32 = vld [vmem:[%s5748_s7 + $0x74] ss:$8 sps:$4 sm:$0xff]  }
 0x131   : > { %v864_v39 = vpack.c.bf16 %v845_v36, %v844_v33  ;;  %1373 = vmatprep.subr.bf16.mxu1 %v4310_v27  ;;  %v4117_v40 = vpop.f32.mrb[28].mxu0  ;;  %v376_v33 = vld [vmem:[%s4847_s20 + $0x60] sm:$0xff]  ;;  %v381_v27 = vld [vmem:[%s4847_s20 + $0x88] sm:$0xff]  ;;  %v383_v35 = vld [vmem:[%s4847_s20 + $0x98] sm:$0xff] }
 0x132   : > { %v814_v44 = vadd.f32 %v4117_v40, %v4682_v42  ;;  %v805_v45 = vpop.f32.mrb[29].mxu0  ;;  %v4341_v36 = vld [vmem:[%s5748_s7 + $0x70] ss:$8 sps:$4 sm:$0xff]   ;;  %v4344_v40 = vld [vmem:[%s5748_s7 + $0x80] ss:$8 sps:$4 sm:$0xff]  }
 0x133   : > { %1089 = vmatmul.mubr.bf16.gmra.mrb[24].mxu1 %v4746_v49  ;;  %v806_v46 = vadd.f32 %v4682_v42, %v805_v45  ;;  %v4118_v48 = vpop.f32.mrb[30].mxu0  ;;  %v4316_v49 = vld [vmem:[%s5745_s4 + $0xe4] ss:$8 sps:$4 sm:$0xff]   ;;  %v382_v45 = vld [vmem:[%s4847_s20 + $0x90] sm:$0xff] }
 0x134   : > { %1098 = vmatprep.mubr.bf16.mxu1 %v4520_v41  ;;  %1374 = vmatpush1.bf16.msra.mxu1 %v4308_v38  ;;  %v850_v50 = vmax.f32 %v814_v44, 0.0  ;;  %v817_v51 = vadd.f32 %v4118_v48, %v4682_v42  ;;  %v808_v52 = vpop.f32.mrb[31].mxu0  ;;  %v4346_v38 = vld [vmem:[%s5748_s7 + $0x84] ss:$8 sps:$4 sm:$0xff]   ;;  %v387_v48 = vld [vmem:[%s4847_s20 + $0xb8] sm:$0xff]  ;;  %v406_v24 = vld [vmem:[%s4847_s20 + $0x150] sm:$0xff] }
 0x135   : > { %v848_v54 = vmax.f32 %v806_v46, 0.0  ;;  %v809_v55 = vadd.f32 %v4682_v42, %v808_v52  ;;  %1375 = vmatprep.subr.bf16.mxu1 %v4313_v43  ;;  %v4317_v42 = vld [vmem:[%s5745_s4 + $0xf0] ss:$8 sps:$4 sm:$0xff]   ;;  %v4349_v43 = vld [vmem:[%s5748_s7 + $0x94] ss:$8 sps:$4 sm:$0xff]   ;;  %v380_v44 = vld [vmem:[%s4847_s20 + $0x80] sm:$0xff] }
 0x136   : > { %v851_v56 = vmax.f32 %v817_v51, 0.0  ;;  %v385_v46 = vld [vmem:[%s4847_s20 + $0xa8] sm:$0xff]  ;;  %v436_v51 = vpack.c.bf16 %v382_v45, %v380_v44  ;;  %v419_v44 = vld [vmem:[%s4847_s20 + $0x1b8] sm:$0xff] }
 0x137   : > { %v849_v57 = vmax.f32 %v809_v55, 0.0  ;;  %v4352_v52 = vld [vmem:[%s5748_s7 + $0xa4] ss:$8 sps:$4 sm:$0xff]   ;;  %v4355_v55 = vld [vmem:[%s5748_s7 + $0xb4] ss:$8 sps:$4 sm:$0xff]  }
 0x138   : > { %v867_v58 = vpack.c.bf16 %v851_v56, %v850_v50  ;;  %1376 = vmatpush1.bf16.msra.mxu1 %v4311_v53  ;;  %v4347_v50 = vld [vmem:[%s5748_s7 + $0x90] ss:$8 sps:$4 sm:$0xff]   ;;  %v439_v53 = vpack.c.bf16 %v387_v48, %v385_v46  ;;  %v409_v25 = vld [vmem:[%s4847_s20 + $0x168] sm:$0xff]  ;;  %v416_v48 = vld [vmem:[%s4847_s20 + $0x1a0] sm:$0xff] }
 0x139   : > { %v866_v60 = vpack.c.bf16 %v849_v57, %v848_v54  ;;  %1377 = vmatprep.subr.bf16.mxu1 %v4316_v49  ;;  %v4350_v54 = vld [vmem:[%s5748_s7 + $0xa0] ss:$8 sps:$4 sm:$0xff]   ;;  %v386_v56 = vld [vmem:[%s4847_s20 + $0xb0] sm:$0xff] }
 0x13a   : > { %v384_v49 = vld [vmem:[%s4847_s20 + $0xa0] sm:$0xff]  ;;  %v389_v57 = vld [vmem:[%s4847_s20 + $0xc8] sm:$0xff] }
 0x13b   : > { %1099 = vmatmul.mubr.bf16.gmra.mrb[28].mxu1 %v4741_v47  ;;  %v365_v47 = vld [vmem:[%s4847_s20 + $0x8] sm:$0xff] }
 0x13c   : > { %1108 = vmatprep.mubr.bf16.mxu1 %v4520_v41  ;;  %1378 = vmatpush1.bf16.msra.mxu1 %v4314_v59  ;;  %v429_v63 = vpack.c.bf16 %v367_v62, %v365_v47  ;;  %v4353_v59 = vld [vmem:[%s5748_s7 + $0xb0] ss:$8 sps:$4 sm:$0xff]   ;;  %v4356_v47 = vld [vmem:[%s5748_s7 + $0xc0] ss:$8 sps:$4 sm:$0xff]   ;;  %v4361_v62 = vld [vmem:[%s5748_s7 + $0xd4] ss:$8 sps:$4 sm:$0xff]  }
 0x13d   : > { %1379 = vmatprep.subr.bf16.mxu1 %v4319_v61  ;;  %v4358_v61 = vld [vmem:[%s5748_s7 + $0xc4] ss:$8 sps:$4 sm:$0xff]  }
 0x140   : > { %1380 = vmatpush1.bf16.msra.mxu1 %v4317_v42 }
 0x143   : > { %1109 = vmatmul.mubr.bf16.gmra.mrb[32].mxu1 %v4767_v3  ;;  %v366_v3 = vld [vmem:[%s4847_s20 + $0x10] sm:$0xff] }
 0x144   : > { %1118 = vmatprep.mubr.bf16.mxu1 %v4520_v41  ;;  %v428_v7 = vpack.c.bf16 %v366_v3, %v364_v2  ;;  %v395_v2 = vld [vmem:[%s4847_s20 + $0xf8] sm:$0xff] }
 0x145   : > { %v4359_v3 = vld [vmem:[%s5748_s7 + $0xd0] ss:$8 sps:$4 sm:$0xff]  }
 0x14b   : > { %1119 = vmatmul.mubr.bf16.gmra.mrb[36].mxu1 %v4762_v1  ;;  %v4322_v1 = vld [vmem:[%s5748_s7 + $0x4] ss:$8 sps:$4 sm:$0xff]  }
 0x14c   : > { %1128 = vmatprep.mubr.bf16.mxu1 %v4520_v41  ;;  %1918 = vmatprep.subr.bf16.mxu0 %v4322_v1  ;;  %v393_v1 = vld [vmem:[%s4847_s20 + $0xe8] sm:$0xff] }
 0x14d   : > { %1919 = vmatpush1.bf16.msra.mxu0 %v4320_v0  ;;  %v390_v0 = vld [vmem:[%s4847_s20 + $0xd0] sm:$0xff] }
 0x14e   : > { %1920 = vmatprep.subr.bf16.mxu0 %v4325_v4 }
 0x151   : > { %1921 = vmatpush1.bf16.msra.mxu0 %v4323_v6  ;;  %v394_v6 = vld [vmem:[%s4847_s20 + $0xf0] sm:$0xff] }
 0x152   : > { %1922 = vmatprep.subr.bf16.mxu0 %v4328_v8  ;;  %v399_v8 = vld [vmem:[%s4847_s20 + $0x118] sm:$0xff] }
 0x153   : > { %1129 = vmatmul.mubr.bf16.gmra.mrb[40].mxu1 %v862_v21  ;;  %v4337_v21 = vld [vmem:[%s5748_s7 + $0x54] ss:$8 sps:$4 sm:$0xff]  }
 0x154   : > { %1138 = vmatprep.mubr.bf16.mxu1 %v4520_v41 }
 0x155   : > { %1923 = vmatpush1.bf16.msra.mxu0 %v4326_v10 }
 0x156   : > { %1924 = vmatprep.subr.bf16.mxu0 %v4331_v11  ;;  %v396_v11 = vld [vmem:[%s4847_s20 + $0x100] sm:$0xff] }
 0x159   : > { %1925 = vmatpush1.bf16.msra.mxu0 %v4329_v16 }
 0x15a   : > { %1926 = vmatprep.subr.bf16.mxu0 %v4334_v18  ;;  %v402_v18 = vld [vmem:[%s4847_s20 + $0x130] sm:$0xff] }
 0x15b   : > { %1139 = vmatmul.mubr.bf16.gmra.mrb[44].mxu1 %v4783_v19  ;;  %v433_v19 = vpack.c.bf16 %v375_v15, %v373_v14  ;;  %v403_v14 = vld [vmem:[%s4847_s20 + $0x138] sm:$0xff]  ;;  %v444_v15 = vpack.c.bf16 %v398_v12, %v396_v11 }
 0x15c   : > { %1148 = vmatprep.mubr.bf16.mxu1 %v4520_v41  ;;  %v447_v16 = vpack.c.bf16 %v403_v14, %v401_v13 }
 0x15d   : > { %1927 = vmatpush1.bf16.msra.mxu0 %v4332_v20  ;;  %v407_v20 = vld [vmem:[%s4847_s20 + $0x158] sm:$0xff] }
 0x15e   : > { %1928 = vmatprep.subr.bf16.mxu0 %v4337_v21 }
 0x161   : > { %1929 = vmatpush1.bf16.msra.mxu0 %v4335_v26  ;;  %v411_v26 = vld [vmem:[%s4847_s20 + $0x178] sm:$0xff] }
 0x162   : > { %1930 = vmatprep.subr.bf16.mxu0 %v4340_v29  ;;  %v451_v29 = vpack.c.bf16 %v411_v26, %v409_v25 }
 0x163   : > { %1149 = vmatmul.mubr.bf16.gmra.mrb[48].mxu1 %v864_v39  ;;  %v437_v39 = vpack.c.bf16 %v383_v35, %v381_v27  ;;  %v4364_v27 = vld [vmem:[%s5748_s7 + $0xe4] ss:$8 sps:$4 sm:$0xff]  }
 0x164   : > { %1158 = vmatprep.mubr.bf16.mxu1 %v4520_v41 }
 0x165   : > { %1931 = vmatpush1.bf16.msra.mxu0 %v4338_v31  ;;  %v410_v31 = vld [vmem:[%s4847_s20 + $0x170] sm:$0xff] }
 0x166   : > { %1932 = vmatprep.subr.bf16.mxu0 %v4343_v32  ;;  %v413_v32 = vld [vmem:[%s4847_s20 + $0x188] sm:$0xff] }
 0x169   : > { %1933 = vmatpush1.bf16.msra.mxu0 %v4341_v36  ;;  %v4362_v36 = vld [vmem:[%s5748_s7 + $0xe0] ss:$8 sps:$4 sm:$0xff]  }
 0x16a   : > { %1934 = vmatprep.subr.bf16.mxu0 %v4346_v38  ;;  %v412_v38 = vld [vmem:[%s4847_s20 + $0x180] sm:$0xff] }
 0x16b   : > { %1159 = vmatmul.mubr.bf16.gmra.mrb[52].mxu1 %v865_v37  ;;  %v434_v37 = vpack.c.bf16 %v378_v34, %v376_v33  ;;  %v415_v33 = vld [vmem:[%s4847_s20 + $0x198] sm:$0xff] }
 0x16c   : > { %1168 = vmatprep.mubr.bf16.mxu1 %v4520_v41  ;;  %v453_v35 = vpack.c.bf16 %v415_v33, %v413_v32  ;;  %v4376_v32 = vld [vmem:[%s5748_s7 + $0x124] ss:$8 sps:$4 sm:$0xff]  }
 0x16d   : > { %1935 = vmatpush1.bf16.msra.mxu0 %v4344_v40  ;;  %v4365_v40 = vld [vmem:[%s5748_s7 + $0xf0] ss:$8 sps:$4 sm:$0xff]  }
 0x16e   : > { %1936 = vmatprep.subr.bf16.mxu0 %v4349_v43  ;;  %v417_v43 = vld [vmem:[%s4847_s20 + $0x1a8] sm:$0xff] }
 0x16f   : > { %v455_v46 = vpack.c.bf16 %v419_v44, %v417_v43 }
 0x171   : > { %1937 = vmatpush1.bf16.msra.mxu0 %v4347_v50  ;;  %v418_v50 = vld [vmem:[%s4847_s20 + $0x1b0] sm:$0xff] }
 0x172   : > { %1938 = vmatprep.subr.bf16.mxu0 %v4352_v52  ;;  %v423_v52 = vld [vmem:[%s4847_s20 + $0x1d8] sm:$0xff] }
 0x173   : > { %1169 = vmatmul.mubr.bf16.gmra.mrb[56].mxu1 %v866_v60  ;;  %v438_v60 = vpack.c.bf16 %v386_v56, %v384_v49  ;;  %v422_v49 = vld [vmem:[%s4847_s20 + $0x1d0] sm:$0xff]  ;;  %v425_v56 = vld [vmem:[%s4847_s20 + $0x1e8] sm:$0xff] }
 0x174   : > { %1178 = vmatprep.mubr.bf16.mxu1 %v4520_v41  ;;  %v369_v41 = vld [vmem:[%s4847_s20 + $0x28] sm:$0xff] }
 0x175   : > { %v431_v9 = vpack.c.bf16 %v371_v5, %v369_v41  ;;  %1939 = vmatpush1.bf16.msra.mxu0 %v4350_v54  ;;  %v443_v41 = vpack.c.bf16 %v395_v2, %v393_v1  ;;  %v392_v5 = vld [vmem:[%s4847_s20 + $0xe0] sm:$0xff] }
 0x176   : > { %1940 = vmatprep.subr.bf16.mxu0 %v4355_v55  ;;  %v420_v55 = vld [vmem:[%s4847_s20 + $0x1c0] sm:$0xff] }
 0x177   : > { %v1542_v1 = vld [vmem:[%s5747_s6] sm:$0x3] }
 0x179   : > { %1941 = vmatpush1.bf16.msra.mxu0 %v4353_v59 }
 0x17a   : > { %1942 = vmatprep.subr.bf16.mxu0 %v4358_v61  ;;  %v426_v61 = vld [vmem:[%s4847_s20 + $0x1f0] sm:$0xff] }
 0x17b   : > { %1179 = vmatmul.mubr.bf16.gmra.mrb[60].mxu1 %v867_v58  ;;  %v391_v58 = vld [vmem:[%s4847_s20 + $0xd8] sm:$0xff] }
 0x17c   : > { %1381 = vmatprep.mubr.bf16.mxu1 %v429_v63  ;;  %v441_v42 = vpack.c.bf16 %v391_v58, %v389_v57  ;;  %v388_v63 = vld [vmem:[%s4847_s20 + $0xc0] sm:$0xff]  ;;  %v427_v57 = vld [vmem:[%s4847_s20 + $0x1f8] sm:$0xff]  ;;  %v456_v58 = vpack.c.bf16 %v422_v49, %v420_v55 }
 0x17d   : > { %1943 = vmatpush1.bf16.msra.mxu0 %v4356_v47  ;;  %v440_v4 = vpack.c.bf16 %v390_v0, %v388_v63  ;;  %v459_v59 = vpack.c.bf16 %v427_v57, %v425_v56  ;;  %v4370_v47 = vld [vmem:[%s5748_s7 + $0x104] ss:$8 sps:$4 sm:$0xff]  }
 0x17e   : > { %1944 = vmatprep.subr.bf16.mxu0 %v4361_v62  ;;  %v1544_v62 = vlaneseq }
 0x180   : > { %v1545_v63 = vshrl.u32 %v1544_v62, 7 }
 0x181   : > { %1945 = vmatpush1.bf16.msra.mxu0 %v4359_v3 }
 0x182   : > { %1946 = vmatprep.subr.bf16.mxu0 %v4364_v27  ;;  %v5013_v0 = vsub.s32 0, %v1545_v63  ;;  %v5018_v2 = vsub.s32 1, %v1545_v63 }
 0x183   : > { %1382 = vmatmul.mubr.bf16.vlgmr.msra.gmra.mrb[0].mxu1 %v428_v7  ;;  %v397_v7 = vld [vmem:[%s4847_s20 + $0x108] sm:$0xff] }
 0x184   : > { %1391 = vmatprep.mubr.bf16.mxu1 %v431_v9  ;;  %v442_v9 = vpack.c.bf16 %v394_v6, %v392_v5  ;;  %v445_v10 = vpack.c.bf16 %v399_v8, %v397_v7  ;;  %v5021_v3 = vrot.slane %v1542_v1, %v5013_v0 }
 0x185   : > { %1947 = vmatpush1.bf16.msra.mxu0 %v4362_v36 }
 0x18b   : > { %1392 = vmatmul.mubr.bf16.gmra.mrb[4].mxu1 %v430_v17  ;;  %v400_v17 = vld [vmem:[%s4847_s20 + $0x120] sm:$0xff] }
 0x18c   : > { %1401 = vmatprep.mubr.bf16.mxu1 %v433_v19  ;;  %v405_v19 = vld [vmem:[%s4847_s20 + $0x148] sm:$0xff]  ;;  %v446_v21 = vpack.c.bf16 %v402_v18, %v400_v17 }
 0x18d   : > { %v449_v22 = vpack.c.bf16 %v407_v20, %v405_v19  ;;  %v4368_v19 = vld [vmem:[%s5748_s7 + $0x100] ss:$8 sps:$4 sm:$0xff]  }
 0x193   : > { %1402 = vmatmul.mubr.bf16.gmra.mrb[8].mxu1 %v432_v28  ;;  %v448_v28 = vpack.c.bf16 %v406_v24, %v404_v23 }
 0x194   : > { %1411 = vmatprep.mubr.bf16.mxu1 %v435_v30  ;;  %v408_v30 = vld [vmem:[%s4847_s20 + $0x160] sm:$0xff] }
 0x195   : > { %v450_v34 = vpack.c.bf16 %v410_v31, %v408_v30 }
 0x19b   : > { %1412 = vmatmul.mubr.bf16.gmra.mrb[12].mxu1 %v434_v37  ;;  %v4367_v37 = vld [vmem:[%s5748_s7 + $0xf4] ss:$8 sps:$4 sm:$0xff]  }
 0x19c   : > { %1421 = vmatprep.mubr.bf16.mxu1 %v437_v39  ;;  %v414_v39 = vld [vmem:[%s4847_s20 + $0x190] sm:$0xff]  ;;  %1948 = vmatprep.subr.bf16.mxu0 %v4367_v37  ;;  %v4374_v37 = vld [vmem:[%s5748_s7 + $0x120] ss:$8 sps:$4 sm:$0xff]  }
 0x19d   : > { %1949 = vmatpush1.bf16.msra.mxu0 %v4365_v40  ;;  %v452_v45 = vpack.c.bf16 %v414_v39, %v412_v38  ;;  %v4379_v40 = vld [vmem:[%s5748_s7 + $0x134] ss:$8 sps:$4 sm:$0xff]  }
 0x19e   : > { %2413 = vmatprep.subr.bf16.mxu0 %v4370_v47 }
 0x1a3   : > { %1422 = vmatmul.mubr.bf16.gmra.mrb[16].mxu1 %v436_v51  ;;  %v421_v51 = vld [vmem:[%s4847_s20 + $0x1c8] sm:$0xff] }
 0x1a4   : > { %1431 = vmatprep.mubr.bf16.mxu1 %v439_v53  ;;  %v454_v53 = vpack.c.bf16 %v418_v50, %v416_v48  ;;  %v457_v54 = vpack.c.bf16 %v423_v52, %v421_v51  ;;  %v4377_v50 = vld [vmem:[%s5748_s7 + $0x130] ss:$8 sps:$4 sm:$0xff]  }
 0x1ab   : > { %1432 = vmatmul.mubr.bf16.gmra.mrb[20].mxu1 %v438_v60  ;;  %v424_v60 = vld [vmem:[%s4847_s20 + $0x1e0] sm:$0xff] }
 0x1ac   : > { %1441 = vmatprep.mubr.bf16.mxu1 %v441_v42  ;;  %v458_v42 = vpack.c.bf16 %v426_v61, %v424_v60  ;;  %v4385_v61 = vld [vmem:[%s5748_s7 + $0x154] ss:$8 sps:$4 sm:$0xff]  }
 0x1b3   : > { %1442 = vmatmul.mubr.bf16.gmra.mrb[24].mxu1 %v440_v4  ;;  %v5024_v4 = vrot.slane %v1542_v1, %v5018_v2 }
 0x1b4   : > { %1451 = vmatprep.mubr.bf16.mxu1 %v443_v41 }
 0x1bb   : > { %1452 = vmatmul.mubr.bf16.gmra.mrb[28].mxu1 %v442_v9 }
 0x1bc   : > { %1461 = vmatprep.mubr.bf16.mxu1 %v445_v10 }
 0x1c3   : > { %1462 = vmatmul.mubr.bf16.gmra.mrb[32].mxu1 %v444_v15 }
 0x1c4   : > { %1471 = vmatprep.mubr.bf16.mxu1 %v447_v16 }
 0x1cb   : > { %1472 = vmatmul.mubr.bf16.gmra.mrb[36].mxu1 %v446_v21 }
 0x1cc   : > { %1481 = vmatprep.mubr.bf16.mxu1 %v449_v22  ;;  %v4373_v22 = vld [vmem:[%s5748_s7 + $0x114] ss:$8 sps:$4 sm:$0xff]  }
 0x1d3   : > { %1482 = vmatmul.mubr.bf16.gmra.mrb[40].mxu1 %v448_v28 }
 0x1d4   : > { %1491 = vmatprep.mubr.bf16.mxu1 %v451_v29  ;;  %v4371_v29 = vld [vmem:[%s5748_s7 + $0x110] ss:$8 sps:$4 sm:$0xff]  }
 0x1db   : > { %1492 = vmatmul.mubr.bf16.gmra.mrb[44].mxu1 %v450_v34 }
 0x1dc   : > { %1501 = vmatprep.mubr.bf16.mxu1 %v453_v35 }
 0x1e3   : > { %1502 = vmatmul.mubr.bf16.gmra.mrb[48].mxu1 %v452_v45 }
 0x1e4   : > { %1511 = vmatprep.mubr.bf16.mxu1 %v455_v46 }
 0x1eb   : > { %1512 = vmatmul.mubr.bf16.gmra.mrb[52].mxu1 %v454_v53  ;;  %v4382_v53 = vld [vmem:[%s5748_s7 + $0x144] ss:$8 sps:$4 sm:$0xff]  }
 0x1ec   : > { %1521 = vmatprep.mubr.bf16.mxu1 %v457_v54 }
 0x1f3   : > { %1522 = vmatmul.mubr.bf16.gmra.mrb[56].mxu1 %v456_v58  ;;  %v4380_v58 = vld [vmem:[%s5748_s7 + $0x140] ss:$8 sps:$4 sm:$0xff]  }
 0x1f4   : > { %1531 = vmatprep.mubr.bf16.mxu1 %v459_v59 }
 0x1fb   : > { %1532 = vmatmul.mubr.bf16.gmra.mrb[60].mxu1 %v458_v42 }
 0x256   : > { %v1383_v41 = vpop.f32.mrb[0].mxu1 }
 0x257   : > { %v1554_v5 = vadd.f32 %v5021_v3, %v1383_v41  ;;  %v1385_v6 = vpop.f32.mrb[1].mxu1  ;;  %v4383_v41 = vld [vmem:[%s5748_s7 + $0x150] ss:$8 sps:$4 sm:$0xff]  }
 0x258   : > { %v1555_v7 = vadd.f32 %v5024_v4, %v1385_v6  ;;  %v1387_v8 = vpop.f32.mrb[2].mxu1 }
 0x259   : > { %v1556_v9 = vadd.f32 %v5021_v3, %v1387_v8  ;;  %v1389_v10 = vpop.f32.mrb[3].mxu1  ;;  %v1618_v12 = vmax.f32 %v1554_v5, 0.0 }
 0x25a   : > { %v1557_v11 = vadd.f32 %v5024_v4, %v1389_v10  ;;  %v1619_v14 = vmax.f32 %v1555_v7, 0.0  ;;  %v4388_v7 = vld [vmem:[%s5748_s7 + $0x164] ss:$8 sps:$4 sm:$0xff]  }
 0x25b   : > { %v1620_v13 = vmax.f32 %v1556_v9, 0.0 }
 0x25c   : > { %v1621_v15 = vmax.f32 %v1557_v11, 0.0 }
 0x25d   : > { %v1682_v16 = vpack.c.bf16 %v1620_v13, %v1618_v12  ;;  %v4386_v13 = vld [vmem:[%s5748_s7 + $0x160] ss:$8 sps:$4 sm:$0xff]  }
 0x25e   : > { %v1683_v17 = vpack.c.bf16 %v1621_v15, %v1619_v14  ;;  %v1393_v18 = vpop.f32.mrb[4].mxu1 }
 0x25f   : > { %v1558_v20 = vadd.f32 %v5021_v3, %v1393_v18  ;;  %v1395_v21 = vpop.f32.mrb[5].mxu1 }
 0x260   : > { %v1559_v23 = vadd.f32 %v5024_v4, %v1395_v21  ;;  %v1397_v24 = vpop.f32.mrb[6].mxu1  ;;  %1950 = vmatprep.mubr.bf16.mxu0 %v1683_v17 }
 0x261   : > { %v1560_v25 = vadd.f32 %v5021_v3, %v1397_v24  ;;  %v1399_v26 = vpop.f32.mrb[7].mxu1  ;;  %1951 = vmatmul.mubr.bf16.vlgmr.msra.gmra.mrb[32].mxu0 %v1682_v16  ;;  %v1622_v30 = vmax.f32 %v1558_v20, 0.0  ;;  %v4391_v16 = vld [vmem:[%s5748_s7 + $0x174] ss:$8 sps:$4 sm:$0xff]  }
 0x262   : > { %v1561_v28 = vadd.f32 %v5024_v4, %v1399_v26  ;;  %2414 = vmatpush1.bf16.msra.mxu0 %v4368_v19  ;;  %v1623_v33 = vmax.f32 %v1559_v23, 0.0 }
 0x263   : > { %v1624_v31 = vmax.f32 %v1560_v25, 0.0  ;;  %2415 = vmatprep.subr.bf16.mxu0 %v4373_v22  ;;  %v4389_v22 = vld [vmem:[%s5748_s7 + $0x170] ss:$8 sps:$4 sm:$0xff]   ;;  %v4394_v25 = vld [vmem:[%s5748_s7 + $0x184] ss:$8 sps:$4 sm:$0xff]  }
 0x264   : > { %v1625_v34 = vmax.f32 %v1561_v28, 0.0 }
 0x265   : > { %v1684_v27 = vpack.c.bf16 %v1624_v31, %v1622_v30 }
 0x266   : > { %v1685_v35 = vpack.c.bf16 %v1625_v34, %v1623_v33  ;;  %v1403_v36 = vpop.f32.mrb[8].mxu1  ;;  %2416 = vmatpush1.bf16.msra.mxu0 %v4371_v29 }
 0x267   : > { %v1562_v38 = vadd.f32 %v5021_v3, %v1403_v36  ;;  %v1405_v39 = vpop.f32.mrb[9].mxu1  ;;  %2417 = vmatprep.subr.bf16.mxu0 %v4376_v32  ;;  %v4392_v32 = vld [vmem:[%s5748_s7 + $0x180] ss:$8 sps:$4 sm:$0xff]  }
 0x268   : > { %v1563_v43 = vadd.f32 %v5024_v4, %v1405_v39  ;;  %v1407_v44 = vpop.f32.mrb[10].mxu1  ;;  %1960 = vmatprep.mubr.bf16.mxu0 %v1685_v35 }
 0x269   : > { %v1564_v45 = vadd.f32 %v5021_v3, %v1407_v44  ;;  %v1409_v46 = vpop.f32.mrb[11].mxu1  ;;  %1961 = vmatmul.mubr.bf16.gmra.mrb[36].mxu0 %v1684_v27  ;;  %v1626_v51 = vmax.f32 %v1562_v38, 0.0  ;;  %v4397_v27 = vld [vmem:[%s5748_s7 + $0x194] ss:$8 sps:$4 sm:$0xff]  }
 0x26a   : > { %v1565_v48 = vadd.f32 %v5024_v4, %v1409_v46  ;;  %2418 = vmatpush1.bf16.msra.mxu0 %v4374_v37  ;;  %v1627_v54 = vmax.f32 %v1563_v43, 0.0 }
 0x26b   : > { %v1628_v52 = vmax.f32 %v1564_v45, 0.0  ;;  %2419 = vmatprep.subr.bf16.mxu0 %v4379_v40  ;;  %v4395_v40 = vld [vmem:[%s5748_s7 + $0x190] ss:$8 sps:$4 sm:$0xff]   ;;  %v4400_v45 = vld [vmem:[%s5748_s7 + $0x1a4] ss:$8 sps:$4 sm:$0xff]  }
 0x26c   : > { %v1629_v55 = vmax.f32 %v1565_v48, 0.0 }
 0x26d   : > { %v1686_v49 = vpack.c.bf16 %v1628_v52, %v1626_v51 }
 0x26e   : > { %v1687_v56 = vpack.c.bf16 %v1629_v55, %v1627_v54  ;;  %v1413_v57 = vpop.f32.mrb[12].mxu1  ;;  %2420 = vmatpush1.bf16.msra.mxu0 %v4377_v50 }
 0x26f   : > { %v1566_v59 = vadd.f32 %v5021_v3, %v1413_v57  ;;  %v1415_v60 = vpop.f32.mrb[13].mxu1  ;;  %2421 = vmatprep.subr.bf16.mxu0 %v4382_v53  ;;  %v4398_v53 = vld [vmem:[%s5748_s7 + $0x1a0] ss:$8 sps:$4 sm:$0xff]  }
 0x270   : > { %v1567_v42 = vadd.f32 %v5024_v4, %v1415_v60  ;;  %v1417_v47 = vpop.f32.mrb[14].mxu1  ;;  %1970 = vmatprep.mubr.bf16.mxu0 %v1687_v56 }
 0x271   : > { %v1568_v62 = vadd.f32 %v5021_v3, %v1417_v47  ;;  %v1419_v63 = vpop.f32.mrb[15].mxu1  ;;  %1971 = vmatmul.mubr.bf16.gmra.mrb[40].mxu0 %v1686_v49  ;;  %v1630_v5 = vmax.f32 %v1566_v59, 0.0  ;;  %v4403_v49 = vld [vmem:[%s5748_s7 + $0x1b4] ss:$8 sps:$4 sm:$0xff]  }
 0x272   : > { %v1569_v1 = vadd.f32 %v5024_v4, %v1419_v63  ;;  %2422 = vmatpush1.bf16.msra.mxu0 %v4380_v58  ;;  %v1631_v8 = vmax.f32 %v1567_v42, 0.0 }
 0x273   : > { %v1632_v6 = vmax.f32 %v1568_v62, 0.0  ;;  %2423 = vmatprep.subr.bf16.mxu0 %v4385_v61  ;;  %v4401_v61 = vld [vmem:[%s5748_s7 + $0x1b0] ss:$8 sps:$4 sm:$0xff]   ;;  %v4406_v62 = vld [vmem:[%s5748_s7 + $0x1c4] ss:$8 sps:$4 sm:$0xff]  }
 0x274   : > { %v1633_v9 = vmax.f32 %v1569_v1, 0.0 }
 0x275   : > { %v1688_v10 = vpack.c.bf16 %v1632_v6, %v1630_v5 }
 0x276   : > { %v1689_v11 = vpack.c.bf16 %v1633_v9, %v1631_v8  ;;  %v1423_v12 = vpop.f32.mrb[16].mxu1  ;;  %2424 = vmatpush1.bf16.msra.mxu0 %v4383_v41 }
 0x277   : > { %v1570_v14 = vadd.f32 %v5021_v3, %v1423_v12  ;;  %v1425_v15 = vpop.f32.mrb[17].mxu1  ;;  %2425 = vmatprep.subr.bf16.mxu0 %v4388_v7  ;;  %v4404_v7 = vld [vmem:[%s5748_s7 + $0x1c0] ss:$8 sps:$4 sm:$0xff]  }
 0x278   : > { %v1571_v17 = vadd.f32 %v5024_v4, %v1425_v15  ;;  %v1427_v18 = vpop.f32.mrb[18].mxu1  ;;  %1980 = vmatprep.mubr.bf16.mxu0 %v1689_v11 }
 0x279   : > { %v1572_v19 = vadd.f32 %v5021_v3, %v1427_v18  ;;  %v1429_v20 = vpop.f32.mrb[19].mxu1  ;;  %1981 = vmatmul.mubr.bf16.gmra.mrb[44].mxu0 %v1688_v10  ;;  %v1634_v23 = vmax.f32 %v1570_v14, 0.0  ;;  %v4409_v10 = vld [vmem:[%s5748_s7 + $0x1d4] ss:$8 sps:$4 sm:$0xff]  }
 0x27a   : > { %v1573_v21 = vadd.f32 %v5024_v4, %v1429_v20  ;;  %2426 = vmatpush1.bf16.msra.mxu0 %v4386_v13  ;;  %v1635_v26 = vmax.f32 %v1571_v17, 0.0 }
 0x27b   : > { %v1636_v24 = vmax.f32 %v1572_v19, 0.0  ;;  %2427 = vmatprep.subr.bf16.mxu0 %v4391_v16  ;;  %v4407_v16 = vld [vmem:[%s5748_s7 + $0x1d0] ss:$8 sps:$4 sm:$0xff]   ;;  %v4412_v19 = vld [vmem:[%s5748_s7 + $0x1e4] ss:$8 sps:$4 sm:$0xff]  }
 0x27c   : > { %v1637_v28 = vmax.f32 %v1573_v21, 0.0 }
 0x27d   : > { %v1690_v29 = vpack.c.bf16 %v1636_v24, %v1634_v23 }
 0x27e   : > { %v1691_v30 = vpack.c.bf16 %v1637_v28, %v1635_v26  ;;  %v1433_v31 = vpop.f32.mrb[20].mxu1  ;;  %2428 = vmatpush1.bf16.msra.mxu0 %v4389_v22 }
 0x27f   : > { %v1574_v33 = vadd.f32 %v5021_v3, %v1433_v31  ;;  %v1435_v34 = vpop.f32.mrb[21].mxu1  ;;  %2429 = vmatprep.subr.bf16.mxu0 %v4394_v25  ;;  %v4410_v25 = vld [vmem:[%s5748_s7 + $0x1e0] ss:$8 sps:$4 sm:$0xff]  }
 0x280   : > { %v1575_v35 = vadd.f32 %v5024_v4, %v1435_v34  ;;  %v1437_v36 = vpop.f32.mrb[22].mxu1  ;;  %1990 = vmatprep.mubr.bf16.mxu0 %v1691_v30 }
 0x281   : > { %v1576_v37 = vadd.f32 %v5021_v3, %v1437_v36  ;;  %v1439_v38 = vpop.f32.mrb[23].mxu1  ;;  %1991 = vmatmul.mubr.bf16.gmra.mrb[48].mxu0 %v1690_v29  ;;  %v1638_v43 = vmax.f32 %v1574_v33, 0.0 }
 0x282   : > { %v1577_v39 = vadd.f32 %v5024_v4, %v1439_v38  ;;  %2430 = vmatpush1.bf16.msra.mxu0 %v4392_v32  ;;  %v1639_v46 = vmax.f32 %v1575_v35, 0.0 }
 0x283   : > { %v1640_v44 = vmax.f32 %v1576_v37, 0.0  ;;  %2431 = vmatprep.subr.bf16.mxu0 %v4397_v27 }
 0x284   : > { %v1641_v48 = vmax.f32 %v1577_v39, 0.0 }
 0x285   : > { %v1692_v50 = vpack.c.bf16 %v1640_v44, %v1638_v43 }
 0x286   : > { %v1693_v51 = vpack.c.bf16 %v1641_v48, %v1639_v46  ;;  %v1443_v52 = vpop.f32.mrb[24].mxu1  ;;  %2432 = vmatpush1.bf16.msra.mxu0 %v4395_v40 }
 0x287   : > { %v1578_v54 = vadd.f32 %v5021_v3, %v1443_v52  ;;  %v1445_v55 = vpop.f32.mrb[25].mxu1  ;;  %2433 = vmatprep.subr.bf16.mxu0 %v4400_v45 }
 0x288   : > { %v1579_v56 = vadd.f32 %v5024_v4, %v1445_v55  ;;  %v1447_v57 = vpop.f32.mrb[26].mxu1  ;;  %2000 = vmatprep.mubr.bf16.mxu0 %v1693_v51 }
 0x289   : > { %v1580_v58 = vadd.f32 %v5021_v3, %v1447_v57  ;;  %v1449_v59 = vpop.f32.mrb[27].mxu1  ;;  %2001 = vmatmul.mubr.bf16.gmra.mrb[52].mxu0 %v1692_v50  ;;  %v1642_v42 = vmax.f32 %v1578_v54, 0.0 }
 0x28a   : > { %v1581_v60 = vadd.f32 %v5024_v4, %v1449_v59  ;;  %2434 = vmatpush1.bf16.msra.mxu0 %v4398_v53  ;;  %v1643_v63 = vmax.f32 %v1579_v56, 0.0 }
 0x28b   : > { %v1644_v47 = vmax.f32 %v1580_v58, 0.0  ;;  %2435 = vmatprep.subr.bf16.mxu0 %v4403_v49 }
 0x28c   : > { %v1645_v1 = vmax.f32 %v1581_v60, 0.0 }
 0x28d   : > { %v1694_v41 = vpack.c.bf16 %v1644_v47, %v1642_v42 }
 0x28e   : > { %v1695_v5 = vpack.c.bf16 %v1645_v1, %v1643_v63  ;;  %v1453_v6 = vpop.f32.mrb[28].mxu1  ;;  %2436 = vmatpush1.bf16.msra.mxu0 %v4401_v61 }
 0x28f   : > { %v1582_v8 = vadd.f32 %v5021_v3, %v1453_v6  ;;  %v1455_v9 = vpop.f32.mrb[29].mxu1  ;;  %2437 = vmatprep.subr.bf16.mxu0 %v4406_v62 }
 0x290   : > { %v1583_v11 = vadd.f32 %v5024_v4, %v1455_v9  ;;  %v1457_v12 = vpop.f32.mrb[30].mxu1  ;;  %2010 = vmatprep.mubr.bf16.mxu0 %v1695_v5 }
 0x291   : > { %v1584_v13 = vadd.f32 %v5021_v3, %v1457_v12  ;;  %v1459_v14 = vpop.f32.mrb[31].mxu1  ;;  %2011 = vmatmul.mubr.bf16.gmra.mrb[56].mxu0 %v1694_v41  ;;  %v1646_v17 = vmax.f32 %v1582_v8, 0.0 }
 0x292   : > { %v1585_v15 = vadd.f32 %v5024_v4, %v1459_v14  ;;  %2438 = vmatpush1.bf16.msra.mxu0 %v4404_v7  ;;  %v1647_v20 = vmax.f32 %v1583_v11, 0.0 }
 0x293   : > { %v1648_v18 = vmax.f32 %v1584_v13, 0.0  ;;  %2439 = vmatprep.subr.bf16.mxu0 %v4409_v10 }
 0x294   : > { %v1649_v21 = vmax.f32 %v1585_v15, 0.0 }
 0x295   : > { %v1696_v22 = vpack.c.bf16 %v1648_v18, %v1646_v17 }
 0x296   : > { %v1697_v23 = vpack.c.bf16 %v1649_v21, %v1647_v20  ;;  %v1463_v24 = vpop.f32.mrb[32].mxu1  ;;  %2440 = vmatpush1.bf16.msra.mxu0 %v4407_v16 }
 0x297   : > { %v1586_v26 = vadd.f32 %v5021_v3, %v1463_v24  ;;  %v1465_v28 = vpop.f32.mrb[33].mxu1  ;;  %2441 = vmatprep.subr.bf16.mxu0 %v4412_v19 }
 0x298   : > { %v1587_v29 = vadd.f32 %v5024_v4, %v1465_v28  ;;  %v1467_v30 = vpop.f32.mrb[34].mxu1  ;;  %2020 = vmatprep.mubr.bf16.mxu0 %v1697_v23 }
 0x299   : > { %v1588_v31 = vadd.f32 %v5021_v3, %v1467_v30  ;;  %v1469_v32 = vpop.f32.mrb[35].mxu1  ;;  %2021 = vmatmul.mubr.bf16.gmra.mrb[60].mxu0 %v1696_v22  ;;  %v1650_v34 = vmax.f32 %v1586_v26, 0.0 }
 0x29a   : > { %v1589_v33 = vadd.f32 %v5024_v4, %v1469_v32  ;;  %2442 = vmatpush1.bf16.msra.mxu0 %v4410_v25  ;;  %v1651_v35 = vmax.f32 %v1587_v29, 0.0  ;;  %v4415_v29 = vld [vmem:[%s5748_s7 + $0x1f4] ss:$8 sps:$4 sm:$0xff]  }
 0x29b   : > { %v1652_v27 = vmax.f32 %v1588_v31, 0.0  ;;  %v4413_v31 = vld [vmem:[%s5748_s7 + $0x1f0] ss:$8 sps:$4 sm:$0xff]   ;;  %2443 = vmatprep.subr.bf16.mxu0 %v4415_v29  ;;  %v4427_v29 = vld [vmem:[%s5748_s7 + $0x234] ss:$8 sps:$4 sm:$0xff]  }
 0x29c   : > { %v1653_v36 = vmax.f32 %v1589_v33, 0.0 }
 0x29d   : > { %v1698_v37 = vpack.c.bf16 %v1652_v27, %v1650_v34 }
 0x29e   : > { %v1699_v38 = vpack.c.bf16 %v1653_v36, %v1651_v35  ;;  %v1473_v39 = vpop.f32.mrb[36].mxu1  ;;  %2444 = vmatpush1.bf16.msra.mxu0 %v4413_v31 }
 0x29f   : > { %v1590_v40 = vadd.f32 %v5021_v3, %v1473_v39  ;;  %v1475_v43 = vpop.f32.mrb[37].mxu1 }
 0x2a0   : > { %v1591_v44 = vadd.f32 %v5024_v4, %v1475_v43  ;;  %v1477_v45 = vpop.f32.mrb[38].mxu1  ;;  %2030 = vmatprep.mubr.bf16.mxu0 %v1699_v38 }
 0x2a1   : > { %v1592_v46 = vadd.f32 %v5021_v3, %v1477_v45  ;;  %v1479_v48 = vpop.f32.mrb[39].mxu1  ;;  %2031 = vmatmul.mubr.bf16.gmra.mrb[64].mxu0 %v1698_v37  ;;  %v1654_v51 = vmax.f32 %v1590_v40, 0.0 }
 0x2a2   : > { %v1593_v50 = vadd.f32 %v5024_v4, %v1479_v48  ;;  %v1655_v53 = vmax.f32 %v1591_v44, 0.0 }
 0x2a3   : > { %v1656_v52 = vmax.f32 %v1592_v46, 0.0 }
 0x2a4   : > { %v1657_v54 = vmax.f32 %v1593_v50, 0.0 }
 0x2a5   : > { %v1700_v55 = vpack.c.bf16 %v1656_v52, %v1654_v51 }
 0x2a6   : > { %v1701_v49 = vpack.c.bf16 %v1657_v54, %v1655_v53  ;;  %v1483_v56 = vpop.f32.mrb[40].mxu1 }
 0x2a7   : > { %v1594_v57 = vadd.f32 %v5021_v3, %v1483_v56  ;;  %v1485_v58 = vpop.f32.mrb[41].mxu1 }
 0x2a8   : > { %v1595_v59 = vadd.f32 %v5024_v4, %v1485_v58  ;;  %v1487_v60 = vpop.f32.mrb[42].mxu1  ;;  %2040 = vmatprep.mubr.bf16.mxu0 %v1701_v49 }
 0x2a9   : > { %v1596_v61 = vadd.f32 %v5021_v3, %v1487_v60  ;;  %v1489_v42 = vpop.f32.mrb[43].mxu1  ;;  %2041 = vmatmul.mubr.bf16.gmra.mrb[68].mxu0 %v1700_v55  ;;  %v1658_v62 = vmax.f32 %v1594_v57, 0.0 }
 0x2aa   : > { %v1597_v47 = vadd.f32 %v5024_v4, %v1489_v42  ;;  %v1659_v1 = vmax.f32 %v1595_v59, 0.0 }
 0x2ab   : > { %v1660_v63 = vmax.f32 %v1596_v61, 0.0 }
 0x2ac   : > { %v1661_v41 = vmax.f32 %v1597_v47, 0.0 }
 0x2ad   : > { %v1702_v5 = vpack.c.bf16 %v1660_v63, %v1658_v62 }
 0x2ae   : > { %v1703_v6 = vpack.c.bf16 %v1661_v41, %v1659_v1  ;;  %v1493_v7 = vpop.f32.mrb[44].mxu1 }
 0x2af   : > { %v1598_v8 = vadd.f32 %v5021_v3, %v1493_v7  ;;  %v1495_v9 = vpop.f32.mrb[45].mxu1 }
 0x2b0   : > { %v1599_v10 = vadd.f32 %v5024_v4, %v1495_v9  ;;  %v1497_v11 = vpop.f32.mrb[46].mxu1  ;;  %2050 = vmatprep.mubr.bf16.mxu0 %v1703_v6 }
 0x2b1   : > { %v1600_v12 = vadd.f32 %v5021_v3, %v1497_v11  ;;  %v1499_v13 = vpop.f32.mrb[47].mxu1  ;;  %2051 = vmatmul.mubr.bf16.gmra.mrb[72].mxu0 %v1702_v5  ;;  %v1662_v15 = vmax.f32 %v1598_v8, 0.0 }
 0x2b2   : > { %v1601_v14 = vadd.f32 %v5024_v4, %v1499_v13  ;;  %v1663_v17 = vmax.f32 %v1599_v10, 0.0 }
 0x2b3   : > { %v1664_v16 = vmax.f32 %v1600_v12, 0.0 }
 0x2b4   : > { %v1665_v18 = vmax.f32 %v1601_v14, 0.0 }
 0x2b5   : > { %v1704_v19 = vpack.c.bf16 %v1664_v16, %v1662_v15 }
 0x2b6   : > { %v1705_v20 = vpack.c.bf16 %v1665_v18, %v1663_v17  ;;  %v1503_v21 = vpop.f32.mrb[48].mxu1 }
 0x2b7   : > { %v1602_v22 = vadd.f32 %v5021_v3, %v1503_v21  ;;  %v1505_v23 = vpop.f32.mrb[49].mxu1  ;;  %v1746_v21 = vld [vmem:[%s5749_s8] sm:$0x3] }
 0x2b8   : > { %v1603_v24 = vadd.f32 %v5024_v4, %v1505_v23  ;;  %v1507_v25 = vpop.f32.mrb[50].mxu1  ;;  %2060 = vmatprep.mubr.bf16.mxu0 %v1705_v20  ;;  %v4421_v20 = vld [vmem:[%s5748_s7 + $0x214] ss:$8 sps:$4 sm:$0xff]   ;;  %v4424_v23 = vld [vmem:[%s5748_s7 + $0x224] ss:$8 sps:$4 sm:$0xff]  }
 0x2b9   : > { %v1604_v26 = vadd.f32 %v5021_v3, %v1507_v25  ;;  %v1509_v28 = vpop.f32.mrb[51].mxu1  ;;  %2061 = vmatmul.mubr.bf16.gmra.mrb[76].mxu0 %v1704_v19  ;;  %v1666_v32 = vmax.f32 %v1602_v22, 0.0  ;;  %v4416_v19 = vld [vmem:[%s5748_s7 + $0x200] ss:$8 sps:$4 sm:$0xff]   ;;  %v5208_v25 = vrot.slane %v1746_v21, %v5018_v2 }
 0x2ba   : > { %v1605_v30 = vadd.f32 %v5024_v4, %v1509_v28  ;;  %v1667_v34 = vmax.f32 %v1603_v24, 0.0  ;;  %v4422_v22 = vld [vmem:[%s5748_s7 + $0x220] ss:$8 sps:$4 sm:$0xff]   ;;  %v5205_v24 = vrot.slane %v1746_v21, %v5013_v0  ;;  %v4425_v28 = vld [vmem:[%s5748_s7 + $0x230] ss:$8 sps:$4 sm:$0xff]  }
 0x2bb   : > { %v1668_v33 = vmax.f32 %v1604_v26, 0.0  ;;  %v4448_v21 = vld [vmem:[%s5748_s7 + $0x2a4] ss:$8 sps:$4 sm:$0xff]  }
 0x2bc   : > { %v1669_v27 = vmax.f32 %v1605_v30, 0.0 }
 0x2bd   : > { %v1706_v35 = vpack.c.bf16 %v1668_v33, %v1666_v32 }
 0x2be   : > { %v1707_v36 = vpack.c.bf16 %v1669_v27, %v1667_v34  ;;  %v1513_v37 = vpop.f32.mrb[52].mxu1 }
 0x2bf   : > { %v1606_v38 = vadd.f32 %v5021_v3, %v1513_v37  ;;  %v1515_v39 = vpop.f32.mrb[53].mxu1 }
 0x2c0   : > { %v1607_v40 = vadd.f32 %v5024_v4, %v1515_v39  ;;  %v1517_v43 = vpop.f32.mrb[54].mxu1  ;;  %2070 = vmatprep.mubr.bf16.mxu0 %v1707_v36  ;;  %v4430_v36 = vld [vmem:[%s5748_s7 + $0x244] ss:$8 sps:$4 sm:$0xff]  }
 0x2c1   : > { %v1608_v44 = vadd.f32 %v5021_v3, %v1517_v43  ;;  %v1519_v45 = vpop.f32.mrb[55].mxu1  ;;  %2071 = vmatmul.mubr.bf16.gmra.mrb[80].mxu0 %v1706_v35  ;;  %v1670_v48 = vmax.f32 %v1606_v38, 0.0  ;;  %v4428_v35 = vld [vmem:[%s5748_s7 + $0x240] ss:$8 sps:$4 sm:$0xff]   ;;  %v4433_v38 = vld [vmem:[%s5748_s7 + $0x254] ss:$8 sps:$4 sm:$0xff]  }
 0x2c2   : > { %v1609_v46 = vadd.f32 %v5024_v4, %v1519_v45  ;;  %v1671_v51 = vmax.f32 %v1607_v40, 0.0 }
 0x2c3   : > { %v1672_v50 = vmax.f32 %v1608_v44, 0.0 }
 0x2c4   : > { %v1673_v52 = vmax.f32 %v1609_v46, 0.0  ;;  %v4431_v46 = vld [vmem:[%s5748_s7 + $0x250] ss:$8 sps:$4 sm:$0xff]  }
 0x2c5   : > { %v1708_v53 = vpack.c.bf16 %v1672_v50, %v1670_v48 }
 0x2c6   : > { %v1709_v54 = vpack.c.bf16 %v1673_v52, %v1671_v51  ;;  %v1523_v55 = vpop.f32.mrb[56].mxu1  ;;  %v4436_v51 = vld [vmem:[%s5748_s7 + $0x264] ss:$8 sps:$4 sm:$0xff]  }
 0x2c7   : > { %v1610_v49 = vadd.f32 %v5021_v3, %v1523_v55  ;;  %v1525_v56 = vpop.f32.mrb[57].mxu1 }
 0x2c8   : > { %v1611_v57 = vadd.f32 %v5024_v4, %v1525_v56  ;;  %v1527_v58 = vpop.f32.mrb[58].mxu1  ;;  %2080 = vmatprep.mubr.bf16.mxu0 %v1709_v54 }
 0x2c9   : > { %v1612_v59 = vadd.f32 %v5021_v3, %v1527_v58  ;;  %v1529_v60 = vpop.f32.mrb[59].mxu1  ;;  %2081 = vmatmul.mubr.bf16.gmra.mrb[84].mxu0 %v1708_v53  ;;  %v1674_v42 = vmax.f32 %v1610_v49, 0.0 }
 0x2ca   : > { %v1613_v61 = vadd.f32 %v5024_v4, %v1529_v60  ;;  %v1675_v62 = vmax.f32 %v1611_v57, 0.0  ;;  %v4434_v57 = vld [vmem:[%s5748_s7 + $0x260] ss:$8 sps:$4 sm:$0xff]  }
 0x2cb   : > { %v1676_v47 = vmax.f32 %v1612_v59, 0.0  ;;  %v4439_v59 = vld [vmem:[%s5748_s7 + $0x274] ss:$8 sps:$4 sm:$0xff]  }
 0x2cc   : > { %v1677_v63 = vmax.f32 %v1613_v61, 0.0 }
 0x2cd   : > { %v1710_v1 = vpack.c.bf16 %v1676_v47, %v1674_v42 }
 0x2ce   : > { %v1711_v41 = vpack.c.bf16 %v1677_v63, %v1675_v62  ;;  %v1533_v5 = vpop.f32.mrb[60].mxu1  ;;  %v4437_v63 = vld [vmem:[%s5748_s7 + $0x270] ss:$8 sps:$4 sm:$0xff]  }
 0x2cf   : > { %v1614_v6 = vadd.f32 %v5021_v3, %v1533_v5  ;;  %v1535_v7 = vpop.f32.mrb[61].mxu1  ;;  %v4442_v5 = vld [vmem:[%s5748_s7 + $0x284] ss:$8 sps:$4 sm:$0xff]  }
 0x2d0   : > { %v1615_v8 = vadd.f32 %v5024_v4, %v1535_v7  ;;  %v1537_v9 = vpop.f32.mrb[62].mxu1  ;;  %2090 = vmatprep.mubr.bf16.mxu0 %v1711_v41 }
 0x2d1   : > { %v1616_v10 = vadd.f32 %v5021_v3, %v1537_v9  ;;  %v1539_v11 = vpop.f32.mrb[63].mxu1  ;;  %2091 = vmatmul.mubr.bf16.gmra.mrb[88].mxu0 %v1710_v1  ;;  %v1678_v13 = vmax.f32 %v1614_v6, 0.0  ;;  %v4418_v3 = vld [vmem:[%s5748_s7 + $0x204] ss:$8 sps:$4 sm:$0xff]  }
 0x2d2   : > { %v1617_v12 = vadd.f32 %v5024_v4, %v1539_v11  ;;  %v1679_v15 = vmax.f32 %v1615_v8, 0.0  ;;  %2908 = vmatprep.subr.bf16.mxu1 %v4418_v3  ;;  %v4419_v4 = vld [vmem:[%s5748_s7 + $0x210] ss:$8 sps:$4 sm:$0xff]  }
 0x2d3   : > { %v1680_v14 = vmax.f32 %v1616_v10, 0.0  ;;  %2909 = vmatpush1.bf16.msra.mxu1 %v4416_v19  ;;  %v4443_v3 = vld [vmem:[%s5748_s7 + $0x290] ss:$8 sps:$4 sm:$0xff]  }
 0x2d4   : > { %v1681_v16 = vmax.f32 %v1617_v12, 0.0  ;;  %2910 = vmatprep.subr.bf16.mxu1 %v4421_v20  ;;  %v4440_v12 = vld [vmem:[%s5748_s7 + $0x280] ss:$8 sps:$4 sm:$0xff]  }
 0x2d5   : > { %v1712_v17 = vpack.c.bf16 %v1680_v14, %v1678_v13  ;;  %v4445_v14 = vld [vmem:[%s5748_s7 + $0x294] ss:$8 sps:$4 sm:$0xff]  }
 0x2d6   : > { %v1713_v18 = vpack.c.bf16 %v1681_v16, %v1679_v15 }
 0x2d7   : > { %2911 = vmatpush1.bf16.msra.mxu1 %v4419_v4 }
 0x2d8   : > { %2100 = vmatprep.mubr.bf16.mxu0 %v1713_v18  ;;  %2912 = vmatprep.subr.bf16.mxu1 %v4424_v23 }
 0x2d9   : > { %2101 = vmatmul.mubr.bf16.gmra.mrb[92].mxu0 %v1712_v17 }
 0x2db   : > { %2913 = vmatpush1.bf16.msra.mxu1 %v4422_v22 }
 0x2dc   : > { %2914 = vmatprep.subr.bf16.mxu1 %v4427_v29 }
 0x2df   : > { %2915 = vmatpush1.bf16.msra.mxu1 %v4425_v28 }
 0x2e0   : > { %2916 = vmatprep.subr.bf16.mxu1 %v4430_v36 }
 0x2e3   : > { %2917 = vmatpush1.bf16.msra.mxu1 %v4428_v35 }
 0x2e4   : > { %2918 = vmatprep.subr.bf16.mxu1 %v4433_v38  ;;  %v4449_v38 = vld [vmem:[%s5748_s7 + $0x2b0] ss:$8 sps:$4 sm:$0xff]  }
 0x2e7   : > { %2919 = vmatpush1.bf16.msra.mxu1 %v4431_v46 }
 0x2e8   : > { %2920 = vmatprep.subr.bf16.mxu1 %v4436_v51 }
 0x2eb   : > { %2921 = vmatpush1.bf16.msra.mxu1 %v4434_v57 }
 0x2ec   : > { %2922 = vmatprep.subr.bf16.mxu1 %v4439_v59  ;;  %v4455_v59 = vld [vmem:[%s5748_s7 + $0x2d0] ss:$8 sps:$4 sm:$0xff]  }
 0x2ef   : > { %2923 = vmatpush1.bf16.msra.mxu1 %v4437_v63 }
 0x2f0   : > { %2924 = vmatprep.subr.bf16.mxu1 %v4442_v5 }
 0x2f3   : > { %2925 = vmatpush1.bf16.msra.mxu1 %v4440_v12 }
 0x2f4   : > { %2926 = vmatprep.subr.bf16.mxu1 %v4445_v14 }
 0x2f7   : > { %2927 = vmatpush1.bf16.msra.mxu1 %v4443_v3 }
 0x2f8   : > { %2928 = vmatprep.subr.bf16.mxu1 %v4448_v21 }
 0x334   : > { %v1952_v26 = vpop.f32.mrb[32].mxu0 }
 0x335   : > { %v1953_v30 = vadd.f32 %v1952_v26, %v5205_v24  ;;  %v1954_v31 = vpop.f32.mrb[33].mxu0 }
 0x336   : > { %v1955_v32 = vadd.f32 %v1954_v31, %v5208_v25  ;;  %v1956_v33 = vpop.f32.mrb[34].mxu0  ;;  %v4446_v31 = vld [vmem:[%s5748_s7 + $0x2a0] ss:$8 sps:$4 sm:$0xff]  }
 0x337   : > { %v1957_v34 = vadd.f32 %v1956_v33, %v5205_v24  ;;  %v1958_v27 = vpop.f32.mrb[35].mxu0  ;;  %v2111_v39 = vmax.f32 %v1953_v30, 0.0  ;;  %v4451_v33 = vld [vmem:[%s5748_s7 + $0x2b4] ss:$8 sps:$4 sm:$0xff]   ;;  %2929 = vmatpush1.bf16.msra.mxu1 %v4446_v31 }
 0x338   : > { %v1959_v37 = vadd.f32 %v1958_v27, %v5208_v25  ;;  %v2112_v43 = vmax.f32 %v1955_v32, 0.0  ;;  %2930 = vmatprep.subr.bf16.mxu1 %v4451_v33 }
 0x339   : > { %v2113_v40 = vmax.f32 %v1957_v34, 0.0 }
 0x33a   : > { %v2114_v44 = vmax.f32 %v1959_v37, 0.0 }
 0x33b   : > { %v2175_v45 = vpack.c.bf16 %v2113_v40, %v2111_v39  ;;  %2931 = vmatpush1.bf16.msra.mxu1 %v4449_v38 }
 0x33c   : > { %v2176_v48 = vpack.c.bf16 %v2114_v44, %v2112_v43  ;;  %v1962_v50 = vpop.f32.mrb[36].mxu0  ;;  %v4454_v43 = vld [vmem:[%s5748_s7 + $0x2c4] ss:$8 sps:$4 sm:$0xff]  }
 0x33d   : > { %v1963_v52 = vadd.f32 %v1962_v50, %v5205_v24  ;;  %v1964_v53 = vpop.f32.mrb[37].mxu0  ;;  %2932 = vmatprep.subr.bf16.mxu1 %v4454_v43 }
 0x33e   : > { %v1965_v54 = vadd.f32 %v1964_v53, %v5208_v25  ;;  %v1966_v55 = vpop.f32.mrb[38].mxu0  ;;  %2445 = vmatprep.mubr.bf16.mxu0 %v2176_v48 }
 0x33f   : > { %v1967_v49 = vadd.f32 %v1966_v55, %v5205_v24  ;;  %v1968_v56 = vpop.f32.mrb[39].mxu0  ;;  %2446 = vmatmul.mubr.bf16.vlgmr.msra.gmra.mrb[96].mxu0 %v2175_v45  ;;  %v2115_v60 = vmax.f32 %v1963_v52, 0.0  ;;  %v4452_v52 = vld [vmem:[%s5748_s7 + $0x2c0] ss:$8 sps:$4 sm:$0xff]  }
 0x340   : > { %v1969_v58 = vadd.f32 %v1968_v56, %v5208_v25  ;;  %v2116_v42 = vmax.f32 %v1965_v54, 0.0  ;;  %v4457_v54 = vld [vmem:[%s5748_s7 + $0x2d4] ss:$8 sps:$4 sm:$0xff]   ;;  %2933 = vmatpush1.bf16.msra.mxu1 %v4452_v52 }
 0x341   : > { %v2117_v61 = vmax.f32 %v1967_v49, 0.0  ;;  %2934 = vmatprep.subr.bf16.mxu1 %v4457_v54 }
 0x342   : > { %v2118_v47 = vmax.f32 %v1969_v58, 0.0 }
 0x343   : > { %v2177_v62 = vpack.c.bf16 %v2117_v61, %v2115_v60 }
 0x344   : > { %v2178_v1 = vpack.c.bf16 %v2118_v47, %v2116_v42  ;;  %v1972_v41 = vpop.f32.mrb[40].mxu0  ;;  %v4460_v42 = vld [vmem:[%s5748_s7 + $0x2e4] ss:$8 sps:$4 sm:$0xff]   ;;  %2935 = vmatpush1.bf16.msra.mxu1 %v4455_v59 }
 0x345   : > { %v1973_v6 = vadd.f32 %v1972_v41, %v5205_v24  ;;  %v1974_v7 = vpop.f32.mrb[41].mxu0  ;;  %2936 = vmatprep.subr.bf16.mxu1 %v4460_v42 }
 0x346   : > { %v1975_v8 = vadd.f32 %v1974_v7, %v5208_v25  ;;  %v1976_v9 = vpop.f32.mrb[42].mxu0  ;;  %2455 = vmatprep.mubr.bf16.mxu0 %v2178_v1 }
 0x347   : > { %v1977_v10 = vadd.f32 %v1976_v9, %v5205_v24  ;;  %v1978_v11 = vpop.f32.mrb[43].mxu0  ;;  %2456 = vmatmul.mubr.bf16.gmra.mrb[100].mxu0 %v2177_v62  ;;  %v2119_v15 = vmax.f32 %v1973_v6, 0.0  ;;  %v4458_v6 = vld [vmem:[%s5748_s7 + $0x2e0] ss:$8 sps:$4 sm:$0xff]  }
 0x348   : > { %v1979_v13 = vadd.f32 %v1978_v11, %v5208_v25  ;;  %v2120_v17 = vmax.f32 %v1975_v8, 0.0  ;;  %2937 = vmatpush1.bf16.msra.mxu1 %v4458_v6 }
 0x349   : > { %v2121_v16 = vmax.f32 %v1977_v10, 0.0 }
 0x34a   : > { %v2122_v18 = vmax.f32 %v1979_v13, 0.0 }
 0x34b   : > { %v2179_v19 = vpack.c.bf16 %v2121_v16, %v2119_v15 }
 0x34c   : > { %v2180_v4 = vpack.c.bf16 %v2122_v18, %v2120_v17  ;;  %v1982_v20 = vpop.f32.mrb[44].mxu0 }
 0x34d   : > { %v1983_v22 = vadd.f32 %v1982_v20, %v5205_v24  ;;  %v1984_v23 = vpop.f32.mrb[45].mxu0 }
 0x34e   : > { %v1985_v26 = vadd.f32 %v1984_v23, %v5208_v25  ;;  %v1986_v28 = vpop.f32.mrb[46].mxu0  ;;  %2465 = vmatprep.mubr.bf16.mxu0 %v2180_v4 }
 0x34f   : > { %v1987_v29 = vadd.f32 %v1986_v28, %v5205_v24  ;;  %v1988_v30 = vpop.f32.mrb[47].mxu0  ;;  %2466 = vmatmul.mubr.bf16.gmra.mrb[104].mxu0 %v2179_v19  ;;  %v2123_v34 = vmax.f32 %v1983_v22, 0.0 }
 0x350   : > { %v1989_v32 = vadd.f32 %v1988_v30, %v5208_v25  ;;  %v2124_v35 = vmax.f32 %v1985_v26, 0.0 }
 0x351   : > { %v2125_v27 = vmax.f32 %v1987_v29, 0.0 }
 0x352   : > { %v2126_v36 = vmax.f32 %v1989_v32, 0.0 }
 0x353   : > { %v2181_v37 = vpack.c.bf16 %v2125_v27, %v2123_v34 }
 0x354   : > { %v2182_v39 = vpack.c.bf16 %v2126_v36, %v2124_v35  ;;  %v1992_v40 = vpop.f32.mrb[48].mxu0 }
 0x355   : > { %v1993_v44 = vadd.f32 %v1992_v40, %v5205_v24  ;;  %v1994_v45 = vpop.f32.mrb[49].mxu0 }
 0x356   : > { %v1995_v46 = vadd.f32 %v1994_v45, %v5208_v25  ;;  %v1996_v48 = vpop.f32.mrb[50].mxu0  ;;  %2475 = vmatprep.mubr.bf16.mxu0 %v2182_v39 }
 0x357   : > { %v1997_v50 = vadd.f32 %v1996_v48, %v5205_v24  ;;  %v1998_v51 = vpop.f32.mrb[51].mxu0  ;;  %2476 = vmatmul.mubr.bf16.gmra.mrb[108].mxu0 %v2181_v37  ;;  %v2127_v55 = vmax.f32 %v1993_v44, 0.0 }
 0x358   : > { %v1999_v53 = vadd.f32 %v1998_v51, %v5208_v25  ;;  %v2128_v56 = vmax.f32 %v1995_v46, 0.0 }
 0x359   : > { %v2129_v49 = vmax.f32 %v1997_v50, 0.0 }
 0x35a   : > { %v2130_v57 = vmax.f32 %v1999_v53, 0.0 }
 0x35b   : > { %v2183_v58 = vpack.c.bf16 %v2129_v49, %v2127_v55 }
 0x35c   : > { %v2184_v60 = vpack.c.bf16 %v2130_v57, %v2128_v56  ;;  %v2002_v61 = vpop.f32.mrb[52].mxu0 }
 0x35d   : > { %v2003_v47 = vadd.f32 %v2002_v61, %v5205_v24  ;;  %v2004_v62 = vpop.f32.mrb[53].mxu0 }
 0x35e   : > { %v2005_v63 = vadd.f32 %v2004_v62, %v5208_v25  ;;  %v2006_v1 = vpop.f32.mrb[54].mxu0  ;;  %2485 = vmatprep.mubr.bf16.mxu0 %v2184_v60 }
 0x35f   : > { %v2007_v41 = vadd.f32 %v2006_v1, %v5205_v24  ;;  %v2008_v5 = vpop.f32.mrb[55].mxu0  ;;  %2486 = vmatmul.mubr.bf16.gmra.mrb[112].mxu0 %v2183_v58  ;;  %v2131_v8 = vmax.f32 %v2003_v47, 0.0 }
 0x360   : > { %v2009_v7 = vadd.f32 %v2008_v5, %v5208_v25  ;;  %v2132_v10 = vmax.f32 %v2005_v63, 0.0 }
 0x361   : > { %v2133_v9 = vmax.f32 %v2007_v41, 0.0 }
 0x362   : > { %v2134_v11 = vmax.f32 %v2009_v7, 0.0 }
 0x363   : > { %v2185_v12 = vpack.c.bf16 %v2133_v9, %v2131_v8 }
 0x364   : > { %v2186_v13 = vpack.c.bf16 %v2134_v11, %v2132_v10  ;;  %v2012_v14 = vpop.f32.mrb[56].mxu0 }
 0x365   : > { %v2013_v15 = vadd.f32 %v2012_v14, %v5205_v24  ;;  %v2014_v16 = vpop.f32.mrb[57].mxu0 }
 0x366   : > { %v2015_v17 = vadd.f32 %v2014_v16, %v5208_v25  ;;  %v2016_v18 = vpop.f32.mrb[58].mxu0  ;;  %2495 = vmatprep.mubr.bf16.mxu0 %v2186_v13 }
 0x367   : > { %v2017_v19 = vadd.f32 %v2016_v18, %v5205_v24  ;;  %v2018_v3 = vpop.f32.mrb[59].mxu0  ;;  %2496 = vmatmul.mubr.bf16.gmra.mrb[116].mxu0 %v2185_v12  ;;  %v2135_v20 = vmax.f32 %v2013_v15, 0.0 }
 0x368   : > { %v2019_v4 = vadd.f32 %v2018_v3, %v5208_v25  ;;  %v2136_v22 = vmax.f32 %v2015_v17, 0.0 }
 0x369   : > { %v2137_v21 = vmax.f32 %v2017_v19, 0.0 }
 0x36a   : > { %v2138_v23 = vmax.f32 %v2019_v4, 0.0 }
 0x36b   : > { %v2187_v26 = vpack.c.bf16 %v2137_v21, %v2135_v20 }
 0x36c   : > { %v2188_v28 = vpack.c.bf16 %v2138_v23, %v2136_v22  ;;  %v2022_v29 = vpop.f32.mrb[60].mxu0 }
 0x36d   : > { %v2023_v30 = vadd.f32 %v2022_v29, %v5205_v24  ;;  %v2024_v31 = vpop.f32.mrb[61].mxu0 }
 0x36e   : > { %v2025_v32 = vadd.f32 %v2024_v31, %v5208_v25  ;;  %v2026_v33 = vpop.f32.mrb[62].mxu0  ;;  %2505 = vmatprep.mubr.bf16.mxu0 %v2188_v28 }
 0x36f   : > { %v2027_v34 = vadd.f32 %v2026_v33, %v5205_v24  ;;  %v2028_v27 = vpop.f32.mrb[63].mxu0  ;;  %2506 = vmatmul.mubr.bf16.gmra.mrb[120].mxu0 %v2187_v26  ;;  %v2139_v36 = vmax.f32 %v2023_v30, 0.0 }
 0x370   : > { %v2029_v35 = vadd.f32 %v2028_v27, %v5208_v25  ;;  %v2140_v38 = vmax.f32 %v2025_v32, 0.0 }
 0x371   : > { %v2141_v37 = vmax.f32 %v2027_v34, 0.0 }
 0x372   : > { %v2142_v39 = vmax.f32 %v2029_v35, 0.0 }
 0x373   : > { %v2189_v40 = vpack.c.bf16 %v2141_v37, %v2139_v36 }
 0x374   : > { %v2190_v43 = vpack.c.bf16 %v2142_v39, %v2140_v38  ;;  %v2032_v44 = vpop.f32.mrb[64].mxu0 }
 0x375   : > { %v2033_v45 = vadd.f32 %v2032_v44, %v5205_v24  ;;  %v2034_v46 = vpop.f32.mrb[65].mxu0 }
 0x376   : > { %v2035_v48 = vadd.f32 %v2034_v46, %v5208_v25  ;;  %v2036_v50 = vpop.f32.mrb[66].mxu0  ;;  %2515 = vmatprep.mubr.bf16.mxu0 %v2190_v43 }
 0x377   : > { %v2037_v51 = vadd.f32 %v2036_v50, %v5205_v24  ;;  %v2038_v52 = vpop.f32.mrb[67].mxu0  ;;  %2516 = vmatmul.mubr.bf16.gmra.mrb[124].mxu0 %v2189_v40  ;;  %v2143_v54 = vmax.f32 %v2033_v45, 0.0 }
 0x378   : > { %v2039_v53 = vadd.f32 %v2038_v52, %v5208_v25  ;;  %v2144_v49 = vmax.f32 %v2035_v48, 0.0  ;;  %v4463_v48 = vld [vmem:[%s5748_s7 + $0x2f4] ss:$8 sps:$4 sm:$0xff]  }
 0x379   : > { %v2145_v55 = vmax.f32 %v2037_v51, 0.0  ;;  %v4461_v51 = vld [vmem:[%s5748_s7 + $0x2f0] ss:$8 sps:$4 sm:$0xff]   ;;  %2938 = vmatprep.subr.bf16.mxu1 %v4463_v48  ;;  %v4466_v48 = vld [vmem:[%s5748_s7 + $0x304] ss:$8 sps:$4 sm:$0xff]  }
 0x37a   : > { %v2146_v56 = vmax.f32 %v2039_v53, 0.0  ;;  %2939 = vmatpush1.bf16.msra.mxu1 %v4461_v51  ;;  %v4469_v51 = vld [vmem:[%s5748_s7 + $0x314] ss:$8 sps:$4 sm:$0xff]   ;;  %3403 = vmatprep.subr.bf16.mxu0 %v4466_v48 }
 0x37b   : > { %v2191_v57 = vpack.c.bf16 %v2145_v55, %v2143_v54  ;;  %4119 = vmatprep.subr.bf16.mxu1 %v4466_v48 }
 0x37c   : > { %v2192_v58 = vpack.c.bf16 %v2146_v56, %v2144_v49  ;;  %v2042_v59 = vpop.f32.mrb[68].mxu0 }
 0x37d   : > { %v2043_v60 = vadd.f32 %v2042_v59, %v5205_v24  ;;  %v2044_v61 = vpop.f32.mrb[69].mxu0 }
 0x37e   : > { %v2045_v42 = vadd.f32 %v2044_v61, %v5208_v25  ;;  %v2046_v47 = vpop.f32.mrb[70].mxu0  ;;  %2525 = vmatprep.mubr.bf16.mxu0 %v2192_v58 }
 0x37f   : > { %v2047_v62 = vadd.f32 %v2046_v47, %v5205_v24  ;;  %v2048_v63 = vpop.f32.mrb[71].mxu0  ;;  %2526 = vmatmul.mubr.bf16.gmra.mrb[128].mxu0 %v2191_v57  ;;  %v2147_v41 = vmax.f32 %v2043_v60, 0.0 }
 0x380   : > { %v2049_v1 = vadd.f32 %v2048_v63, %v5208_v25  ;;  %v2148_v6 = vmax.f32 %v2045_v42, 0.0 }
 0x381   : > { %v2149_v5 = vmax.f32 %v2047_v62, 0.0 }
 0x382   : > { %v2150_v7 = vmax.f32 %v2049_v1, 0.0 }
 0x383   : > { %v2193_v8 = vpack.c.bf16 %v2149_v5, %v2147_v41 }
 0x384   : > { %v2194_v9 = vpack.c.bf16 %v2150_v7, %v2148_v6  ;;  %v2052_v10 = vpop.f32.mrb[72].mxu0 }
 0x385   : > { %v2053_v11 = vadd.f32 %v2052_v10, %v5205_v24  ;;  %v2054_v12 = vpop.f32.mrb[73].mxu0 }
 0x386   : > { %v2055_v13 = vadd.f32 %v2054_v12, %v5208_v25  ;;  %v2056_v14 = vpop.f32.mrb[74].mxu0  ;;  %2535 = vmatprep.mubr.bf16.mxu0 %v2194_v9 }
 0x387   : > { %v2057_v15 = vadd.f32 %v2056_v14, %v5205_v24  ;;  %v2058_v16 = vpop.f32.mrb[75].mxu0  ;;  %2536 = vmatmul.mubr.bf16.gmra.mrb[132].mxu0 %v2193_v8  ;;  %v2151_v18 = vmax.f32 %v2053_v11, 0.0 }
 0x388   : > { %v2059_v17 = vadd.f32 %v2058_v16, %v5208_v25  ;;  %v2152_v3 = vmax.f32 %v2055_v13, 0.0 }
 0x389   : > { %v2153_v19 = vmax.f32 %v2057_v15, 0.0 }
 0x38a   : > { %v2154_v4 = vmax.f32 %v2059_v17, 0.0 }
 0x38b   : > { %v2195_v20 = vpack.c.bf16 %v2153_v19, %v2151_v18 }
 0x38c   : > { %v2196_v21 = vpack.c.bf16 %v2154_v4, %v2152_v3  ;;  %v2062_v22 = vpop.f32.mrb[76].mxu0 }
 0x38d   : > { %v2063_v23 = vadd.f32 %v2062_v22, %v5205_v24  ;;  %v2064_v26 = vpop.f32.mrb[77].mxu0 }
 0x38e   : > { %v2065_v28 = vadd.f32 %v2064_v26, %v5208_v25  ;;  %v2066_v29 = vpop.f32.mrb[78].mxu0  ;;  %2545 = vmatprep.mubr.bf16.mxu0 %v2196_v21 }
 0x38f   : > { %v2067_v30 = vadd.f32 %v2066_v29, %v5205_v24  ;;  %v2068_v31 = vpop.f32.mrb[79].mxu0  ;;  %2546 = vmatmul.mubr.bf16.gmra.mrb[136].mxu0 %v2195_v20  ;;  %v2155_v33 = vmax.f32 %v2063_v23, 0.0 }
 0x390   : > { %v2069_v32 = vadd.f32 %v2068_v31, %v5208_v25  ;;  %v2156_v27 = vmax.f32 %v2065_v28, 0.0 }
 0x391   : > { %v2157_v34 = vmax.f32 %v2067_v30, 0.0 }
 0x392   : > { %v2158_v35 = vmax.f32 %v2069_v32, 0.0 }
 0x393   : > { %v2197_v36 = vpack.c.bf16 %v2157_v34, %v2155_v33 }
 0x394   : > { %v2198_v37 = vpack.c.bf16 %v2158_v35, %v2156_v27  ;;  %v2072_v38 = vpop.f32.mrb[80].mxu0 }
 0x395   : > { %v2073_v39 = vadd.f32 %v2072_v38, %v5205_v24  ;;  %v2074_v40 = vpop.f32.mrb[81].mxu0 }
 0x396   : > { %v2075_v43 = vadd.f32 %v2074_v40, %v5208_v25  ;;  %v2076_v44 = vpop.f32.mrb[82].mxu0  ;;  %2555 = vmatprep.mubr.bf16.mxu0 %v2198_v37 }
 0x397   : > { %v2077_v45 = vadd.f32 %v2076_v44, %v5205_v24  ;;  %v2078_v46 = vpop.f32.mrb[83].mxu0  ;;  %2556 = vmatmul.mubr.bf16.gmra.mrb[140].mxu0 %v2197_v36  ;;  %v2159_v52 = vmax.f32 %v2073_v39, 0.0  ;;  %v3880_v36 = vld [vmem:[%s5749_s8 + $0x2] sm:$0x3] }
 0x398   : > { %v2079_v50 = vadd.f32 %v2078_v46, %v5208_v25  ;;  %v2160_v54 = vmax.f32 %v2075_v43, 0.0  ;;  %v5356_v37 = vrot.slane %v3880_v36, %v5013_v0  ;;  %v4464_v46 = vld [vmem:[%s5748_s7 + $0x300] ss:$8 sps:$4 sm:$0xff]  }
 0x399   : > { %v2161_v53 = vmax.f32 %v2077_v45, 0.0  ;;  %3404 = vmatpush1.bf16.msra.mxu0 %v4464_v46 }
 0x39a   : > { %v2162_v55 = vmax.f32 %v2079_v50, 0.0  ;;  %3405 = vmatprep.subr.bf16.mxu0 %v4469_v51 }
 0x39b   : > { %v2199_v49 = vpack.c.bf16 %v2161_v53, %v2159_v52 }
 0x39c   : > { %v2200_v56 = vpack.c.bf16 %v2162_v55, %v2160_v54  ;;  %v2082_v57 = vpop.f32.mrb[84].mxu0 }
 0x39d   : > { %v2083_v58 = vadd.f32 %v2082_v57, %v5205_v24  ;;  %v2084_v59 = vpop.f32.mrb[85].mxu0  ;;  %v4472_v57 = vld [vmem:[%s5748_s7 + $0x324] ss:$8 sps:$4 sm:$0xff]  }
 0x39e   : > { %v2085_v60 = vadd.f32 %v2084_v59, %v5208_v25  ;;  %v2086_v61 = vpop.f32.mrb[86].mxu0  ;;  %2565 = vmatprep.mubr.bf16.mxu0 %v2200_v56 }
 0x39f   : > { %v2087_v42 = vadd.f32 %v2086_v61, %v5205_v24  ;;  %v2088_v47 = vpop.f32.mrb[87].mxu0  ;;  %2566 = vmatmul.mubr.bf16.gmra.mrb[144].mxu0 %v2199_v49  ;;  %v2163_v63 = vmax.f32 %v2083_v58, 0.0  ;;  %v4467_v49 = vld [vmem:[%s5748_s7 + $0x310] ss:$8 sps:$4 sm:$0xff]  }
 0x3a0   : > { %v2089_v62 = vadd.f32 %v2088_v47, %v5208_v25  ;;  %v2164_v41 = vmax.f32 %v2085_v60, 0.0  ;;  %3406 = vmatpush1.bf16.msra.mxu0 %v4467_v49 }
 0x3a1   : > { %v2165_v1 = vmax.f32 %v2087_v42, 0.0  ;;  %3407 = vmatprep.subr.bf16.mxu0 %v4472_v57 }
 0x3a2   : > { %v2166_v5 = vmax.f32 %v2089_v62, 0.0  ;;  %v4470_v62 = vld [vmem:[%s5748_s7 + $0x320] ss:$8 sps:$4 sm:$0xff]  }
 0x3a3   : > { %v2201_v6 = vpack.c.bf16 %v2165_v1, %v2163_v63 }
 0x3a4   : > { %v2202_v7 = vpack.c.bf16 %v2166_v5, %v2164_v41  ;;  %v2092_v8 = vpop.f32.mrb[88].mxu0  ;;  %v4475_v41 = vld [vmem:[%s5748_s7 + $0x334] ss:$8 sps:$4 sm:$0xff]   ;;  %3408 = vmatpush1.bf16.msra.mxu0 %v4470_v62 }
 0x3a5   : > { %v2093_v9 = vadd.f32 %v2092_v8, %v5205_v24  ;;  %v2094_v10 = vpop.f32.mrb[89].mxu0  ;;  %3409 = vmatprep.subr.bf16.mxu0 %v4475_v41 }
 0x3a6   : > { %v2095_v11 = vadd.f32 %v2094_v10, %v5208_v25  ;;  %v2096_v12 = vpop.f32.mrb[90].mxu0  ;;  %2575 = vmatprep.mubr.bf16.mxu0 %v2202_v7  ;;  %v4473_v10 = vld [vmem:[%s5748_s7 + $0x330] ss:$8 sps:$4 sm:$0xff]  }
 0x3a7   : > { %v2097_v13 = vadd.f32 %v2096_v12, %v5205_v24  ;;  %v2098_v14 = vpop.f32.mrb[91].mxu0  ;;  %2576 = vmatmul.mubr.bf16.gmra.mrb[148].mxu0 %v2201_v6  ;;  %v2167_v16 = vmax.f32 %v2093_v9, 0.0  ;;  %v4478_v12 = vld [vmem:[%s5748_s7 + $0x344] ss:$8 sps:$4 sm:$0xff]  }
 0x3a8   : > { %v2099_v15 = vadd.f32 %v2098_v14, %v5208_v25  ;;  %v2168_v18 = vmax.f32 %v2095_v11, 0.0  ;;  %3410 = vmatpush1.bf16.msra.mxu0 %v4473_v10 }
 0x3a9   : > { %v2169_v17 = vmax.f32 %v2097_v13, 0.0  ;;  %3411 = vmatprep.subr.bf16.mxu0 %v4478_v12 }
 0x3aa   : > { %v2170_v19 = vmax.f32 %v2099_v15, 0.0 }
 0x3ab   : > { %v2203_v3 = vpack.c.bf16 %v2169_v17, %v2167_v16 }
 0x3ac   : > { %v2204_v4 = vpack.c.bf16 %v2170_v19, %v2168_v18  ;;  %v2102_v20 = vpop.f32.mrb[92].mxu0  ;;  %v4476_v19 = vld [vmem:[%s5748_s7 + $0x340] ss:$8 sps:$4 sm:$0xff]  }
 0x3ad   : > { %v2103_v21 = vadd.f32 %v2102_v20, %v5205_v24  ;;  %v2104_v22 = vpop.f32.mrb[93].mxu0  ;;  %v4481_v20 = vld [vmem:[%s5748_s7 + $0x354] ss:$8 sps:$4 sm:$0xff]   ;;  %3412 = vmatpush1.bf16.msra.mxu0 %v4476_v19 }
 0x3ae   : > { %v2105_v23 = vadd.f32 %v2104_v22, %v5208_v25  ;;  %v2106_v26 = vpop.f32.mrb[94].mxu0  ;;  %2585 = vmatprep.mubr.bf16.mxu0 %v2204_v4  ;;  %3413 = vmatprep.subr.bf16.mxu0 %v4481_v20 }
 0x3af   : > { %v2107_v28 = vadd.f32 %v2106_v26, %v5205_v24  ;;  %v2108_v29 = vpop.f32.mrb[95].mxu0  ;;  %2586 = vmatmul.mubr.bf16.gmra.mrb[152].mxu0 %v2203_v3  ;;  %v2171_v31 = vmax.f32 %v2103_v21, 0.0  ;;  %v5359_v24 = vrot.slane %v3880_v36, %v5018_v2 }
 0x3b0   : > { %v2109_v30 = vadd.f32 %v2108_v29, %v5208_v25  ;;  %v2172_v33 = vmax.f32 %v2105_v23, 0.0  ;;  %v4479_v29 = vld [vmem:[%s5748_s7 + $0x350] ss:$8 sps:$4 sm:$0xff]  }
 0x3b1   : > { %v2173_v32 = vmax.f32 %v2107_v28, 0.0  ;;  %3414 = vmatpush1.bf16.msra.mxu0 %v4479_v29 }
 0x3b2   : > { %v2174_v34 = vmax.f32 %v2109_v30, 0.0 }
 0x3b3   : > { %v2205_v27 = vpack.c.bf16 %v2173_v32, %v2171_v31  ;;  %v4484_v31 = vld [vmem:[%s5748_s7 + $0x364] ss:$8 sps:$4 sm:$0xff]  }
 0x3b4   : > { %v2206_v35 = vpack.c.bf16 %v2174_v34, %v2172_v33  ;;  %3415 = vmatprep.subr.bf16.mxu0 %v4484_v31 }
 0x3b6   : > { %2595 = vmatprep.mubr.bf16.mxu0 %v2206_v35 }
 0x3b7   : > { %2596 = vmatmul.mubr.bf16.gmra.mrb[156].mxu0 %v2205_v27 }
 0x412   : > { %v2447_v38 = vpop.f32.mrb[96].mxu0 }
 0x413   : > { %v2448_v25 = vadd.f32 %v2447_v38, %v5356_v37  ;;  %v2449_v39 = vpop.f32.mrb[97].mxu0  ;;  %v4482_v38 = vld [vmem:[%s5748_s7 + $0x360] ss:$8 sps:$4 sm:$0xff]  }
 0x414   : > { %v2450_v40 = vadd.f32 %v2449_v39, %v5359_v24  ;;  %v2451_v43 = vpop.f32.mrb[98].mxu0  ;;  %3416 = vmatpush1.bf16.msra.mxu0 %v4482_v38 }
 0x415   : > { %v2452_v44 = vadd.f32 %v2451_v43, %v5356_v37  ;;  %v2453_v45 = vpop.f32.mrb[99].mxu0  ;;  %v2606_v52 = vmax.f32 %v2448_v25, 0.0 }
 0x416   : > { %v2454_v50 = vadd.f32 %v2453_v45, %v5359_v24  ;;  %v2607_v54 = vmax.f32 %v2450_v40, 0.0  ;;  %v4487_v40 = vld [vmem:[%s5748_s7 + $0x374] ss:$8 sps:$4 sm:$0xff]  }
 0x417   : > { %v2608_v53 = vmax.f32 %v2452_v44, 0.0  ;;  %3417 = vmatprep.subr.bf16.mxu0 %v4487_v40 }
 0x418   : > { %v2609_v55 = vmax.f32 %v2454_v50, 0.0  ;;  %v4485_v50 = vld [vmem:[%s5748_s7 + $0x370] ss:$8 sps:$4 sm:$0xff]  }
 0x419   : > { %v2670_v56 = vpack.c.bf16 %v2608_v53, %v2606_v52  ;;  %v4490_v52 = vld [vmem:[%s5748_s7 + $0x384] ss:$8 sps:$4 sm:$0xff]   ;;  %3418 = vmatpush1.bf16.msra.mxu0 %v4485_v50 }
 0x41a   : > { %v2671_v58 = vpack.c.bf16 %v2609_v55, %v2607_v54  ;;  %v2457_v59 = vpop.f32.mrb[100].mxu0  ;;  %3419 = vmatprep.subr.bf16.mxu0 %v4490_v52 }
 0x41b   : > { %v2458_v60 = vadd.f32 %v2457_v59, %v5356_v37  ;;  %v2459_v61 = vpop.f32.mrb[101].mxu0 }
 0x41c   : > { %v2460_v42 = vadd.f32 %v2459_v61, %v5359_v24  ;;  %v2461_v47 = vpop.f32.mrb[102].mxu0  ;;  %2940 = vmatprep.mubr.bf16.mxu1 %v2671_v58  ;;  %v4488_v58 = vld [vmem:[%s5748_s7 + $0x380] ss:$8 sps:$4 sm:$0xff]   ;;  %v4493_v61 = vld [vmem:[%s5748_s7 + $0x394] ss:$8 sps:$4 sm:$0xff]  }
 0x41d   : > { %v2462_v63 = vadd.f32 %v2461_v47, %v5356_v37  ;;  %v2463_v1 = vpop.f32.mrb[103].mxu0  ;;  %2941 = vmatmul.mubr.bf16.vlgmr.msra.gmra.mrb[64].mxu1 %v2670_v56  ;;  %v2610_v6 = vmax.f32 %v2458_v60, 0.0  ;;  %3420 = vmatpush1.bf16.msra.mxu0 %v4488_v58 }
 0x41e   : > { %v2464_v5 = vadd.f32 %v2463_v1, %v5359_v24  ;;  %4135 = vmatpush1.bf16.msra.mxu1 %v4464_v46  ;;  %v2611_v8 = vmax.f32 %v2460_v42, 0.0  ;;  %3421 = vmatprep.subr.bf16.mxu0 %v4493_v61 }
 0x41f   : > { %v2612_v7 = vmax.f32 %v2462_v63, 0.0  ;;  %4120 = vmatprep.subr.bf16.mxu1 %v4469_v51 }
 0x420   : > { %v2613_v9 = vmax.f32 %v2464_v5, 0.0 }
 0x421   : > { %v2672_v11 = vpack.c.bf16 %v2612_v7, %v2610_v6  ;;  %v4496_v6 = vld [vmem:[%s5748_s7 + $0x3a4] ss:$8 sps:$4 sm:$0xff]  }
 0x422   : > { %v2673_v13 = vpack.c.bf16 %v2613_v9, %v2611_v8  ;;  %v2467_v14 = vpop.f32.mrb[104].mxu0  ;;  %4136 = vmatpush1.bf16.msra.mxu1 %v4467_v49 }
 0x423   : > { %v2468_v15 = vadd.f32 %v2467_v14, %v5356_v37  ;;  %v2469_v16 = vpop.f32.mrb[105].mxu0  ;;  %4121 = vmatprep.subr.bf16.mxu1 %v4472_v57 }
 0x424   : > { %v2470_v17 = vadd.f32 %v2469_v16, %v5359_v24  ;;  %v2471_v18 = vpop.f32.mrb[106].mxu0  ;;  %2950 = vmatprep.mubr.bf16.mxu1 %v2673_v13  ;;  %v4494_v13 = vld [vmem:[%s5748_s7 + $0x3a0] ss:$8 sps:$4 sm:$0xff]   ;;  %v4499_v16 = vld [vmem:[%s5748_s7 + $0x3b4] ss:$8 sps:$4 sm:$0xff]  }
 0x425   : > { %v2472_v3 = vadd.f32 %v2471_v18, %v5356_v37  ;;  %v2473_v4 = vpop.f32.mrb[107].mxu0  ;;  %2951 = vmatmul.mubr.bf16.gmra.mrb[68].mxu1 %v2672_v11  ;;  %v2614_v22 = vmax.f32 %v2468_v15, 0.0 }
 0x426   : > { %v2474_v21 = vadd.f32 %v2473_v4, %v5359_v24  ;;  %4137 = vmatpush1.bf16.msra.mxu1 %v4470_v62  ;;  %v2615_v26 = vmax.f32 %v2470_v17, 0.0 }
 0x427   : > { %v2616_v23 = vmax.f32 %v2472_v3, 0.0  ;;  %4122 = vmatprep.subr.bf16.mxu1 %v4475_v41  ;;  %v4491_v41 = vld [vmem:[%s5748_s7 + $0x390] ss:$8 sps:$4 sm:$0xff]  }
 0x428   : > { %v2617_v28 = vmax.f32 %v2474_v21, 0.0  ;;  %3422 = vmatpush1.bf16.msra.mxu0 %v4491_v41 }
 0x429   : > { %v2674_v30 = vpack.c.bf16 %v2616_v23, %v2614_v22  ;;  %3423 = vmatprep.subr.bf16.mxu0 %v4496_v6  ;;  %v4502_v22 = vld [vmem:[%s5748_s7 + $0x3c4] ss:$8 sps:$4 sm:$0xff]  }
 0x42a   : > { %v2675_v32 = vpack.c.bf16 %v2617_v28, %v2615_v26  ;;  %v2477_v33 = vpop.f32.mrb[108].mxu0  ;;  %4138 = vmatpush1.bf16.msra.mxu1 %v4473_v10 }
 0x42b   : > { %v2478_v34 = vadd.f32 %v2477_v33, %v5356_v37  ;;  %v2479_v27 = vpop.f32.mrb[109].mxu0  ;;  %4123 = vmatprep.subr.bf16.mxu1 %v4478_v12 }
 0x42c   : > { %v2480_v35 = vadd.f32 %v2479_v27, %v5359_v24  ;;  %v2481_v36 = vpop.f32.mrb[110].mxu0  ;;  %2960 = vmatprep.mubr.bf16.mxu1 %v2675_v32  ;;  %3424 = vmatpush1.bf16.msra.mxu0 %v4494_v13  ;;  %v4500_v32 = vld [vmem:[%s5748_s7 + $0x3c0] ss:$8 sps:$4 sm:$0xff]   ;;  %v4505_v27 = vld [vmem:[%s5748_s7 + $0x3d4] ss:$8 sps:$4 sm:$0xff]  }
 0x42d   : > { %v2482_v25 = vadd.f32 %v2481_v36, %v5356_v37  ;;  %v2483_v39 = vpop.f32.mrb[111].mxu0  ;;  %2961 = vmatmul.mubr.bf16.gmra.mrb[72].mxu1 %v2674_v30  ;;  %v2618_v44 = vmax.f32 %v2478_v34, 0.0  ;;  %3425 = vmatprep.subr.bf16.mxu0 %v4499_v16 }
 0x42e   : > { %v2484_v43 = vadd.f32 %v2483_v39, %v5359_v24  ;;  %4139 = vmatpush1.bf16.msra.mxu1 %v4476_v19  ;;  %v2619_v46 = vmax.f32 %v2480_v35, 0.0 }
 0x42f   : > { %v2620_v45 = vmax.f32 %v2482_v25, 0.0  ;;  %4124 = vmatprep.subr.bf16.mxu1 %v4481_v20  ;;  %v4497_v20 = vld [vmem:[%s5748_s7 + $0x3b0] ss:$8 sps:$4 sm:$0xff]  }
 0x430   : > { %v2621_v48 = vmax.f32 %v2484_v43, 0.0  ;;  %3426 = vmatpush1.bf16.msra.mxu0 %v4497_v20 }
 0x431   : > { %v2676_v51 = vpack.c.bf16 %v2620_v45, %v2618_v44  ;;  %3427 = vmatprep.subr.bf16.mxu0 %v4502_v22 }
 0x432   : > { %v2677_v53 = vpack.c.bf16 %v2621_v48, %v2619_v46  ;;  %v2487_v54 = vpop.f32.mrb[112].mxu0  ;;  %4140 = vmatpush1.bf16.msra.mxu1 %v4479_v29 }
 0x433   : > { %v2488_v55 = vadd.f32 %v2487_v54, %v5356_v37  ;;  %v2489_v49 = vpop.f32.mrb[113].mxu0  ;;  %4125 = vmatprep.subr.bf16.mxu1 %v4484_v31 }
 0x434   : > { %v2490_v56 = vadd.f32 %v2489_v49, %v5359_v24  ;;  %v2491_v57 = vpop.f32.mrb[114].mxu0  ;;  %2970 = vmatprep.mubr.bf16.mxu1 %v2677_v53  ;;  %3428 = vmatpush1.bf16.msra.mxu0 %v4500_v32 }
 0x435   : > { %v2492_v59 = vadd.f32 %v2491_v57, %v5356_v37  ;;  %v2493_v60 = vpop.f32.mrb[115].mxu0  ;;  %2971 = vmatmul.mubr.bf16.gmra.mrb[76].mxu1 %v2676_v51  ;;  %v2622_v47 = vmax.f32 %v2488_v55, 0.0  ;;  %3429 = vmatprep.subr.bf16.mxu0 %v4505_v27 }
 0x436   : > { %v2494_v42 = vadd.f32 %v2493_v60, %v5359_v24  ;;  %4141 = vmatpush1.bf16.msra.mxu1 %v4482_v38  ;;  %v2623_v63 = vmax.f32 %v2490_v56, 0.0 }
 0x437   : > { %v2624_v62 = vmax.f32 %v2492_v59, 0.0  ;;  %4126 = vmatprep.subr.bf16.mxu1 %v4487_v40  ;;  %v4503_v40 = vld [vmem:[%s5748_s7 + $0x3d0] ss:$8 sps:$4 sm:$0xff]  }
 0x438   : > { %v2625_v1 = vmax.f32 %v2494_v42, 0.0  ;;  %3430 = vmatpush1.bf16.msra.mxu0 %v4503_v40 }
 0x439   : > { %v2678_v5 = vpack.c.bf16 %v2624_v62, %v2622_v47 }
 0x43a   : > { %v2679_v7 = vpack.c.bf16 %v2625_v1, %v2623_v63  ;;  %v2497_v8 = vpop.f32.mrb[116].mxu0  ;;  %4142 = vmatpush1.bf16.msra.mxu1 %v4485_v50 }
 0x43b   : > { %v2498_v9 = vadd.f32 %v2497_v8, %v5356_v37  ;;  %v2499_v10 = vpop.f32.mrb[117].mxu0  ;;  %4127 = vmatprep.subr.bf16.mxu1 %v4490_v52 }
 0x43c   : > { %v2500_v11 = vadd.f32 %v2499_v10, %v5359_v24  ;;  %v2501_v12 = vpop.f32.mrb[118].mxu0  ;;  %2980 = vmatprep.mubr.bf16.mxu1 %v2679_v7 }
 0x43d   : > { %v2502_v14 = vadd.f32 %v2501_v12, %v5356_v37  ;;  %v2503_v15 = vpop.f32.mrb[119].mxu0  ;;  %2981 = vmatmul.mubr.bf16.gmra.mrb[80].mxu1 %v2678_v5  ;;  %v2626_v18 = vmax.f32 %v2498_v9, 0.0 }
 0x43e   : > { %v2504_v17 = vadd.f32 %v2503_v15, %v5359_v24  ;;  %4143 = vmatpush1.bf16.msra.mxu1 %v4488_v58  ;;  %v2627_v3 = vmax.f32 %v2500_v11, 0.0 }
 0x43f   : > { %v2628_v19 = vmax.f32 %v2502_v14, 0.0  ;;  %4128 = vmatprep.subr.bf16.mxu1 %v4493_v61 }
 0x440   : > { %v2629_v4 = vmax.f32 %v2504_v17, 0.0 }
 0x441   : > { %v2680_v21 = vpack.c.bf16 %v2628_v19, %v2626_v18 }
 0x442   : > { %v2681_v23 = vpack.c.bf16 %v2629_v4, %v2627_v3  ;;  %v2507_v26 = vpop.f32.mrb[120].mxu0  ;;  %4144 = vmatpush1.bf16.msra.mxu1 %v4491_v41 }
 0x443   : > { %v2508_v28 = vadd.f32 %v2507_v26, %v5356_v37  ;;  %v2509_v29 = vpop.f32.mrb[121].mxu0  ;;  %4129 = vmatprep.subr.bf16.mxu1 %v4496_v6 }
 0x444   : > { %v2510_v30 = vadd.f32 %v2509_v29, %v5359_v24  ;;  %v2511_v31 = vpop.f32.mrb[122].mxu0  ;;  %2990 = vmatprep.mubr.bf16.mxu1 %v2681_v23 }
 0x445   : > { %v2512_v33 = vadd.f32 %v2511_v31, %v5356_v37  ;;  %v2513_v34 = vpop.f32.mrb[123].mxu0  ;;  %2991 = vmatmul.mubr.bf16.gmra.mrb[84].mxu1 %v2680_v21  ;;  %v2630_v36 = vmax.f32 %v2508_v28, 0.0 }
 0x446   : > { %v2514_v35 = vadd.f32 %v2513_v34, %v5359_v24  ;;  %4145 = vmatpush1.bf16.msra.mxu1 %v4494_v13  ;;  %v2631_v25 = vmax.f32 %v2510_v30, 0.0 }
 0x447   : > { %v2632_v38 = vmax.f32 %v2512_v33, 0.0  ;;  %4130 = vmatprep.subr.bf16.mxu1 %v4499_v16 }
 0x448   : > { %v2633_v39 = vmax.f32 %v2514_v35, 0.0 }
 0x449   : > { %v2682_v43 = vpack.c.bf16 %v2632_v38, %v2630_v36 }
 0x44a   : > { %v2683_v44 = vpack.c.bf16 %v2633_v39, %v2631_v25  ;;  %v2517_v45 = vpop.f32.mrb[124].mxu0  ;;  %4146 = vmatpush1.bf16.msra.mxu1 %v4497_v20 }
 0x44b   : > { %v2518_v46 = vadd.f32 %v2517_v45, %v5356_v37  ;;  %v2519_v48 = vpop.f32.mrb[125].mxu0  ;;  %4131 = vmatprep.subr.bf16.mxu1 %v4502_v22 }
 0x44c   : > { %v2520_v50 = vadd.f32 %v2519_v48, %v5359_v24  ;;  %v2521_v51 = vpop.f32.mrb[126].mxu0  ;;  %3000 = vmatprep.mubr.bf16.mxu1 %v2683_v44 }
 0x44d   : > { %v2522_v52 = vadd.f32 %v2521_v51, %v5356_v37  ;;  %v2523_v53 = vpop.f32.mrb[127].mxu0  ;;  %3001 = vmatmul.mubr.bf16.gmra.mrb[88].mxu1 %v2682_v43  ;;  %v2634_v55 = vmax.f32 %v2518_v46, 0.0 }
 0x44e   : > { %v2524_v54 = vadd.f32 %v2523_v53, %v5359_v24  ;;  %4147 = vmatpush1.bf16.msra.mxu1 %v4500_v32  ;;  %v2635_v56 = vmax.f32 %v2520_v50, 0.0 }
 0x44f   : > { %v2636_v49 = vmax.f32 %v2522_v52, 0.0  ;;  %4132 = vmatprep.subr.bf16.mxu1 %v4505_v27 }
 0x450   : > { %v2637_v57 = vmax.f32 %v2524_v54, 0.0 }
 0x451   : > { %v2684_v58 = vpack.c.bf16 %v2636_v49, %v2634_v55  ;;  %v4508_v49 = vld [vmem:[%s5748_s7 + $0x3e4] ss:$8 sps:$4 sm:$0xff]  }
 0x452   : > { %v2685_v59 = vpack.c.bf16 %v2637_v57, %v2635_v56  ;;  %v2527_v60 = vpop.f32.mrb[128].mxu0  ;;  %4148 = vmatpush1.bf16.msra.mxu1 %v4503_v40  ;;  %3431 = vmatprep.subr.bf16.mxu0 %v4508_v49 }
 0x453   : > { %v2528_v61 = vadd.f32 %v2527_v60, %v5356_v37  ;;  %v2529_v42 = vpop.f32.mrb[129].mxu0  ;;  %4133 = vmatprep.subr.bf16.mxu1 %v4508_v49 }
 0x454   : > { %v2530_v47 = vadd.f32 %v2529_v42, %v5359_v24  ;;  %v2531_v62 = vpop.f32.mrb[130].mxu0  ;;  %3010 = vmatprep.mubr.bf16.mxu1 %v2685_v59 }
 0x455   : > { %v2532_v63 = vadd.f32 %v2531_v62, %v5356_v37  ;;  %v2533_v1 = vpop.f32.mrb[131].mxu0  ;;  %3011 = vmatmul.mubr.bf16.gmra.mrb[92].mxu1 %v2684_v58  ;;  %v2638_v5 = vmax.f32 %v2528_v61, 0.0  ;;  %v4506_v58 = vld [vmem:[%s5748_s7 + $0x3e0] ss:$8 sps:$4 sm:$0xff]  }
 0x456   : > { %v2534_v41 = vadd.f32 %v2533_v1, %v5359_v24  ;;  %v2639_v7 = vmax.f32 %v2530_v47, 0.0  ;;  %3432 = vmatpush1.bf16.msra.mxu0 %v4506_v58  ;;  %4149 = vmatpush1.bf16.msra.mxu1 %v4506_v58 }
 0x457   : > { %v2640_v6 = vmax.f32 %v2532_v63, 0.0  ;;  %v4511_v63 = vld [vmem:[%s5748_s7 + $0x3f4] ss:$8 sps:$4 sm:$0xff]  }
 0x458   : > { %v2641_v8 = vmax.f32 %v2534_v41, 0.0  ;;  %v4509_v41 = vld [vmem:[%s5748_s7 + $0x3f0] ss:$8 sps:$4 sm:$0xff]   ;;  %3433 = vmatprep.subr.bf16.mxu0 %v4511_v63  ;;  %4134 = vmatprep.subr.bf16.mxu1 %v4511_v63 }
 0x459   : > { %v2686_v9 = vpack.c.bf16 %v2640_v6, %v2638_v5 }
 0x45a   : > { %v2687_v10 = vpack.c.bf16 %v2641_v8, %v2639_v7  ;;  %v2537_v11 = vpop.f32.mrb[132].mxu0  ;;  %3434 = vmatpush1.bf16.msra.mxu0 %v4509_v41  ;;  %4150 = vmatpush1.bf16.msra.mxu1 %v4509_v41 }
 0x45b   : > { %v2538_v12 = vadd.f32 %v2537_v11, %v5356_v37  ;;  %v2539_v13 = vpop.f32.mrb[133].mxu0 }
 0x45c   : > { %v2540_v14 = vadd.f32 %v2539_v13, %v5359_v24  ;;  %v2541_v15 = vpop.f32.mrb[134].mxu0  ;;  %3020 = vmatprep.mubr.bf16.mxu1 %v2687_v10 }
 0x45d   : > { %v2542_v16 = vadd.f32 %v2541_v15, %v5356_v37  ;;  %v2543_v17 = vpop.f32.mrb[135].mxu0  ;;  %3021 = vmatmul.mubr.bf16.gmra.mrb[96].mxu1 %v2686_v9  ;;  %v2642_v19 = vmax.f32 %v2538_v12, 0.0 }
 0x45e   : > { %v2544_v18 = vadd.f32 %v2543_v17, %v5359_v24  ;;  %v2643_v4 = vmax.f32 %v2540_v14, 0.0 }
 0x45f   : > { %v2644_v3 = vmax.f32 %v2542_v16, 0.0 }
 0x460   : > { %v2645_v20 = vmax.f32 %v2544_v18, 0.0 }
 0x461   : > { %v2688_v21 = vpack.c.bf16 %v2644_v3, %v2642_v19 }
 0x462   : > { %v2689_v22 = vpack.c.bf16 %v2645_v20, %v2643_v4  ;;  %v2547_v23 = vpop.f32.mrb[136].mxu0 }
 0x463   : > { %v2548_v26 = vadd.f32 %v2547_v23, %v5356_v37  ;;  %v2549_v28 = vpop.f32.mrb[137].mxu0 }
 0x464   : > { %v2550_v29 = vadd.f32 %v2549_v28, %v5359_v24  ;;  %v2551_v30 = vpop.f32.mrb[138].mxu0  ;;  %3030 = vmatprep.mubr.bf16.mxu1 %v2689_v22 }
 0x465   : > { %v2552_v31 = vadd.f32 %v2551_v30, %v5356_v37  ;;  %v2553_v32 = vpop.f32.mrb[139].mxu0  ;;  %3031 = vmatmul.mubr.bf16.gmra.mrb[100].mxu1 %v2688_v21  ;;  %v2646_v34 = vmax.f32 %v2548_v26, 0.0 }
 0x466   : > { %v2554_v33 = vadd.f32 %v2553_v32, %v5359_v24  ;;  %v2647_v35 = vmax.f32 %v2550_v29, 0.0 }
 0x467   : > { %v2648_v27 = vmax.f32 %v2552_v31, 0.0 }
 0x468   : > { %v2649_v36 = vmax.f32 %v2554_v33, 0.0 }
 0x469   : > { %v2690_v38 = vpack.c.bf16 %v2648_v27, %v2646_v34 }
 0x46a   : > { %v2691_v25 = vpack.c.bf16 %v2649_v36, %v2647_v35  ;;  %v2557_v39 = vpop.f32.mrb[140].mxu0 }
 0x46b   : > { %v2558_v40 = vadd.f32 %v2557_v39, %v5356_v37  ;;  %v2559_v43 = vpop.f32.mrb[141].mxu0 }
 0x46c   : > { %v2560_v44 = vadd.f32 %v2559_v43, %v5359_v24  ;;  %v2561_v45 = vpop.f32.mrb[142].mxu0  ;;  %3040 = vmatprep.mubr.bf16.mxu1 %v2691_v25 }
 0x46d   : > { %v2562_v46 = vadd.f32 %v2561_v45, %v5356_v37  ;;  %v2563_v48 = vpop.f32.mrb[143].mxu0  ;;  %3041 = vmatmul.mubr.bf16.gmra.mrb[104].mxu1 %v2690_v38  ;;  %v2650_v51 = vmax.f32 %v2558_v40, 0.0 }
 0x46e   : > { %v2564_v50 = vadd.f32 %v2563_v48, %v5359_v24  ;;  %v2651_v53 = vmax.f32 %v2560_v44, 0.0 }
 0x46f   : > { %v2652_v52 = vmax.f32 %v2562_v46, 0.0 }
 0x470   : > { %v2653_v54 = vmax.f32 %v2564_v50, 0.0 }
 0x471   : > { %v2692_v55 = vpack.c.bf16 %v2652_v52, %v2650_v51 }
 0x472   : > { %v2693_v56 = vpack.c.bf16 %v2653_v54, %v2651_v53  ;;  %v2567_v57 = vpop.f32.mrb[144].mxu0 }
 0x473   : > { %v2568_v59 = vadd.f32 %v2567_v57, %v5356_v37  ;;  %v2569_v60 = vpop.f32.mrb[145].mxu0 }
 0x474   : > { %v2570_v61 = vadd.f32 %v2569_v60, %v5359_v24  ;;  %v2571_v42 = vpop.f32.mrb[146].mxu0  ;;  %3050 = vmatprep.mubr.bf16.mxu1 %v2693_v56  ;;  %v3945_v56 = vld [vmem:[%s5749_s8 + $0x4] sm:$0x3] }
 0x475   : > { %v2572_v47 = vadd.f32 %v2571_v42, %v5356_v37  ;;  %v2573_v62 = vpop.f32.mrb[147].mxu0  ;;  %3051 = vmatmul.mubr.bf16.gmra.mrb[108].mxu1 %v2692_v55  ;;  %v2654_v5 = vmax.f32 %v2568_v59, 0.0  ;;  %v5525_v57 = vrot.slane %v3945_v56, %v5013_v0 }
 0x476   : > { %v2574_v1 = vadd.f32 %v2573_v62, %v5359_v24  ;;  %v2655_v7 = vmax.f32 %v2570_v61, 0.0 }
 0x477   : > { %v2656_v6 = vmax.f32 %v2572_v47, 0.0 }
 0x478   : > { %v2657_v8 = vmax.f32 %v2574_v1, 0.0 }
 0x479   : > { %v2694_v9 = vpack.c.bf16 %v2656_v6, %v2654_v5 }
 0x47a   : > { %v2695_v10 = vpack.c.bf16 %v2657_v8, %v2655_v7  ;;  %v2577_v11 = vpop.f32.mrb[148].mxu0 }
 0x47b   : > { %v2578_v12 = vadd.f32 %v2577_v11, %v5356_v37  ;;  %v2579_v13 = vpop.f32.mrb[149].mxu0 }
 0x47c   : > { %v2580_v14 = vadd.f32 %v2579_v13, %v5359_v24  ;;  %v2581_v15 = vpop.f32.mrb[150].mxu0  ;;  %3060 = vmatprep.mubr.bf16.mxu1 %v2695_v10 }
 0x47d   : > { %v2582_v16 = vadd.f32 %v2581_v15, %v5356_v37  ;;  %v2583_v17 = vpop.f32.mrb[151].mxu0  ;;  %3061 = vmatmul.mubr.bf16.gmra.mrb[112].mxu1 %v2694_v9  ;;  %v2658_v19 = vmax.f32 %v2578_v12, 0.0 }
 0x47e   : > { %v2584_v18 = vadd.f32 %v2583_v17, %v5359_v24  ;;  %v2659_v4 = vmax.f32 %v2580_v14, 0.0 }
 0x47f   : > { %v2660_v3 = vmax.f32 %v2582_v16, 0.0 }
 0x480   : > { %v2661_v20 = vmax.f32 %v2584_v18, 0.0 }
 0x481   : > { %v2696_v21 = vpack.c.bf16 %v2660_v3, %v2658_v19 }
 0x482   : > { %v2697_v22 = vpack.c.bf16 %v2661_v20, %v2659_v4  ;;  %v2587_v23 = vpop.f32.mrb[152].mxu0 }
 0x483   : > { %v2588_v26 = vadd.f32 %v2587_v23, %v5356_v37  ;;  %v2589_v28 = vpop.f32.mrb[153].mxu0 }
 0x484   : > { %v2590_v29 = vadd.f32 %v2589_v28, %v5359_v24  ;;  %v2591_v30 = vpop.f32.mrb[154].mxu0  ;;  %3070 = vmatprep.mubr.bf16.mxu1 %v2697_v22 }
 0x485   : > { %v2592_v31 = vadd.f32 %v2591_v30, %v5356_v37  ;;  %v2593_v32 = vpop.f32.mrb[155].mxu0  ;;  %3071 = vmatmul.mubr.bf16.gmra.mrb[116].mxu1 %v2696_v21  ;;  %v2662_v34 = vmax.f32 %v2588_v26, 0.0 }
 0x486   : > { %v2594_v33 = vadd.f32 %v2593_v32, %v5359_v24  ;;  %v2663_v35 = vmax.f32 %v2590_v29, 0.0 }
 0x487   : > { %v2664_v27 = vmax.f32 %v2592_v31, 0.0 }
 0x488   : > { %v2665_v36 = vmax.f32 %v2594_v33, 0.0 }
 0x489   : > { %v2698_v38 = vpack.c.bf16 %v2664_v27, %v2662_v34 }
 0x48a   : > { %v2699_v25 = vpack.c.bf16 %v2665_v36, %v2663_v35  ;;  %v2597_v39 = vpop.f32.mrb[156].mxu0 }
 0x48b   : > { %v2598_v40 = vadd.f32 %v2597_v39, %v5356_v37  ;;  %v2599_v43 = vpop.f32.mrb[157].mxu0 }
 0x48c   : > { %v2600_v44 = vadd.f32 %v2599_v43, %v5359_v24  ;;  %v2601_v45 = vpop.f32.mrb[158].mxu0  ;;  %3080 = vmatprep.mubr.bf16.mxu1 %v2699_v25 }
 0x48d   : > { %v2602_v46 = vadd.f32 %v2601_v45, %v5356_v37  ;;  %v2603_v48 = vpop.f32.mrb[159].mxu0  ;;  %3081 = vmatmul.mubr.bf16.gmra.mrb[120].mxu1 %v2698_v38  ;;  %v2666_v51 = vmax.f32 %v2598_v40, 0.0  ;;  %v5528_v37 = vrot.slane %v3945_v56, %v5018_v2 }
 0x48e   : > { %v2604_v50 = vadd.f32 %v2603_v48, %v5359_v24  ;;  %v2667_v53 = vmax.f32 %v2600_v44, 0.0 }
 0x48f   : > { %v2668_v52 = vmax.f32 %v2602_v46, 0.0 }
 0x490   : > { %v2669_v54 = vmax.f32 %v2604_v50, 0.0 }
 0x491   : > { %v2700_v55 = vpack.c.bf16 %v2668_v52, %v2666_v51 }
 0x492   : > { %v2701_v49 = vpack.c.bf16 %v2669_v54, %v2667_v53 }
 0x494   : > { %3090 = vmatprep.mubr.bf16.mxu1 %v2701_v49 }
 0x495   : > { %3091 = vmatmul.mubr.bf16.gmra.mrb[124].mxu1 %v2700_v55 }
 0x4f0   : > { %v2942_v58 = vpop.f32.mrb[64].mxu1 }
 0x4f1   : > { %v2943_v24 = vadd.f32 %v2942_v58, %v5525_v57  ;;  %v2944_v59 = vpop.f32.mrb[65].mxu1 }
 0x4f2   : > { %v2945_v60 = vadd.f32 %v2944_v59, %v5528_v37  ;;  %v2946_v61 = vpop.f32.mrb[66].mxu1 }
 0x4f3   : > { %v2947_v42 = vadd.f32 %v2946_v61, %v5525_v57  ;;  %v2948_v47 = vpop.f32.mrb[67].mxu1  ;;  %v3101_v63 = vmax.f32 %v2943_v24, 0.0 }
 0x4f4   : > { %v2949_v62 = vadd.f32 %v2948_v47, %v5528_v37  ;;  %v3102_v41 = vmax.f32 %v2945_v60, 0.0 }
 0x4f5   : > { %v3103_v1 = vmax.f32 %v2947_v42, 0.0 }
 0x4f6   : > { %v3104_v5 = vmax.f32 %v2949_v62, 0.0 }
 0x4f7   : > { %v3165_v6 = vpack.c.bf16 %v3103_v1, %v3101_v63 }
 0x4f8   : > { %v3166_v7 = vpack.c.bf16 %v3104_v5, %v3102_v41  ;;  %v2952_v8 = vpop.f32.mrb[68].mxu1 }
 0x4f9   : > { %v2953_v9 = vadd.f32 %v2952_v8, %v5525_v57  ;;  %v2954_v10 = vpop.f32.mrb[69].mxu1 }
 0x4fa   : > { %v2955_v11 = vadd.f32 %v2954_v10, %v5528_v37  ;;  %v2956_v12 = vpop.f32.mrb[70].mxu1  ;;  %3435 = vmatprep.mubr.bf16.mxu0 %v3166_v7 }
 0x4fb   : > { %v2957_v13 = vadd.f32 %v2956_v12, %v5525_v57  ;;  %v2958_v14 = vpop.f32.mrb[71].mxu1  ;;  %3436 = vmatmul.mubr.bf16.vlgmr.msra.gmra.mrb[160].mxu0 %v3165_v6  ;;  %v3105_v16 = vmax.f32 %v2953_v9, 0.0 }
 0x4fc   : > { %v2959_v15 = vadd.f32 %v2958_v14, %v5528_v37  ;;  %v3106_v18 = vmax.f32 %v2955_v11, 0.0 }
 0x4fd   : > { %v3107_v17 = vmax.f32 %v2957_v13, 0.0 }
 0x4fe   : > { %v3108_v19 = vmax.f32 %v2959_v15, 0.0 }
 0x4ff   : > { %v3167_v3 = vpack.c.bf16 %v3107_v17, %v3105_v16 }
 0x500   : > { %v3168_v4 = vpack.c.bf16 %v3108_v19, %v3106_v18  ;;  %v2962_v20 = vpop.f32.mrb[72].mxu1 }
 0x501   : > { %v2963_v21 = vadd.f32 %v2962_v20, %v5525_v57  ;;  %v2964_v22 = vpop.f32.mrb[73].mxu1 }
 0x502   : > { %v2965_v23 = vadd.f32 %v2964_v22, %v5528_v37  ;;  %v2966_v26 = vpop.f32.mrb[74].mxu1  ;;  %3445 = vmatprep.mubr.bf16.mxu0 %v3168_v4 }
 0x503   : > { %v2967_v28 = vadd.f32 %v2966_v26, %v5525_v57  ;;  %v2968_v29 = vpop.f32.mrb[75].mxu1  ;;  %3446 = vmatmul.mubr.bf16.gmra.mrb[164].mxu0 %v3167_v3  ;;  %v3109_v31 = vmax.f32 %v2963_v21, 0.0 }
 0x504   : > { %v2969_v30 = vadd.f32 %v2968_v29, %v5528_v37  ;;  %v3110_v33 = vmax.f32 %v2965_v23, 0.0 }
 0x505   : > { %v3111_v32 = vmax.f32 %v2967_v28, 0.0 }
 0x506   : > { %v3112_v34 = vmax.f32 %v2969_v30, 0.0 }
 0x507   : > { %v3169_v27 = vpack.c.bf16 %v3111_v32, %v3109_v31 }
 0x508   : > { %v3170_v35 = vpack.c.bf16 %v3112_v34, %v3110_v33  ;;  %v2972_v36 = vpop.f32.mrb[76].mxu1 }
 0x509   : > { %v2973_v38 = vadd.f32 %v2972_v36, %v5525_v57  ;;  %v2974_v25 = vpop.f32.mrb[77].mxu1 }
 0x50a   : > { %v2975_v39 = vadd.f32 %v2974_v25, %v5528_v37  ;;  %v2976_v40 = vpop.f32.mrb[78].mxu1  ;;  %3455 = vmatprep.mubr.bf16.mxu0 %v3170_v35 }
 0x50b   : > { %v2977_v43 = vadd.f32 %v2976_v40, %v5525_v57  ;;  %v2978_v44 = vpop.f32.mrb[79].mxu1  ;;  %3456 = vmatmul.mubr.bf16.gmra.mrb[168].mxu0 %v3169_v27  ;;  %v3113_v46 = vmax.f32 %v2973_v38, 0.0 }
 0x50c   : > { %v2979_v45 = vadd.f32 %v2978_v44, %v5528_v37  ;;  %v3114_v50 = vmax.f32 %v2975_v39, 0.0 }
 0x50d   : > { %v3115_v48 = vmax.f32 %v2977_v43, 0.0 }
 0x50e   : > { %v3116_v51 = vmax.f32 %v2979_v45, 0.0 }
 0x50f   : > { %v3171_v52 = vpack.c.bf16 %v3115_v48, %v3113_v46 }
 0x510   : > { %v3172_v53 = vpack.c.bf16 %v3116_v51, %v3114_v50  ;;  %v2982_v54 = vpop.f32.mrb[80].mxu1 }
 0x511   : > { %v2983_v55 = vadd.f32 %v2982_v54, %v5525_v57  ;;  %v2984_v49 = vpop.f32.mrb[81].mxu1 }
 0x512   : > { %v2985_v56 = vadd.f32 %v2984_v49, %v5528_v37  ;;  %v2986_v58 = vpop.f32.mrb[82].mxu1  ;;  %3465 = vmatprep.mubr.bf16.mxu0 %v3172_v53 }
 0x513   : > { %v2987_v24 = vadd.f32 %v2986_v58, %v5525_v57  ;;  %v2988_v59 = vpop.f32.mrb[83].mxu1  ;;  %3466 = vmatmul.mubr.bf16.gmra.mrb[172].mxu0 %v3171_v52  ;;  %v3117_v61 = vmax.f32 %v2983_v55, 0.0 }
 0x514   : > { %v2989_v60 = vadd.f32 %v2988_v59, %v5528_v37  ;;  %v3118_v47 = vmax.f32 %v2985_v56, 0.0 }
 0x515   : > { %v3119_v42 = vmax.f32 %v2987_v24, 0.0 }
 0x516   : > { %v3120_v62 = vmax.f32 %v2989_v60, 0.0 }
 0x517   : > { %v3173_v63 = vpack.c.bf16 %v3119_v42, %v3117_v61 }
 0x518   : > { %v3174_v1 = vpack.c.bf16 %v3120_v62, %v3118_v47  ;;  %v2992_v41 = vpop.f32.mrb[84].mxu1 }
 0x519   : > { %v2993_v5 = vadd.f32 %v2992_v41, %v5525_v57  ;;  %v2994_v6 = vpop.f32.mrb[85].mxu1 }
 0x51a   : > { %v2995_v7 = vadd.f32 %v2994_v6, %v5528_v37  ;;  %v2996_v8 = vpop.f32.mrb[86].mxu1  ;;  %3475 = vmatprep.mubr.bf16.mxu0 %v3174_v1 }
 0x51b   : > { %v2997_v9 = vadd.f32 %v2996_v8, %v5525_v57  ;;  %v2998_v10 = vpop.f32.mrb[87].mxu1  ;;  %3476 = vmatmul.mubr.bf16.gmra.mrb[176].mxu0 %v3173_v63  ;;  %v3121_v12 = vmax.f32 %v2993_v5, 0.0 }
 0x51c   : > { %v2999_v11 = vadd.f32 %v2998_v10, %v5528_v37  ;;  %v3122_v14 = vmax.f32 %v2995_v7, 0.0 }
 0x51d   : > { %v3123_v13 = vmax.f32 %v2997_v9, 0.0 }
 0x51e   : > { %v3124_v15 = vmax.f32 %v2999_v11, 0.0 }
 0x51f   : > { %v3175_v16 = vpack.c.bf16 %v3123_v13, %v3121_v12 }
 0x520   : > { %v3176_v17 = vpack.c.bf16 %v3124_v15, %v3122_v14  ;;  %v3002_v18 = vpop.f32.mrb[88].mxu1 }
 0x521   : > { %v3003_v19 = vadd.f32 %v3002_v18, %v5525_v57  ;;  %v3004_v3 = vpop.f32.mrb[89].mxu1 }
 0x522   : > { %v3005_v4 = vadd.f32 %v3004_v3, %v5528_v37  ;;  %v3006_v20 = vpop.f32.mrb[90].mxu1  ;;  %3485 = vmatprep.mubr.bf16.mxu0 %v3176_v17 }
 0x523   : > { %v3007_v21 = vadd.f32 %v3006_v20, %v5525_v57  ;;  %v3008_v22 = vpop.f32.mrb[91].mxu1  ;;  %3486 = vmatmul.mubr.bf16.gmra.mrb[180].mxu0 %v3175_v16  ;;  %v3125_v26 = vmax.f32 %v3003_v19, 0.0 }
 0x524   : > { %v3009_v23 = vadd.f32 %v3008_v22, %v5528_v37  ;;  %v3126_v29 = vmax.f32 %v3005_v4, 0.0 }
 0x525   : > { %v3127_v28 = vmax.f32 %v3007_v21, 0.0 }
 0x526   : > { %v3128_v30 = vmax.f32 %v3009_v23, 0.0 }
 0x527   : > { %v3177_v31 = vpack.c.bf16 %v3127_v28, %v3125_v26 }
 0x528   : > { %v3178_v32 = vpack.c.bf16 %v3128_v30, %v3126_v29  ;;  %v3012_v33 = vpop.f32.mrb[92].mxu1 }
 0x529   : > { %v3013_v34 = vadd.f32 %v3012_v33, %v5525_v57  ;;  %v3014_v27 = vpop.f32.mrb[93].mxu1 }
 0x52a   : > { %v3015_v35 = vadd.f32 %v3014_v27, %v5528_v37  ;;  %v3016_v36 = vpop.f32.mrb[94].mxu1  ;;  %3495 = vmatprep.mubr.bf16.mxu0 %v3178_v32 }
 0x52b   : > { %v3017_v38 = vadd.f32 %v3016_v36, %v5525_v57  ;;  %v3018_v25 = vpop.f32.mrb[95].mxu1  ;;  %3496 = vmatmul.mubr.bf16.gmra.mrb[184].mxu0 %v3177_v31  ;;  %v3129_v40 = vmax.f32 %v3013_v34, 0.0 }
 0x52c   : > { %v3019_v39 = vadd.f32 %v3018_v25, %v5528_v37  ;;  %v3130_v44 = vmax.f32 %v3015_v35, 0.0 }
 0x52d   : > { %v3131_v43 = vmax.f32 %v3017_v38, 0.0 }
 0x52e   : > { %v3132_v45 = vmax.f32 %v3019_v39, 0.0 }
 0x52f   : > { %v3179_v46 = vpack.c.bf16 %v3131_v43, %v3129_v40 }
 0x530   : > { %v3180_v48 = vpack.c.bf16 %v3132_v45, %v3130_v44  ;;  %v3022_v50 = vpop.f32.mrb[96].mxu1 }
 0x531   : > { %v3023_v51 = vadd.f32 %v3022_v50, %v5525_v57  ;;  %v3024_v52 = vpop.f32.mrb[97].mxu1 }
 0x532   : > { %v3025_v53 = vadd.f32 %v3024_v52, %v5528_v37  ;;  %v3026_v54 = vpop.f32.mrb[98].mxu1  ;;  %3505 = vmatprep.mubr.bf16.mxu0 %v3180_v48 }
 0x533   : > { %v3027_v55 = vadd.f32 %v3026_v54, %v5525_v57  ;;  %v3028_v49 = vpop.f32.mrb[99].mxu1  ;;  %3506 = vmatmul.mubr.bf16.gmra.mrb[188].mxu0 %v3179_v46  ;;  %v3133_v58 = vmax.f32 %v3023_v51, 0.0 }
 0x534   : > { %v3029_v56 = vadd.f32 %v3028_v49, %v5528_v37  ;;  %v3134_v59 = vmax.f32 %v3025_v53, 0.0 }
 0x535   : > { %v3135_v24 = vmax.f32 %v3027_v55, 0.0 }
 0x536   : > { %v3136_v60 = vmax.f32 %v3029_v56, 0.0 }
 0x537   : > { %v3181_v61 = vpack.c.bf16 %v3135_v24, %v3133_v58 }
 0x538   : > { %v3182_v42 = vpack.c.bf16 %v3136_v60, %v3134_v59  ;;  %v3032_v47 = vpop.f32.mrb[100].mxu1 }
 0x539   : > { %v3033_v62 = vadd.f32 %v3032_v47, %v5525_v57  ;;  %v3034_v63 = vpop.f32.mrb[101].mxu1 }
 0x53a   : > { %v3035_v1 = vadd.f32 %v3034_v63, %v5528_v37  ;;  %v3036_v41 = vpop.f32.mrb[102].mxu1  ;;  %3515 = vmatprep.mubr.bf16.mxu0 %v3182_v42 }
 0x53b   : > { %v3037_v5 = vadd.f32 %v3036_v41, %v5525_v57  ;;  %v3038_v6 = vpop.f32.mrb[103].mxu1  ;;  %3516 = vmatmul.mubr.bf16.gmra.mrb[192].mxu0 %v3181_v61  ;;  %v3137_v8 = vmax.f32 %v3033_v62, 0.0 }
 0x53c   : > { %v3039_v7 = vadd.f32 %v3038_v6, %v5528_v37  ;;  %v3138_v10 = vmax.f32 %v3035_v1, 0.0 }
 0x53d   : > { %v3139_v9 = vmax.f32 %v3037_v5, 0.0 }
 0x53e   : > { %v3140_v11 = vmax.f32 %v3039_v7, 0.0 }
 0x53f   : > { %v3183_v12 = vpack.c.bf16 %v3139_v9, %v3137_v8 }
 0x540   : > { %v3184_v13 = vpack.c.bf16 %v3140_v11, %v3138_v10  ;;  %v3042_v14 = vpop.f32.mrb[104].mxu1 }
 0x541   : > { %v3043_v15 = vadd.f32 %v3042_v14, %v5525_v57  ;;  %v3044_v16 = vpop.f32.mrb[105].mxu1 }
 0x542   : > { %v3045_v17 = vadd.f32 %v3044_v16, %v5528_v37  ;;  %v3046_v18 = vpop.f32.mrb[106].mxu1  ;;  %3525 = vmatprep.mubr.bf16.mxu0 %v3184_v13 }
 0x543   : > { %v3047_v19 = vadd.f32 %v3046_v18, %v5525_v57  ;;  %v3048_v3 = vpop.f32.mrb[107].mxu1  ;;  %3526 = vmatmul.mubr.bf16.gmra.mrb[196].mxu0 %v3183_v12  ;;  %v3141_v20 = vmax.f32 %v3043_v15, 0.0 }
 0x544   : > { %v3049_v4 = vadd.f32 %v3048_v3, %v5528_v37  ;;  %v3142_v22 = vmax.f32 %v3045_v17, 0.0 }
 0x545   : > { %v3143_v21 = vmax.f32 %v3047_v19, 0.0 }
 0x546   : > { %v3144_v23 = vmax.f32 %v3049_v4, 0.0 }
 0x547   : > { %v3185_v26 = vpack.c.bf16 %v3143_v21, %v3141_v20 }
 0x548   : > { %v3186_v28 = vpack.c.bf16 %v3144_v23, %v3142_v22  ;;  %v3052_v29 = vpop.f32.mrb[108].mxu1 }
 0x549   : > { %v3053_v30 = vadd.f32 %v3052_v29, %v5525_v57  ;;  %v3054_v31 = vpop.f32.mrb[109].mxu1 }
 0x54a   : > { %v3055_v32 = vadd.f32 %v3054_v31, %v5528_v37  ;;  %v3056_v33 = vpop.f32.mrb[110].mxu1  ;;  %3535 = vmatprep.mubr.bf16.mxu0 %v3186_v28 }
 0x54b   : > { %v3057_v34 = vadd.f32 %v3056_v33, %v5525_v57  ;;  %v3058_v27 = vpop.f32.mrb[111].mxu1  ;;  %3536 = vmatmul.mubr.bf16.gmra.mrb[200].mxu0 %v3185_v26  ;;  %v3145_v36 = vmax.f32 %v3053_v30, 0.0 }
 0x54c   : > { %v3059_v35 = vadd.f32 %v3058_v27, %v5528_v37  ;;  %v3146_v25 = vmax.f32 %v3055_v32, 0.0 }
 0x54d   : > { %v3147_v38 = vmax.f32 %v3057_v34, 0.0 }
 0x54e   : > { %v3148_v39 = vmax.f32 %v3059_v35, 0.0 }
 0x54f   : > { %v3187_v40 = vpack.c.bf16 %v3147_v38, %v3145_v36 }
 0x550   : > { %v3188_v43 = vpack.c.bf16 %v3148_v39, %v3146_v25  ;;  %v3062_v44 = vpop.f32.mrb[112].mxu1  ;;  %v4010_v25 = vld [vmem:[%s5749_s8 + $0x6] sm:$0x3] }
 0x551   : > { %v3063_v45 = vadd.f32 %v3062_v44, %v5525_v57  ;;  %v3064_v46 = vpop.f32.mrb[113].mxu1  ;;  %v5598_v39 = vrot.slane %v4010_v25, %v5013_v0 }
 0x552   : > { %v3065_v48 = vadd.f32 %v3064_v46, %v5528_v37  ;;  %v3066_v50 = vpop.f32.mrb[114].mxu1  ;;  %3545 = vmatprep.mubr.bf16.mxu0 %v3188_v43 }
 0x553   : > { %v3067_v51 = vadd.f32 %v3066_v50, %v5525_v57  ;;  %v3068_v52 = vpop.f32.mrb[115].mxu1  ;;  %3546 = vmatmul.mubr.bf16.gmra.mrb[204].mxu0 %v3187_v40  ;;  %v3149_v54 = vmax.f32 %v3063_v45, 0.0 }
 0x554   : > { %v3069_v53 = vadd.f32 %v3068_v52, %v5528_v37  ;;  %v3150_v49 = vmax.f32 %v3065_v48, 0.0 }
 0x555   : > { %v3151_v55 = vmax.f32 %v3067_v51, 0.0 }
 0x556   : > { %v3152_v56 = vmax.f32 %v3069_v53, 0.0 }
 0x557   : > { %v3189_v58 = vpack.c.bf16 %v3151_v55, %v3149_v54 }
 0x558   : > { %v3190_v24 = vpack.c.bf16 %v3152_v56, %v3150_v49  ;;  %v3072_v59 = vpop.f32.mrb[116].mxu1 }
 0x559   : > { %v3073_v60 = vadd.f32 %v3072_v59, %v5525_v57  ;;  %v3074_v61 = vpop.f32.mrb[117].mxu1 }
 0x55a   : > { %v3075_v42 = vadd.f32 %v3074_v61, %v5528_v37  ;;  %v3076_v47 = vpop.f32.mrb[118].mxu1  ;;  %3555 = vmatprep.mubr.bf16.mxu1 %v3190_v24 }
 0x55b   : > { %v3077_v62 = vadd.f32 %v3076_v47, %v5525_v57  ;;  %v3078_v63 = vpop.f32.mrb[119].mxu1  ;;  %3556 = vmatmul.mubr.bf16.vlgmr.msra.gmra.mrb[128].mxu1 %v3189_v58  ;;  %v3153_v41 = vmax.f32 %v3073_v60, 0.0 }
 0x55c   : > { %v3079_v1 = vadd.f32 %v3078_v63, %v5528_v37  ;;  %v3154_v6 = vmax.f32 %v3075_v42, 0.0 }
 0x55d   : > { %v3155_v5 = vmax.f32 %v3077_v62, 0.0 }
 0x55e   : > { %v3156_v7 = vmax.f32 %v3079_v1, 0.0 }
 0x55f   : > { %v3191_v8 = vpack.c.bf16 %v3155_v5, %v3153_v41 }
 0x560   : > { %v3192_v9 = vpack.c.bf16 %v3156_v7, %v3154_v6  ;;  %v3082_v10 = vpop.f32.mrb[120].mxu1 }
 0x561   : > { %v3083_v11 = vadd.f32 %v3082_v10, %v5525_v57  ;;  %v3084_v12 = vpop.f32.mrb[121].mxu1 }
 0x562   : > { %v3085_v13 = vadd.f32 %v3084_v12, %v5528_v37  ;;  %v3086_v14 = vpop.f32.mrb[122].mxu1  ;;  %3565 = vmatprep.mubr.bf16.mxu1 %v3192_v9 }
 0x563   : > { %v3087_v15 = vadd.f32 %v3086_v14, %v5525_v57  ;;  %v3088_v16 = vpop.f32.mrb[123].mxu1  ;;  %3566 = vmatmul.mubr.bf16.gmra.mrb[132].mxu1 %v3191_v8  ;;  %v3157_v18 = vmax.f32 %v3083_v11, 0.0 }
 0x564   : > { %v3089_v17 = vadd.f32 %v3088_v16, %v5528_v37  ;;  %v3158_v3 = vmax.f32 %v3085_v13, 0.0 }
 0x565   : > { %v3159_v19 = vmax.f32 %v3087_v15, 0.0 }
 0x566   : > { %v3160_v4 = vmax.f32 %v3089_v17, 0.0 }
 0x567   : > { %v3193_v20 = vpack.c.bf16 %v3159_v19, %v3157_v18 }
 0x568   : > { %v3194_v21 = vpack.c.bf16 %v3160_v4, %v3158_v3  ;;  %v3092_v22 = vpop.f32.mrb[124].mxu1 }
 0x569   : > { %v3093_v23 = vadd.f32 %v3092_v22, %v5525_v57  ;;  %v3094_v26 = vpop.f32.mrb[125].mxu1 }
 0x56a   : > { %v3095_v28 = vadd.f32 %v3094_v26, %v5528_v37  ;;  %v3096_v29 = vpop.f32.mrb[126].mxu1  ;;  %3575 = vmatprep.mubr.bf16.mxu1 %v3194_v21 }
 0x56b   : > { %v3097_v30 = vadd.f32 %v3096_v29, %v5525_v57  ;;  %v3098_v31 = vpop.f32.mrb[127].mxu1  ;;  %3576 = vmatmul.mubr.bf16.gmra.mrb[136].mxu1 %v3193_v20  ;;  %v3161_v33 = vmax.f32 %v3093_v23, 0.0  ;;  %v5601_v57 = vrot.slane %v4010_v25, %v5018_v2 }
 0x56c   : > { %v3099_v32 = vadd.f32 %v3098_v31, %v5528_v37  ;;  %v3162_v27 = vmax.f32 %v3095_v28, 0.0 }
 0x56d   : > { %v3163_v34 = vmax.f32 %v3097_v30, 0.0 }
 0x56e   : > { %v3164_v35 = vmax.f32 %v3099_v32, 0.0 }
 0x56f   : > { %v3195_v36 = vpack.c.bf16 %v3163_v34, %v3161_v33 }
 0x570   : > { %v3196_v38 = vpack.c.bf16 %v3164_v35, %v3162_v27 }
 0x572   : > { %3585 = vmatprep.mubr.bf16.mxu1 %v3196_v38 }
 0x573   : > { %3586 = vmatmul.mubr.bf16.gmra.mrb[140].mxu1 %v3195_v36 }
 0x5ce   : > { %v3437_v37 = vpop.f32.mrb[160].mxu0 }
 0x5cf   : > { %v3438_v40 = vadd.f32 %v3437_v37, %v5598_v39  ;;  %v3439_v43 = vpop.f32.mrb[161].mxu0 }
 0x5d0   : > { %v3440_v0 = vadd.f32 %v3439_v43, %v5601_v57  ;;  %v3441_v44 = vpop.f32.mrb[162].mxu0 }
 0x5d1   : > { %3596 = vst [vmem:[%s5608_s22] sm:$0xff] %v3438_v40  ;;  %v3442_v2 = vadd.f32 %v3441_v44, %v5598_v39  ;;  %v3443_v45 = vpop.f32.mrb[163].mxu0 }
 0x5d2   : > { %3597 = vst [vmem:[%s5608_s22 + $0x8] sm:$0xff] %v3440_v0  ;;  %v3444_v46 = vadd.f32 %v3443_v45, %v5601_v57 }
 0x5d3   : > { %3598 = vst [vmem:[%s5608_s22 + $0x10] sm:$0xff] %v3442_v2 }
 0x5d4   : > { %3599 = vst [vmem:[%s5608_s22 + $0x18] sm:$0xff] %v3444_v46 }
 0x5d6   : > { %v3447_v48 = vpop.f32.mrb[164].mxu0 }
 0x5d7   : > { %v3448_v50 = vadd.f32 %v3447_v48, %v5598_v39  ;;  %v3449_v51 = vpop.f32.mrb[165].mxu0 }
 0x5d8   : > { %v3450_v52 = vadd.f32 %v3449_v51, %v5601_v57  ;;  %v3451_v53 = vpop.f32.mrb[166].mxu0 }
 0x5d9   : > { %3600 = vst [vmem:[%s5608_s22 + $0x20] sm:$0xff] %v3448_v50  ;;  %v3452_v54 = vadd.f32 %v3451_v53, %v5598_v39  ;;  %v3453_v55 = vpop.f32.mrb[167].mxu0 }
 0x5da   : > { %3601 = vst [vmem:[%s5608_s22 + $0x28] sm:$0xff] %v3450_v52  ;;  %v3454_v49 = vadd.f32 %v3453_v55, %v5601_v57 }
 0x5db   : > { %3602 = vst [vmem:[%s5608_s22 + $0x30] sm:$0xff] %v3452_v54 }
 0x5dc   : > { %3603 = vst [vmem:[%s5608_s22 + $0x38] sm:$0xff] %v3454_v49 }
 0x5de   : > { %v3457_v56 = vpop.f32.mrb[168].mxu0 }
 0x5df   : > { %v3458_v58 = vadd.f32 %v3457_v56, %v5598_v39  ;;  %v3459_v24 = vpop.f32.mrb[169].mxu0 }
 0x5e0   : > { %v3460_v59 = vadd.f32 %v3459_v24, %v5601_v57  ;;  %v3461_v60 = vpop.f32.mrb[170].mxu0 }
 0x5e1   : > { %3604 = vst [vmem:[%s5608_s22 + $0x40] sm:$0xff] %v3458_v58  ;;  %v3462_v61 = vadd.f32 %v3461_v60, %v5598_v39  ;;  %v3463_v42 = vpop.f32.mrb[171].mxu0 }
 0x5e2   : > { %3605 = vst [vmem:[%s5608_s22 + $0x48] sm:$0xff] %v3460_v59  ;;  %v3464_v47 = vadd.f32 %v3463_v42, %v5601_v57 }
 0x5e3   : > { %3606 = vst [vmem:[%s5608_s22 + $0x50] sm:$0xff] %v3462_v61 }
 0x5e4   : > { %3607 = vst [vmem:[%s5608_s22 + $0x58] sm:$0xff] %v3464_v47 }
 0x5e6   : > { %v3467_v62 = vpop.f32.mrb[172].mxu0 }
 0x5e7   : > { %v3468_v63 = vadd.f32 %v3467_v62, %v5598_v39  ;;  %v3469_v1 = vpop.f32.mrb[173].mxu0 }
 0x5e8   : > { %v3470_v41 = vadd.f32 %v3469_v1, %v5601_v57  ;;  %v3471_v5 = vpop.f32.mrb[174].mxu0 }
 0x5e9   : > { %3608 = vst [vmem:[%s5608_s22 + $0x60] sm:$0xff] %v3468_v63  ;;  %v3472_v6 = vadd.f32 %v3471_v5, %v5598_v39  ;;  %v3473_v7 = vpop.f32.mrb[175].mxu0 }
 0x5ea   : > { %3609 = vst [vmem:[%s5608_s22 + $0x68] sm:$0xff] %v3470_v41  ;;  %v3474_v8 = vadd.f32 %v3473_v7, %v5601_v57 }
 0x5eb   : > { %3610 = vst [vmem:[%s5608_s22 + $0x70] sm:$0xff] %v3472_v6 }
 0x5ec   : > { %3611 = vst [vmem:[%s5608_s22 + $0x78] sm:$0xff] %v3474_v8 }
 0x5ee   : > { %v3477_v9 = vpop.f32.mrb[176].mxu0 }
 0x5ef   : > { %v3478_v10 = vadd.f32 %v3477_v9, %v5598_v39  ;;  %v3479_v11 = vpop.f32.mrb[177].mxu0 }
 0x5f0   : > { %v3480_v12 = vadd.f32 %v3479_v11, %v5601_v57  ;;  %v3481_v13 = vpop.f32.mrb[178].mxu0 }
 0x5f1   : > { %3612 = vst [vmem:[%s5608_s22 + $0x80] sm:$0xff] %v3478_v10  ;;  %v3482_v14 = vadd.f32 %v3481_v13, %v5598_v39  ;;  %v3483_v15 = vpop.f32.mrb[179].mxu0 }
 0x5f2   : > { %3613 = vst [vmem:[%s5608_s22 + $0x88] sm:$0xff] %v3480_v12  ;;  %v3484_v16 = vadd.f32 %v3483_v15, %v5601_v57 }
 0x5f3   : > { %3614 = vst [vmem:[%s5608_s22 + $0x90] sm:$0xff] %v3482_v14 }
 0x5f4   : > { %3615 = vst [vmem:[%s5608_s22 + $0x98] sm:$0xff] %v3484_v16 }
 0x5f6   : > { %v3487_v17 = vpop.f32.mrb[180].mxu0 }
 0x5f7   : > { %v3488_v18 = vadd.f32 %v3487_v17, %v5598_v39  ;;  %v3489_v19 = vpop.f32.mrb[181].mxu0 }
 0x5f8   : > { %v3490_v3 = vadd.f32 %v3489_v19, %v5601_v57  ;;  %v3491_v4 = vpop.f32.mrb[182].mxu0 }
 0x5f9   : > { %3616 = vst [vmem:[%s5608_s22 + $0xa0] sm:$0xff] %v3488_v18  ;;  %v3492_v20 = vadd.f32 %v3491_v4, %v5598_v39  ;;  %v3493_v21 = vpop.f32.mrb[183].mxu0 }
 0x5fa   : > { %3617 = vst [vmem:[%s5608_s22 + $0xa8] sm:$0xff] %v3490_v3  ;;  %v3494_v22 = vadd.f32 %v3493_v21, %v5601_v57 }
 0x5fb   : > { %3618 = vst [vmem:[%s5608_s22 + $0xb0] sm:$0xff] %v3492_v20 }
 0x5fc   : > { %3619 = vst [vmem:[%s5608_s22 + $0xb8] sm:$0xff] %v3494_v22 }
 0x5fe   : > { %v3497_v23 = vpop.f32.mrb[184].mxu0 }
 0x5ff   : > { %v3498_v26 = vadd.f32 %v3497_v23, %v5598_v39  ;;  %v3499_v28 = vpop.f32.mrb[185].mxu0 }
 0x600   : > { %v3500_v29 = vadd.f32 %v3499_v28, %v5601_v57  ;;  %v3501_v30 = vpop.f32.mrb[186].mxu0 }
 0x601   : > { %3620 = vst [vmem:[%s5608_s22 + $0xc0] sm:$0xff] %v3498_v26  ;;  %v3502_v31 = vadd.f32 %v3501_v30, %v5598_v39  ;;  %v3503_v32 = vpop.f32.mrb[187].mxu0 }
 0x602   : > { %3621 = vst [vmem:[%s5608_s22 + $0xc8] sm:$0xff] %v3500_v29  ;;  %v3504_v33 = vadd.f32 %v3503_v32, %v5601_v57 }
 0x603   : > { %3622 = vst [vmem:[%s5608_s22 + $0xd0] sm:$0xff] %v3502_v31 }
 0x604   : > { %3623 = vst [vmem:[%s5608_s22 + $0xd8] sm:$0xff] %v3504_v33 }
 0x606   : > { %v3507_v34 = vpop.f32.mrb[188].mxu0 }
 0x607   : > { %v3508_v27 = vadd.f32 %v3507_v34, %v5598_v39  ;;  %v3509_v35 = vpop.f32.mrb[189].mxu0 }
 0x608   : > { %v3510_v36 = vadd.f32 %v3509_v35, %v5601_v57  ;;  %v3511_v38 = vpop.f32.mrb[190].mxu0 }
 0x609   : > { %3624 = vst [vmem:[%s5608_s22 + $0xe0] sm:$0xff] %v3508_v27  ;;  %v3512_v25 = vadd.f32 %v3511_v38, %v5598_v39  ;;  %v3513_v37 = vpop.f32.mrb[191].mxu0 }
 0x60a   : > { %3625 = vst [vmem:[%s5608_s22 + $0xe8] sm:$0xff] %v3510_v36  ;;  %v3514_v40 = vadd.f32 %v3513_v37, %v5601_v57 }
 0x60b   : > { %3626 = vst [vmem:[%s5608_s22 + $0xf0] sm:$0xff] %v3512_v25 }
 0x60c   : > { %3627 = vst [vmem:[%s5608_s22 + $0xf8] sm:$0xff] %v3514_v40 }
 0x60e   : > { %v3517_v43 = vpop.f32.mrb[192].mxu0 }
 0x60f   : > { %v3518_v0 = vadd.f32 %v3517_v43, %v5598_v39  ;;  %v3519_v44 = vpop.f32.mrb[193].mxu0 }
 0x610   : > { %v3520_v2 = vadd.f32 %v3519_v44, %v5601_v57  ;;  %v3521_v45 = vpop.f32.mrb[194].mxu0 }
 0x611   : > { %3628 = vst [vmem:[%s5608_s22 + $0x100] sm:$0xff] %v3518_v0  ;;  %v3522_v46 = vadd.f32 %v3521_v45, %v5598_v39  ;;  %v3523_v48 = vpop.f32.mrb[195].mxu0 }
 0x612   : > { %3629 = vst [vmem:[%s5608_s22 + $0x108] sm:$0xff] %v3520_v2  ;;  %v3524_v50 = vadd.f32 %v3523_v48, %v5601_v57 }
 0x613   : > { %3630 = vst [vmem:[%s5608_s22 + $0x110] sm:$0xff] %v3522_v46 }
 0x614   : > { %3631 = vst [vmem:[%s5608_s22 + $0x118] sm:$0xff] %v3524_v50 }
 0x616   : > { %v3527_v51 = vpop.f32.mrb[196].mxu0 }
 0x617   : > { %v3528_v52 = vadd.f32 %v3527_v51, %v5598_v39  ;;  %v3529_v53 = vpop.f32.mrb[197].mxu0 }
 0x618   : > { %v3530_v54 = vadd.f32 %v3529_v53, %v5601_v57  ;;  %v3531_v55 = vpop.f32.mrb[198].mxu0 }
 0x619   : > { %3632 = vst [vmem:[%s5608_s22 + $0x120] sm:$0xff] %v3528_v52  ;;  %v3532_v49 = vadd.f32 %v3531_v55, %v5598_v39  ;;  %v3533_v56 = vpop.f32.mrb[199].mxu0 }
 0x61a   : > { %3633 = vst [vmem:[%s5608_s22 + $0x128] sm:$0xff] %v3530_v54  ;;  %v3534_v58 = vadd.f32 %v3533_v56, %v5601_v57 }
 0x61b   : > { %3634 = vst [vmem:[%s5608_s22 + $0x130] sm:$0xff] %v3532_v49 }
 0x61c   : > { %3635 = vst [vmem:[%s5608_s22 + $0x138] sm:$0xff] %v3534_v58 }
 0x61e   : > { %v3537_v24 = vpop.f32.mrb[200].mxu0 }
 0x61f   : > { %v3538_v59 = vadd.f32 %v3537_v24, %v5598_v39  ;;  %v3539_v60 = vpop.f32.mrb[201].mxu0 }
 0x620   : > { %v3540_v61 = vadd.f32 %v3539_v60, %v5601_v57  ;;  %v3541_v42 = vpop.f32.mrb[202].mxu0 }
 0x621   : > { %3636 = vst [vmem:[%s5608_s22 + $0x140] sm:$0xff] %v3538_v59  ;;  %v3542_v47 = vadd.f32 %v3541_v42, %v5598_v39  ;;  %v3543_v62 = vpop.f32.mrb[203].mxu0 }
 0x622   : > { %3637 = vst [vmem:[%s5608_s22 + $0x148] sm:$0xff] %v3540_v61  ;;  %v3544_v63 = vadd.f32 %v3543_v62, %v5601_v57 }
 0x623   : > { %3638 = vst [vmem:[%s5608_s22 + $0x150] sm:$0xff] %v3542_v47 }
 0x624   : > { %3639 = vst [vmem:[%s5608_s22 + $0x158] sm:$0xff] %v3544_v63 }
 0x626   : > { %v3547_v1 = vpop.f32.mrb[204].mxu0 }
 0x627   : > { %v3548_v41 = vadd.f32 %v3547_v1, %v5598_v39  ;;  %v3549_v5 = vpop.f32.mrb[205].mxu0 }
 0x628   : > { %v3550_v6 = vadd.f32 %v3549_v5, %v5601_v57  ;;  %v3551_v7 = vpop.f32.mrb[206].mxu0 }
 0x629   : > { %3640 = vst [vmem:[%s5608_s22 + $0x160] sm:$0xff] %v3548_v41  ;;  %v3552_v8 = vadd.f32 %v3551_v7, %v5598_v39  ;;  %v3553_v9 = vpop.f32.mrb[207].mxu0 }
 0x62a   : > { %3641 = vst [vmem:[%s5608_s22 + $0x168] sm:$0xff] %v3550_v6  ;;  %v3554_v10 = vadd.f32 %v3553_v9, %v5601_v57 }
 0x62b   : > { %3642 = vst [vmem:[%s5608_s22 + $0x170] sm:$0xff] %v3552_v8 }
 0x62c   : > { %3643 = vst [vmem:[%s5608_s22 + $0x178] sm:$0xff] %v3554_v10 }
 0x62e   : > { %v3557_v11 = vpop.f32.mrb[128].mxu1 }
 0x62f   : > { %v3558_v12 = vadd.f32 %v3557_v11, %v5598_v39  ;;  %v3559_v13 = vpop.f32.mrb[129].mxu1 }
 0x630   : > { %v3560_v14 = vadd.f32 %v3559_v13, %v5601_v57  ;;  %v3561_v15 = vpop.f32.mrb[130].mxu1 }
 0x631   : > { %3644 = vst [vmem:[%s5608_s22 + $0x180] sm:$0xff] %v3558_v12  ;;  %v3562_v16 = vadd.f32 %v3561_v15, %v5598_v39  ;;  %v3563_v17 = vpop.f32.mrb[131].mxu1 }
 0x632   : > { %3645 = vst [vmem:[%s5608_s22 + $0x188] sm:$0xff] %v3560_v14  ;;  %v3564_v18 = vadd.f32 %v3563_v17, %v5601_v57 }
 0x633   : > { %3646 = vst [vmem:[%s5608_s22 + $0x190] sm:$0xff] %v3562_v16 }
 0x634   : > { %3647 = vst [vmem:[%s5608_s22 + $0x198] sm:$0xff] %v3564_v18 }
 0x636   : > { %v3567_v19 = vpop.f32.mrb[132].mxu1 }
 0x637   : > { %v3568_v3 = vadd.f32 %v3567_v19, %v5598_v39  ;;  %v3569_v4 = vpop.f32.mrb[133].mxu1 }
 0x638   : > { %v3570_v20 = vadd.f32 %v3569_v4, %v5601_v57  ;;  %v3571_v21 = vpop.f32.mrb[134].mxu1 }
 0x639   : > { %3648 = vst [vmem:[%s5608_s22 + $0x1a0] sm:$0xff] %v3568_v3  ;;  %v3572_v22 = vadd.f32 %v3571_v21, %v5598_v39  ;;  %v3573_v23 = vpop.f32.mrb[135].mxu1 }
 0x63a   : > { %3649 = vst [vmem:[%s5608_s22 + $0x1a8] sm:$0xff] %v3570_v20  ;;  %v3574_v26 = vadd.f32 %v3573_v23, %v5601_v57 }
 0x63b   : > { %3650 = vst [vmem:[%s5608_s22 + $0x1b0] sm:$0xff] %v3572_v22 }
 0x63c   : > { %3651 = vst [vmem:[%s5608_s22 + $0x1b8] sm:$0xff] %v3574_v26 }
 0x63e   : > { %v3577_v28 = vpop.f32.mrb[136].mxu1 }
 0x63f   : > { %v3578_v29 = vadd.f32 %v3577_v28, %v5598_v39  ;;  %v3579_v30 = vpop.f32.mrb[137].mxu1 }
 0x640   : > { %v3580_v31 = vadd.f32 %v3579_v30, %v5601_v57  ;;  %v3581_v32 = vpop.f32.mrb[138].mxu1 }
 0x641   : > { %3652 = vst [vmem:[%s5608_s22 + $0x1c0] sm:$0xff] %v3578_v29  ;;  %v3582_v33 = vadd.f32 %v3581_v32, %v5598_v39  ;;  %v3583_v34 = vpop.f32.mrb[139].mxu1 }
 0x642   : > { %3653 = vst [vmem:[%s5608_s22 + $0x1c8] sm:$0xff] %v3580_v31  ;;  %v3584_v27 = vadd.f32 %v3583_v34, %v5601_v57 }
 0x643   : > { %3654 = vst [vmem:[%s5608_s22 + $0x1d0] sm:$0xff] %v3582_v33 }
 0x644   : > { %3655 = vst [vmem:[%s5608_s22 + $0x1d8] sm:$0xff] %v3584_v27 }
 0x646   : > { %v3587_v35 = vpop.f32.mrb[140].mxu1 }
 0x647   : > { %v3588_v36 = vadd.f32 %v3587_v35, %v5598_v39  ;;  %v3589_v38 = vpop.f32.mrb[141].mxu1 }
 0x648   : > { %v3590_v25 = vadd.f32 %v3589_v38, %v5601_v57  ;;  %v3591_v37 = vpop.f32.mrb[142].mxu1 }
 0x649   : > { %3656 = vst [vmem:[%s5608_s22 + $0x1e0] sm:$0xff] %v3588_v36  ;;  %v3592_v40 = vadd.f32 %v3591_v37, %v5598_v39  ;;  %v3593_v43 = vpop.f32.mrb[143].mxu1 }
 0x64a   : > { %3657 = vst [vmem:[%s5608_s22 + $0x1e8] sm:$0xff] %v3590_v25  ;;  %v3594_v0 = vadd.f32 %v3593_v43, %v5601_v57 }
 0x64b   : > { %3658 = vst [vmem:[%s5608_s22 + $0x1f0] sm:$0xff] %v3592_v40 }
 0x64c   : > { %3659 = vst [vmem:[%s5608_s22 + $0x1f8] sm:$0xff] %v3594_v0 }
 0x64d PF: > { %s19_s30 = sadd.s32 1, %s4518_s30  }
 0x64e   : > { %p16_p4 = scmp.ge.s32.totalorder %s19_s30, 4  }
 0x650   :  { %18 = sbr.rel (!%p16_p4) target bundleno = 1 (0x1), region = 95 }

</bundles_post_ra>
